<compile_context>
chip_gen: v6e
topology: v6e:2x2x1
jax: 0.10.0
libtpu: 0.0.40
codegen_flags: <defaults>
</compile_context>

<pallas_src>
import jax
import jax.numpy as jnp
from jax.experimental import pallas as pl
from jax.experimental.pallas import tpu as pltpu  # noqa: F401  (TPU backend assumed)

EPS = 1e-10


def user_model_kernel(gidx_ref, item_id_ref, nbu_id_ref, table_ref,
                      wgv1_ref, bgv1_ref, wgv2_ref, bgv2_ref,
                      wia1_ref, bia1_ref, wia2_ref, bia2_ref,
                      wai_ref, bai_ref,
                      wuu1_ref, buu1_ref, wuu2_ref, buu2_ref,
                      wan_ref, ban_ref,
                      wm1_ref, bm1_ref, wm2_ref, bm2_ref, wm3_ref, bm3_ref,
                      out_ref):
    f32 = jnp.float32
    B, D = out_ref.shape               # batch, embedding dim
    BN = nbu_id_ref.shape[0]           # batch * neighbours
    N = BN // B                        # neighbours per user
    R = item_id_ref.shape[0]           # total item rows = B*N*I2 + B*I
    G = BN + B                         # item groups (neighbour groups first, then own)
    P = R // G                         # items per group (sublane aligned, = 8 here)
    V = table_ref.shape[0]             # combined table rows (incl. trailing zero row)
    R_ALL = gidx_ref.shape[0]          # 3*R + BN gather rows

    def dotf(a, b):
        return jnp.dot(a, b, preferred_element_type=f32)

    def relu(x):
        return jnp.maximum(x, 0.0)

    def linear_cat(xa, xb, w_ref, b_ref):
        # y = [xa | xb] @ W + b, without materialising the (rows, 2D) concat.
        w = w_ref[...]
        return dotf(xa, w[:D]) + dotf(xb, w[D:]) + b_ref[...]

    # ---- fused embedding gather: exact one-hot (0/1 rows) matmul on the idle MXU ----
    ids = gidx_ref[...]                                                    # (R_ALL, 1) int32
    onehot = jnp.where(
        ids == jax.lax.broadcasted_iota(jnp.int32, (R_ALL, V), 1), 1.0, 0.0)  # (R_ALL, V)
    emb = dotf(onehot, table_ref[...])                                     # (R_ALL, D)
    xl = emb[0:R]                # g_v input, left  D columns (quirky row order baked in)
    xr = emb[R:2 * R]            # g_v input, right D columns
    ctx = emb[2 * R:3 * R]       # masked user-embedding context per item row
    pnb = emb[3 * R:3 * R + BN]  # neighbour user embeddings

    # ---- g_v MLP over ALL item rows (neighbours' items ++ user's own items) ----
    h = relu(linear_cat(xl, xr, wgv1_ref, bgv1_ref))                       # (R, D)
    xv = dotf(h, wgv2_ref[...]) + bgv2_ref[...]                            # (R, D)

    # ---- shared user_item_attn over all G groups at once (masked exp-softmax) ----
    ha = relu(linear_cat(xv, ctx, wia1_ref, bia1_ref))                     # (R, D)
    logit = jnp.sum(ha * wia2_ref[...], axis=-1, keepdims=True) + bia2_ref[...]   # (R, 1)
    mask_i = jnp.where(item_id_ref[...] > 0, 1.0, 0.0)                     # (R, 1)
    # NOTE: raw exp (no max-subtraction) to match the reference module exactly.
    e = (jnp.exp(logit) * mask_i).reshape(G, P, 1)                         # (G, P, 1)
    a = e / (jnp.sum(e, axis=1, keepdims=True) + EPS)
    h_item = jnp.sum(a * xv.reshape(G, P, D), axis=1)                      # (G, D)

    # ---- aggr_items (shared weights) on both aggregated item representations ----
    h_agg = relu(dotf(h_item, wai_ref[...]) + bai_ref[...])                # (G, D)
    h_oI = h_agg[0:BN]                                                     # (B*N, D)
    h_iI = h_agg[BN:BN + B]                                                # (B, D)

    # ---- user_user_attn over neighbour users ----
    hb = relu(linear_cat(h_oI, pnb, wuu1_ref, buu1_ref))                   # (B*N, D)
    bl = jnp.sum(hb * wuu2_ref[...], axis=-1, keepdims=True) + buu2_ref[...]      # (B*N, 1)
    mask_su = jnp.where(nbu_id_ref[...] > 0, 1.0, 0.0)                     # (B*N, 1)
    eb = (jnp.exp(bl) * mask_su).reshape(B, N, 1)
    beta = eb / (jnp.sum(eb, axis=1, keepdims=True) + EPS)
    h_nb = jnp.sum(beta * h_oI.reshape(B, N, D), axis=1)                   # (B, D)
    h_iS = relu(dotf(h_nb, wan_ref[...]) + ban_ref[...])                   # (B, D)

    # ---- final 3-layer MLP on [h_iI | h_iS], single lane-dense (B, D) store ----
    z = relu(linear_cat(h_iI, h_iS, wm1_ref, bm1_ref))
    z = relu(dotf(z, wm2_ref[...]) + bm2_ref[...])
    z = relu(dotf(z, wm3_ref[...]) + bm3_ref[...])
    out_ref[...] = z


@jax.jit
def user_model_forward(uids, u_item_pad, u_user_pad, u_user_item_pad, params):
    """Pallas-backed UserModel forward. Returns (B, D) float32."""
    D = params['user_emb'].shape[-1]
    n_items = params['item_emb'].shape[0]
    n_ratings = params['rating_emb'].shape[0]
    n_users = params['user_emb'].shape[0]
    B, I, _ = u_item_pad.shape
    N = u_user_pad.shape[1]
    I2 = u_user_item_pad.shape[2]
    assert I == I2, "fused attention pass assumes items-per-user == items-per-neighbour"
    i32 = jnp.int32
    BN = B * N
    R = BN * I2 + B * I

    RAT_OFF = n_items
    USER_OFF = n_items + n_ratings
    ZERO_ROW = USER_OFF + n_users        # index of the appended all-zeros table row

    # combined embedding table (+1 zero row used to mask attention-context rows)
    table = jnp.concatenate(
        [params['item_emb'], params['rating_emb'], params['user_emb'],
         jnp.zeros((1, D), jnp.float32)], axis=0)                           # (V, D)

    # ---------- int32 index plumbing (the only wrapper-side glue; a few KB) ----------
    # Neighbours' items: the reference concatenates q/er along the ITEM axis before the flat
    # .view(-1, 2D); pairing consecutive entries reproduces that quirk exactly.
    nq = u_user_item_pad[:, :, :, 0]                                        # (B, N, I2)
    nr = u_user_item_pad[:, :, :, 1] + RAT_OFF
    n_lr = jnp.concatenate([nq, nr], axis=2).reshape(BN * I2, 2)            # (B*N*I2, 2)
    # User's own items: plain [item | rating] rows.
    u_lr = jnp.stack([u_item_pad[:, :, 0].reshape(-1),
                      u_item_pad[:, :, 1].reshape(-1) + RAT_OFF], axis=1)   # (B*I, 2)
    lr = jnp.concatenate([n_lr, u_lr], axis=0)                              # (R, 2) nbrs first
    gv_left, gv_right = lr[:, 0:1], lr[:, 1:2]

    # Per-item-row ids (normal order) -> softmax masks and attention-context user rows.
    item_rows = jnp.concatenate(
        [nq.reshape(-1), u_item_pad[:, :, 0].reshape(-1)], axis=0)          # (R,)
    ctx_user = jnp.concatenate(
        [jnp.broadcast_to(u_user_pad[:, :, None], (B, N, I2)).reshape(-1),
         jnp.broadcast_to(uids[:, None], (B, I)).reshape(-1)], axis=0)      # (R,)
    ctx_idx = jnp.where(item_rows > 0, ctx_user + USER_OFF, ZERO_ROW).reshape(R, 1)

    nbu_rows = u_user_pad.reshape(BN, 1)                                    # raw neighbour ids
    pnb_idx = nbu_rows + USER_OFF

    gidx = jnp.concatenate([gv_left, gv_right, ctx_idx, pnb_idx], axis=0).astype(i32)

    out = pl.pallas_call(
        user_model_kernel,
        out_shape=jax.ShapeDtypeStruct((B, D), jnp.float32),
        # gridless: every operand is tiny and VMEM-resident; one kernel invocation.
        # TODO(synk): once B is non-trivial, add a "parallel" batch grid axis so the second
        # v7x TensorCore is used, and re-budget VMEM for its 64 MiB limit.
    )(gidx, item_rows.reshape(R, 1).astype(i32), nbu_rows.astype(i32), table,
      params['w_gv1'], params['b_gv1'], params['w_gv2'], params['b_gv2'],
      params['w_ia1'], params['b_ia1'], params['w_ia2'], params['b_ia2'],
      params['w_ai'], params['b_ai'],
      params['w_uu1'], params['b_uu1'], params['w_uu2'], params['b_uu2'],
      params['w_an'], params['b_an'],
      params['w_m1'], params['b_m1'], params['w_m2'], params['b_m2'],
      params['w_m3'], params['b_m3'])
    return out


def user_model_ref(uids, u_item_pad, u_user_pad, u_user_item_pad, p):
    """Pure-JAX mirror of the PyTorch UserModel.forward (including its concat-dim quirks)."""
    D = p['user_emb'].shape[-1]
    B, I, _ = u_item_pad.shape
    N = u_user_pad.shape[1]
    I2 = u_user_item_pad.shape[2]
    relu = jax.nn.relu

    def g_v(x):
        return relu(x @ p['w_gv1'] + p['b_gv1'][0]) @ p['w_gv2'] + p['b_gv2'][0]

    def user_item_attn(x):
        return relu(x @ p['w_ia1'] + p['b_ia1'][0]) @ p['w_ia2'].T + p['b_ia2'][0, 0]

    def user_user_attn(x):
        return relu(x @ p['w_uu1'] + p['b_uu1'][0]) @ p['w_uu2'].T + p['b_uu2'][0, 0]

    def aggr_items(x):
        return relu(x @ p['w_ai'] + p['b_ai'][0])

    def aggr_neighbors(x):
        return relu(x @ p['w_an'] + p['b_an'][0])

    # user's own items
    q_a = p['item_emb'][u_item_pad[:, :, 0]]
    er = p['rating_emb'][u_item_pad[:, :, 1]]
    x_ia = g_v(jnp.concatenate([q_a, er], axis=2).reshape(-1, 2 * D)).reshape(B, I, D)
    mask_u = (u_item_pad[:, :, 0] > 0).astype(jnp.float32)
    p_i = mask_u[:, :, None] * p['user_emb'][uids][:, None, :]
    alpha = user_item_attn(jnp.concatenate([x_ia, p_i], axis=2).reshape(-1, 2 * D)).reshape(B, I)
    alpha = jnp.exp(alpha) * mask_u
    alpha = alpha / (jnp.sum(alpha, axis=1, keepdims=True) + EPS)
    h_iI = aggr_items(jnp.sum(alpha[:, :, None] * x_ia, axis=1))

    # neighbours' items (concat on axis=2, the ITEM axis, exactly as the PyTorch reference)
    q_a_s = p['item_emb'][u_user_item_pad[:, :, :, 0]]
    er_s = p['rating_emb'][u_user_item_pad[:, :, :, 1]]
    x_ia_s = g_v(jnp.concatenate([q_a_s, er_s], axis=2).reshape(-1, 2 * D)).reshape(B, N, I2, D)
    mask_s = (u_user_item_pad[:, :, :, 0] > 0).astype(jnp.float32)
    p_i_s = mask_s[..., None] * p['user_emb'][u_user_pad][:, :, None, :]
    alpha_s = user_item_attn(
        jnp.concatenate([x_ia_s, p_i_s], axis=3).reshape(-1, 2 * D)).reshape(B, N, I2)
    alpha_s = jnp.exp(alpha_s) * mask_s
    alpha_s = alpha_s / (jnp.sum(alpha_s, axis=2, keepdims=True) + EPS)
    h_oI_tmp = jnp.sum(alpha_s[..., None] * x_ia_s, axis=2)                  # (B, N, D)
    h_oI = aggr_items(h_oI_tmp.reshape(-1, D)).reshape(B, N, D)

    # neighbour-user attention
    beta = user_user_attn(
        jnp.concatenate([h_oI, p['user_emb'][u_user_pad]], axis=2).reshape(-1, 2 * D)).reshape(B, N)
    mask_su = (u_user_pad > 0).astype(jnp.float32)
    beta = jnp.exp(beta) * mask_su
    beta = beta / (jnp.sum(beta, axis=1, keepdims=True) + EPS)
    h_iS = aggr_neighbors(jnp.sum(beta[:, :, None] * h_oI, axis=1))

    # final MLP
    h = jnp.concatenate([h_iI, h_iS], axis=1)
    h = relu(h @ p['w_m1'] + p['b_m1'][0])
    h = relu(h @ p['w_m2'] + p['b_m2'][0])
    h = relu(h @ p['w_m3'] + p['b_m3'][0])
    return h


def init_params(key, emb_dim, n_users, n_items, n_ratings):
    D = emb_dim
    ks = iter(jax.random.split(key, 32))
    w = lambda shape: (0.1 * jax.random.normal(next(ks), shape)).astype(jnp.float32)
    return dict(
        user_emb=w((n_users, D)), item_emb=w((n_items, D)), rating_emb=w((n_ratings, D)),
        # g_v = MLP(2D, D): Linear(2D, D) -> ReLU -> Linear(D, D)
        w_gv1=w((2 * D, D)), b_gv1=w((1, D)), w_gv2=w((D, D)), b_gv2=w((1, D)),
        # user_item_attn = MLP(2D, 1): Linear(2D, D) -> ReLU -> Linear(D, 1)
        w_ia1=w((2 * D, D)), b_ia1=w((1, D)), w_ia2=w((1, D)), b_ia2=w((1, 1)),
        # aggr_items = Linear(D, D) -> ReLU
        w_ai=w((D, D)), b_ai=w((1, D)),
        # user_user_attn = MLP(2D, 1)
        w_uu1=w((2 * D, D)), b_uu1=w((1, D)), w_uu2=w((1, D)), b_uu2=w((1, 1)),
        # aggr_neighbors = Linear(D, D) -> ReLU
        w_an=w((D, D)), b_an=w((1, D)),
        # final mlp: Linear(2D, D)+ReLU, Linear(D, D)+ReLU, Linear(D, D)+ReLU
        w_m1=w((2 * D, D)), b_m1=w((1, D)),
        w_m2=w((D, D)), b_m2=w((1, D)),
        w_m3=w((D, D)), b_m3=w((1, D)),
    )


if __name__ == "__main__":
    # small shapes; I = N = I2 = 8 keeps in-kernel group reshapes sublane-tile aligned.
    B, I, N, I2, D = 4, 8, 8, 8, 32
    n_users, n_items, n_ratings = 20, 12, 6

    key = jax.random.PRNGKey(0)
    kp, k1, k2, k3, k4, k5 = jax.random.split(key, 6)
    params = init_params(kp, D, n_users, n_items, n_ratings)

    uids = jax.random.randint(k1, (B,), 0, n_users, dtype=jnp.int32)
    # id 0 acts as padding (masked out), matching the PyTorch mask semantics.
    u_item_pad = jnp.stack(
        [jax.random.randint(k2, (B, I), 0, n_items, dtype=jnp.int32),
         jax.random.randint(k3, (B, I), 0, n_ratings, dtype=jnp.int32)], axis=-1)      # (B, I, 2)
    u_user_pad = jax.random.randint(k4, (B, N), 0, n_users, dtype=jnp.int32)           # (B, N)
    kk1, kk2 = jax.random.split(k5)
    u_user_item_pad = jnp.stack(
        [jax.random.randint(kk1, (B, N, I2), 0, n_items, dtype=jnp.int32),
         jax.random.randint(kk2, (B, N, I2), 0, n_ratings, dtype=jnp.int32)], axis=-1)  # (B,N,I2,2)

    out = jax.block_until_ready(
        user_model_forward(uids, u_item_pad, u_user_pad, u_user_item_pad, params))
    ref = user_model_ref(uids, u_item_pad, u_user_pad, u_user_item_pad, params)

    assert out.shape == (B, D)
    err = jnp.max(jnp.abs(out - ref))
    # Tolerance 1e-4: the in-kernel one-hot gather and split-K matmuls go through the MXU's
    # multi-pass f32 path, whose rounding can differ from the XLA reference at the ~1e-6 level.
    assert jnp.allclose(out, ref, atol=1e-4, rtol=1e-4), f"max abs err {err}"
    print("KERNEL_OK")
</pallas_src>

<mosaic_0001>
module attributes {stable_mosaic.version = 11 : i64} {
  func.func @user_model_kernel(%arg0: memref<896x1xi32, #tpu.memory_space<vmem>>, %arg1: memref<288x1xi32, #tpu.memory_space<vmem>>, %arg2: memref<32x1xi32, #tpu.memory_space<vmem>>, %arg3: memref<39x32xf32, #tpu.memory_space<vmem>>, %arg4: memref<64x32xf32, #tpu.memory_space<vmem>>, %arg5: memref<1x32xf32, #tpu.memory_space<vmem>>, %arg6: memref<32x32xf32, #tpu.memory_space<vmem>>, %arg7: memref<1x32xf32, #tpu.memory_space<vmem>>, %arg8: memref<64x32xf32, #tpu.memory_space<vmem>>, %arg9: memref<1x32xf32, #tpu.memory_space<vmem>>, %arg10: memref<1x32xf32, #tpu.memory_space<vmem>>, %arg11: memref<1x1xf32, #tpu.memory_space<vmem>>, %arg12: memref<32x32xf32, #tpu.memory_space<vmem>>, %arg13: memref<1x32xf32, #tpu.memory_space<vmem>>, %arg14: memref<64x32xf32, #tpu.memory_space<vmem>>, %arg15: memref<1x32xf32, #tpu.memory_space<vmem>>, %arg16: memref<1x32xf32, #tpu.memory_space<vmem>>, %arg17: memref<1x1xf32, #tpu.memory_space<vmem>>, %arg18: memref<32x32xf32, #tpu.memory_space<vmem>>, %arg19: memref<1x32xf32, #tpu.memory_space<vmem>>, %arg20: memref<64x32xf32, #tpu.memory_space<vmem>>, %arg21: memref<1x32xf32, #tpu.memory_space<vmem>>, %arg22: memref<32x32xf32, #tpu.memory_space<vmem>>, %arg23: memref<1x32xf32, #tpu.memory_space<vmem>>, %arg24: memref<32x32xf32, #tpu.memory_space<vmem>>, %arg25: memref<1x32xf32, #tpu.memory_space<vmem>>, %arg26: memref<4x32xf32, #tpu.memory_space<vmem>>) attributes {dimension_semantics = [], scalar_prefetch = 0 : i64, scratch_operands = 0 : i64, tpu.core_type = #tpu.core_type<tc>} {
    %c0 = arith.constant 0 : index
    %c0_0 = arith.constant 0 : index
    %0 = vector.load %arg0[%c0, %c0_0] : memref<896x1xi32, #tpu.memory_space<vmem>>, vector<896x1xi32>
    %1 = tpu.iota {dimensions = array<i32: 1>} : vector<896x39xi32>
    %2 = vector.broadcast %0 : vector<896x1xi32> to vector<896x39xi32>
    %3 = arith.cmpi eq, %2, %1 : vector<896x39xi32>
    %cst = arith.constant 1.000000e+00 : f32
    %cst_1 = arith.constant 0.000000e+00 : f32
    %4 = vector.broadcast %cst : f32 to vector<896x39xf32>
    %5 = vector.broadcast %cst_1 : f32 to vector<896x39xf32>
    %6 = arith.select %3, %4, %5 : vector<896x39xi1>, vector<896x39xf32>
    %c0_2 = arith.constant 0 : index
    %c0_3 = arith.constant 0 : index
    %7 = vector.load %arg3[%c0_2, %c0_3] : memref<39x32xf32, #tpu.memory_space<vmem>>, vector<39x32xf32>
    %cst_4 = arith.constant dense<0.000000e+00> : vector<896x32xf32>
    %8 = tpu.matmul %6, %7, %cst_4 {dimension_numbers = #tpu.dot_dimension_numbers<[1], [0], [0], [1], [0, 0, 1, 1], [], []>} : vector<896x39xf32>, vector<39x32xf32>, vector<896x32xf32> -> vector<896x32xf32>
    %9 = vector.extract_strided_slice %8 {offsets = [0, 0], sizes = [288, 32], strides = [1, 1]} : vector<896x32xf32> to vector<288x32xf32>
    %10 = vector.extract_strided_slice %8 {offsets = [288, 0], sizes = [288, 32], strides = [1, 1]} : vector<896x32xf32> to vector<288x32xf32>
    %11 = vector.extract_strided_slice %8 {offsets = [576, 0], sizes = [288, 32], strides = [1, 1]} : vector<896x32xf32> to vector<288x32xf32>
    %12 = vector.extract_strided_slice %8 {offsets = [864, 0], sizes = [32, 32], strides = [1, 1]} : vector<896x32xf32> to vector<32x32xf32>
    %c0_5 = arith.constant 0 : index
    %c0_6 = arith.constant 0 : index
    %13 = vector.load %arg4[%c0_5, %c0_6] : memref<64x32xf32, #tpu.memory_space<vmem>>, vector<64x32xf32>
    %14 = vector.extract_strided_slice %13 {offsets = [0, 0], sizes = [32, 32], strides = [1, 1]} : vector<64x32xf32> to vector<32x32xf32>
    %cst_7 = arith.constant dense<0.000000e+00> : vector<288x32xf32>
    %15 = tpu.matmul %9, %14, %cst_7 {dimension_numbers = #tpu.dot_dimension_numbers<[1], [0], [0], [1], [0, 0, 1, 1], [], []>} : vector<288x32xf32>, vector<32x32xf32>, vector<288x32xf32> -> vector<288x32xf32>
    %16 = vector.extract_strided_slice %13 {offsets = [32, 0], sizes = [32, 32], strides = [1, 1]} : vector<64x32xf32> to vector<32x32xf32>
    %cst_8 = arith.constant dense<0.000000e+00> : vector<288x32xf32>
    %17 = tpu.matmul %10, %16, %cst_8 {dimension_numbers = #tpu.dot_dimension_numbers<[1], [0], [0], [1], [0, 0, 1, 1], [], []>} : vector<288x32xf32>, vector<32x32xf32>, vector<288x32xf32> -> vector<288x32xf32>
    %18 = arith.addf %15, %17 : vector<288x32xf32>
    %c0_9 = arith.constant 0 : index
    %c0_10 = arith.constant 0 : index
    %19 = vector.load %arg5[%c0_9, %c0_10] : memref<1x32xf32, #tpu.memory_space<vmem>>, vector<1x32xf32>
    %20 = vector.broadcast %19 : vector<1x32xf32> to vector<288x32xf32>
    %21 = arith.addf %18, %20 : vector<288x32xf32>
    %cst_11 = arith.constant 0.000000e+00 : f32
    %22 = vector.broadcast %cst_11 : f32 to vector<288x32xf32>
    %23 = arith.maximumf %21, %22 : vector<288x32xf32>
    %c0_12 = arith.constant 0 : index
    %c0_13 = arith.constant 0 : index
    %24 = vector.load %arg6[%c0_12, %c0_13] : memref<32x32xf32, #tpu.memory_space<vmem>>, vector<32x32xf32>
    %cst_14 = arith.constant dense<0.000000e+00> : vector<288x32xf32>
    %25 = tpu.matmul %23, %24, %cst_14 {dimension_numbers = #tpu.dot_dimension_numbers<[1], [0], [0], [1], [0, 0, 1, 1], [], []>} : vector<288x32xf32>, vector<32x32xf32>, vector<288x32xf32> -> vector<288x32xf32>
    %c0_15 = arith.constant 0 : index
    %c0_16 = arith.constant 0 : index
    %26 = vector.load %arg7[%c0_15, %c0_16] : memref<1x32xf32, #tpu.memory_space<vmem>>, vector<1x32xf32>
    %27 = vector.broadcast %26 : vector<1x32xf32> to vector<288x32xf32>
    %28 = arith.addf %25, %27 : vector<288x32xf32>
    %c0_17 = arith.constant 0 : index
    %c0_18 = arith.constant 0 : index
    %29 = vector.load %arg8[%c0_17, %c0_18] : memref<64x32xf32, #tpu.memory_space<vmem>>, vector<64x32xf32>
    %30 = vector.extract_strided_slice %29 {offsets = [0, 0], sizes = [32, 32], strides = [1, 1]} : vector<64x32xf32> to vector<32x32xf32>
    %cst_19 = arith.constant dense<0.000000e+00> : vector<288x32xf32>
    %31 = tpu.matmul %28, %30, %cst_19 {dimension_numbers = #tpu.dot_dimension_numbers<[1], [0], [0], [1], [0, 0, 1, 1], [], []>} : vector<288x32xf32>, vector<32x32xf32>, vector<288x32xf32> -> vector<288x32xf32>
    %32 = vector.extract_strided_slice %29 {offsets = [32, 0], sizes = [32, 32], strides = [1, 1]} : vector<64x32xf32> to vector<32x32xf32>
    %cst_20 = arith.constant dense<0.000000e+00> : vector<288x32xf32>
    %33 = tpu.matmul %11, %32, %cst_20 {dimension_numbers = #tpu.dot_dimension_numbers<[1], [0], [0], [1], [0, 0, 1, 1], [], []>} : vector<288x32xf32>, vector<32x32xf32>, vector<288x32xf32> -> vector<288x32xf32>
    %34 = arith.addf %31, %33 : vector<288x32xf32>
    %c0_21 = arith.constant 0 : index
    %c0_22 = arith.constant 0 : index
    %35 = vector.load %arg9[%c0_21, %c0_22] : memref<1x32xf32, #tpu.memory_space<vmem>>, vector<1x32xf32>
    %36 = vector.broadcast %35 : vector<1x32xf32> to vector<288x32xf32>
    %37 = arith.addf %34, %36 : vector<288x32xf32>
    %cst_23 = arith.constant 0.000000e+00 : f32
    %38 = vector.broadcast %cst_23 : f32 to vector<288x32xf32>
    %39 = arith.maximumf %37, %38 : vector<288x32xf32>
    %c0_24 = arith.constant 0 : index
    %c0_25 = arith.constant 0 : index
    %40 = vector.load %arg10[%c0_24, %c0_25] : memref<1x32xf32, #tpu.memory_space<vmem>>, vector<1x32xf32>
    %41 = vector.broadcast %40 : vector<1x32xf32> to vector<288x32xf32>
    %42 = arith.mulf %39, %41 : vector<288x32xf32>
    %cst_26 = arith.constant dense<0.000000e+00> : vector<288xf32>
    %43 = vector.multi_reduction <add>, %42, %cst_26 [1] : vector<288x32xf32> to vector<288xf32>
    %44 = vector.shape_cast %43 : vector<288xf32> to vector<288x1xf32>
    %c0_27 = arith.constant 0 : index
    %c0_28 = arith.constant 0 : index
    %45 = vector.load %arg11[%c0_27, %c0_28] : memref<1x1xf32, #tpu.memory_space<vmem>>, vector<1x1xf32>
    %46 = vector.broadcast %45 : vector<1x1xf32> to vector<288x1xf32>
    %47 = arith.addf %44, %46 : vector<288x1xf32>
    %c0_29 = arith.constant 0 : index
    %c0_30 = arith.constant 0 : index
    %48 = vector.load %arg1[%c0_29, %c0_30] : memref<288x1xi32, #tpu.memory_space<vmem>>, vector<288x1xi32>
    %c0_i32 = arith.constant 0 : i32
    %49 = vector.broadcast %c0_i32 : i32 to vector<288x1xi32>
    %50 = arith.cmpi sgt, %48, %49 : vector<288x1xi32>
    %cst_31 = arith.constant 1.000000e+00 : f32
    %cst_32 = arith.constant 0.000000e+00 : f32
    %51 = vector.broadcast %cst_31 : f32 to vector<288x1xf32>
    %52 = vector.broadcast %cst_32 : f32 to vector<288x1xf32>
    %53 = arith.select %50, %51, %52 : vector<288x1xi1>, vector<288x1xf32>
    %54 = math.exp %47 : vector<288x1xf32>
    %55 = arith.mulf %54, %53 : vector<288x1xf32>
    %56 = vector.shape_cast %55 : vector<288x1xf32> to vector<36x8x1xf32>
    %cst_33 = arith.constant dense<0.000000e+00> : vector<36x1xf32>
    %57 = vector.multi_reduction <add>, %56, %cst_33 [1] : vector<36x8x1xf32> to vector<36x1xf32>
    %58 = vector.shape_cast %57 : vector<36x1xf32> to vector<36x1x1xf32>
    %cst_34 = arith.constant 1.000000e-10 : f32
    %59 = vector.broadcast %cst_34 : f32 to vector<36x1x1xf32>
    %60 = arith.addf %58, %59 : vector<36x1x1xf32>
    %61 = vector.broadcast %60 : vector<36x1x1xf32> to vector<36x8x1xf32>
    %62 = arith.divf %56, %61 : vector<36x8x1xf32>
    %63 = vector.shape_cast %28 : vector<288x32xf32> to vector<36x8x32xf32>
    %64 = vector.broadcast %62 : vector<36x8x1xf32> to vector<36x8x32xf32>
    %65 = arith.mulf %64, %63 : vector<36x8x32xf32>
    %cst_35 = arith.constant dense<0.000000e+00> : vector<36x32xf32>
    %66 = vector.multi_reduction <add>, %65, %cst_35 [1] : vector<36x8x32xf32> to vector<36x32xf32>
    %c0_36 = arith.constant 0 : index
    %c0_37 = arith.constant 0 : index
    %67 = vector.load %arg12[%c0_36, %c0_37] : memref<32x32xf32, #tpu.memory_space<vmem>>, vector<32x32xf32>
    %cst_38 = arith.constant dense<0.000000e+00> : vector<36x32xf32>
    %68 = tpu.matmul %66, %67, %cst_38 {dimension_numbers = #tpu.dot_dimension_numbers<[1], [0], [0], [1], [0, 0, 1, 1], [], []>} : vector<36x32xf32>, vector<32x32xf32>, vector<36x32xf32> -> vector<36x32xf32>
    %c0_39 = arith.constant 0 : index
    %c0_40 = arith.constant 0 : index
    %69 = vector.load %arg13[%c0_39, %c0_40] : memref<1x32xf32, #tpu.memory_space<vmem>>, vector<1x32xf32>
    %70 = vector.broadcast %69 : vector<1x32xf32> to vector<36x32xf32>
    %71 = arith.addf %68, %70 : vector<36x32xf32>
    %cst_41 = arith.constant 0.000000e+00 : f32
    %72 = vector.broadcast %cst_41 : f32 to vector<36x32xf32>
    %73 = arith.maximumf %71, %72 : vector<36x32xf32>
    %74 = vector.extract_strided_slice %73 {offsets = [0, 0], sizes = [32, 32], strides = [1, 1]} : vector<36x32xf32> to vector<32x32xf32>
    %75 = vector.extract_strided_slice %73 {offsets = [32, 0], sizes = [4, 32], strides = [1, 1]} : vector<36x32xf32> to vector<4x32xf32>
    %c0_42 = arith.constant 0 : index
    %c0_43 = arith.constant 0 : index
    %76 = vector.load %arg14[%c0_42, %c0_43] : memref<64x32xf32, #tpu.memory_space<vmem>>, vector<64x32xf32>
    %77 = vector.extract_strided_slice %76 {offsets = [0, 0], sizes = [32, 32], strides = [1, 1]} : vector<64x32xf32> to vector<32x32xf32>
    %cst_44 = arith.constant dense<0.000000e+00> : vector<32x32xf32>
    %78 = tpu.matmul %74, %77, %cst_44 {dimension_numbers = #tpu.dot_dimension_numbers<[1], [0], [0], [1], [0, 0, 1, 1], [], []>} : vector<32x32xf32>, vector<32x32xf32>, vector<32x32xf32> -> vector<32x32xf32>
    %79 = vector.extract_strided_slice %76 {offsets = [32, 0], sizes = [32, 32], strides = [1, 1]} : vector<64x32xf32> to vector<32x32xf32>
    %cst_45 = arith.constant dense<0.000000e+00> : vector<32x32xf32>
    %80 = tpu.matmul %12, %79, %cst_45 {dimension_numbers = #tpu.dot_dimension_numbers<[1], [0], [0], [1], [0, 0, 1, 1], [], []>} : vector<32x32xf32>, vector<32x32xf32>, vector<32x32xf32> -> vector<32x32xf32>
    %81 = arith.addf %78, %80 : vector<32x32xf32>
    %c0_46 = arith.constant 0 : index
    %c0_47 = arith.constant 0 : index
    %82 = vector.load %arg15[%c0_46, %c0_47] : memref<1x32xf32, #tpu.memory_space<vmem>>, vector<1x32xf32>
    %83 = vector.broadcast %82 : vector<1x32xf32> to vector<32x32xf32>
    %84 = arith.addf %81, %83 : vector<32x32xf32>
    %cst_48 = arith.constant 0.000000e+00 : f32
    %85 = vector.broadcast %cst_48 : f32 to vector<32x32xf32>
    %86 = arith.maximumf %84, %85 : vector<32x32xf32>
    %c0_49 = arith.constant 0 : index
    %c0_50 = arith.constant 0 : index
    %87 = vector.load %arg16[%c0_49, %c0_50] : memref<1x32xf32, #tpu.memory_space<vmem>>, vector<1x32xf32>
    %88 = vector.broadcast %87 : vector<1x32xf32> to vector<32x32xf32>
    %89 = arith.mulf %86, %88 : vector<32x32xf32>
    %cst_51 = arith.constant dense<0.000000e+00> : vector<32xf32>
    %90 = vector.multi_reduction <add>, %89, %cst_51 [1] : vector<32x32xf32> to vector<32xf32>
    %91 = vector.shape_cast %90 : vector<32xf32> to vector<32x1xf32>
    %c0_52 = arith.constant 0 : index
    %c0_53 = arith.constant 0 : index
    %92 = vector.load %arg17[%c0_52, %c0_53] : memref<1x1xf32, #tpu.memory_space<vmem>>, vector<1x1xf32>
    %93 = vector.broadcast %92 : vector<1x1xf32> to vector<32x1xf32>
    %94 = arith.addf %91, %93 : vector<32x1xf32>
    %c0_54 = arith.constant 0 : index
    %c0_55 = arith.constant 0 : index
    %95 = vector.load %arg2[%c0_54, %c0_55] : memref<32x1xi32, #tpu.memory_space<vmem>>, vector<32x1xi32>
    %c0_i32_56 = arith.constant 0 : i32
    %96 = vector.broadcast %c0_i32_56 : i32 to vector<32x1xi32>
    %97 = arith.cmpi sgt, %95, %96 : vector<32x1xi32>
    %cst_57 = arith.constant 1.000000e+00 : f32
    %cst_58 = arith.constant 0.000000e+00 : f32
    %98 = vector.broadcast %cst_57 : f32 to vector<32x1xf32>
    %99 = vector.broadcast %cst_58 : f32 to vector<32x1xf32>
    %100 = arith.select %97, %98, %99 : vector<32x1xi1>, vector<32x1xf32>
    %101 = math.exp %94 : vector<32x1xf32>
    %102 = arith.mulf %101, %100 : vector<32x1xf32>
    %103 = vector.shape_cast %102 : vector<32x1xf32> to vector<4x8x1xf32>
    %cst_59 = arith.constant dense<0.000000e+00> : vector<4x1xf32>
    %104 = vector.multi_reduction <add>, %103, %cst_59 [1] : vector<4x8x1xf32> to vector<4x1xf32>
    %105 = vector.shape_cast %104 : vector<4x1xf32> to vector<4x1x1xf32>
    %cst_60 = arith.constant 1.000000e-10 : f32
    %106 = vector.broadcast %cst_60 : f32 to vector<4x1x1xf32>
    %107 = arith.addf %105, %106 : vector<4x1x1xf32>
    %108 = vector.broadcast %107 : vector<4x1x1xf32> to vector<4x8x1xf32>
    %109 = arith.divf %103, %108 : vector<4x8x1xf32>
    %110 = vector.shape_cast %74 : vector<32x32xf32> to vector<4x8x32xf32>
    %111 = vector.broadcast %109 : vector<4x8x1xf32> to vector<4x8x32xf32>
    %112 = arith.mulf %111, %110 : vector<4x8x32xf32>
    %cst_61 = arith.constant dense<0.000000e+00> : vector<4x32xf32>
    %113 = vector.multi_reduction <add>, %112, %cst_61 [1] : vector<4x8x32xf32> to vector<4x32xf32>
    %c0_62 = arith.constant 0 : index
    %c0_63 = arith.constant 0 : index
    %114 = vector.load %arg18[%c0_62, %c0_63] : memref<32x32xf32, #tpu.memory_space<vmem>>, vector<32x32xf32>
    %cst_64 = arith.constant dense<0.000000e+00> : vector<4x32xf32>
    %115 = tpu.matmul %113, %114, %cst_64 {dimension_numbers = #tpu.dot_dimension_numbers<[1], [0], [0], [1], [0, 0, 1, 1], [], []>} : vector<4x32xf32>, vector<32x32xf32>, vector<4x32xf32> -> vector<4x32xf32>
    %c0_65 = arith.constant 0 : index
    %c0_66 = arith.constant 0 : index
    %116 = vector.load %arg19[%c0_65, %c0_66] : memref<1x32xf32, #tpu.memory_space<vmem>>, vector<1x32xf32>
    %117 = vector.broadcast %116 : vector<1x32xf32> to vector<4x32xf32>
    %118 = arith.addf %115, %117 : vector<4x32xf32>
    %cst_67 = arith.constant 0.000000e+00 : f32
    %119 = vector.broadcast %cst_67 : f32 to vector<4x32xf32>
    %120 = arith.maximumf %118, %119 : vector<4x32xf32>
    %c0_68 = arith.constant 0 : index
    %c0_69 = arith.constant 0 : index
    %121 = vector.load %arg20[%c0_68, %c0_69] : memref<64x32xf32, #tpu.memory_space<vmem>>, vector<64x32xf32>
    %122 = vector.extract_strided_slice %121 {offsets = [0, 0], sizes = [32, 32], strides = [1, 1]} : vector<64x32xf32> to vector<32x32xf32>
    %cst_70 = arith.constant dense<0.000000e+00> : vector<4x32xf32>
    %123 = tpu.matmul %75, %122, %cst_70 {dimension_numbers = #tpu.dot_dimension_numbers<[1], [0], [0], [1], [0, 0, 1, 1], [], []>} : vector<4x32xf32>, vector<32x32xf32>, vector<4x32xf32> -> vector<4x32xf32>
    %124 = vector.extract_strided_slice %121 {offsets = [32, 0], sizes = [32, 32], strides = [1, 1]} : vector<64x32xf32> to vector<32x32xf32>
    %cst_71 = arith.constant dense<0.000000e+00> : vector<4x32xf32>
    %125 = tpu.matmul %120, %124, %cst_71 {dimension_numbers = #tpu.dot_dimension_numbers<[1], [0], [0], [1], [0, 0, 1, 1], [], []>} : vector<4x32xf32>, vector<32x32xf32>, vector<4x32xf32> -> vector<4x32xf32>
    %126 = arith.addf %123, %125 : vector<4x32xf32>
    %c0_72 = arith.constant 0 : index
    %c0_73 = arith.constant 0 : index
    %127 = vector.load %arg21[%c0_72, %c0_73] : memref<1x32xf32, #tpu.memory_space<vmem>>, vector<1x32xf32>
    %128 = vector.broadcast %127 : vector<1x32xf32> to vector<4x32xf32>
    %129 = arith.addf %126, %128 : vector<4x32xf32>
    %cst_74 = arith.constant 0.000000e+00 : f32
    %130 = vector.broadcast %cst_74 : f32 to vector<4x32xf32>
    %131 = arith.maximumf %129, %130 : vector<4x32xf32>
    %c0_75 = arith.constant 0 : index
    %c0_76 = arith.constant 0 : index
    %132 = vector.load %arg22[%c0_75, %c0_76] : memref<32x32xf32, #tpu.memory_space<vmem>>, vector<32x32xf32>
    %cst_77 = arith.constant dense<0.000000e+00> : vector<4x32xf32>
    %133 = tpu.matmul %131, %132, %cst_77 {dimension_numbers = #tpu.dot_dimension_numbers<[1], [0], [0], [1], [0, 0, 1, 1], [], []>} : vector<4x32xf32>, vector<32x32xf32>, vector<4x32xf32> -> vector<4x32xf32>
    %c0_78 = arith.constant 0 : index
    %c0_79 = arith.constant 0 : index
    %134 = vector.load %arg23[%c0_78, %c0_79] : memref<1x32xf32, #tpu.memory_space<vmem>>, vector<1x32xf32>
    %135 = vector.broadcast %134 : vector<1x32xf32> to vector<4x32xf32>
    %136 = arith.addf %133, %135 : vector<4x32xf32>
    %cst_80 = arith.constant 0.000000e+00 : f32
    %137 = vector.broadcast %cst_80 : f32 to vector<4x32xf32>
    %138 = arith.maximumf %136, %137 : vector<4x32xf32>
    %c0_81 = arith.constant 0 : index
    %c0_82 = arith.constant 0 : index
    %139 = vector.load %arg24[%c0_81, %c0_82] : memref<32x32xf32, #tpu.memory_space<vmem>>, vector<32x32xf32>
    %cst_83 = arith.constant dense<0.000000e+00> : vector<4x32xf32>
    %140 = tpu.matmul %138, %139, %cst_83 {dimension_numbers = #tpu.dot_dimension_numbers<[1], [0], [0], [1], [0, 0, 1, 1], [], []>} : vector<4x32xf32>, vector<32x32xf32>, vector<4x32xf32> -> vector<4x32xf32>
    %c0_84 = arith.constant 0 : index
    %c0_85 = arith.constant 0 : index
    %141 = vector.load %arg25[%c0_84, %c0_85] : memref<1x32xf32, #tpu.memory_space<vmem>>, vector<1x32xf32>
    %142 = vector.broadcast %141 : vector<1x32xf32> to vector<4x32xf32>
    %143 = arith.addf %140, %142 : vector<4x32xf32>
    %cst_86 = arith.constant 0.000000e+00 : f32
    %144 = vector.broadcast %cst_86 : f32 to vector<4x32xf32>
    %145 = arith.maximumf %143, %144 : vector<4x32xf32>
    %c0_87 = arith.constant 0 : index
    %c0_88 = arith.constant 0 : index
    %146 = vector.load %arg26[%c0_87, %c0_88] : memref<4x32xf32, #tpu.memory_space<vmem>>, vector<4x32xf32>
    tpu.vector_store %arg26[%c0_87, %c0_88], %145 {strides = array<i32>} : memref<4x32xf32, #tpu.memory_space<vmem>>, vector<4x32xf32>,
    return
  }
}

</mosaic_0001>

<bundles_post_ra>
// kernel: squeeze.9
= control target key start
LH: loop header
LB: loop body
LE: loop exit
PB: predicated region body
PF: predicated region fallthrough
CT: control target
= control target key end

     0   :  { %vm8_vm0 = vcmask 64512   ;;  %s40_s8 = smov 8   ;;  %s41_s9 = smov 16   ;;  %vm14_vm1 = vcmask 261312   ;;  %vm20_vm2 = vcmask 195712   ;;  %vm26_vm3 = vcmask 130112   ;;  %s58_s0 = inlined_call_operand.vmem [shape: s32[4,8], index: 0, kind: input, shape index: {}]   ;;  %s59_s1 = inlined_call_operand.vmem [shape: s32[32,1], index: 1, kind: output, shape index: {}]  }
   0x1   :  { %v5_v0 = vld [vmem:[%s58_s0] sm:$0xf]  ;;  %s39_s0 = smov 24  }
   0x2   :  { %6 = vst [vmem:[#allocation1] sm:$0xf] %v5_v0 }
   0x9   :  { %v11_v1 = vld [vmem:[#allocation1 + $0x3] sm:$0x1]   ;;  %v23_v2 = vld [vmem:[#allocation1 + $0x1] sm:$0x1]   ;;  %v7_v3 = vld [vmem:[#allocation1] sm:$0x1]  }
   0xa   :  { %12 = vrot.lane.b32.xlu0 %v11_v1, %s39_s0  ;;  %24 = vrot.lane.b32.xlu1 %v23_v2, %s40_s8  ;;  %v17_v4 = vld [vmem:[#allocation1 + $0x2] sm:$0x1]   ;;  %9 = vst.msk [vmem:[#allocation0] sm:$0x1] %vm8_vm0, %v7_v3  }
   0xe   :  { %18 = vrot.lane.b32.xlu0 %v17_v4, %s41_s9 }
  0x7c   :  { %v13_v5 = vpop.permute.xlu0 %12   ;;  %v25_v6 = vpop.permute.xlu1 %24  }
  0x7d   :  { %15 = vst.msk [vmem:[#allocation0] sm:$0x1] %vm14_vm1, %v13_v5  }
  0x80   :  { %v19_v7 = vpop.permute.xlu0 %18  }
  0x81   :  { %21 = vst.msk [vmem:[#allocation0] sm:$0x1] %vm20_vm2, %v19_v7  }
  0x82   :  { %27 = vst.msk [vmem:[#allocation0] sm:$0x1] %vm26_vm3, %v25_v6  }
  0x89   :  { %v32_v8 = vld [vmem:[#allocation0] sm:$0x1] }
  0x8a   :  { %35 = vst [vmem:[%s59_s1] sm:$0x1] %v32_v8 }

// kernel: squeeze.10
= control target key start
LH: loop header
LB: loop body
LE: loop exit
PB: predicated region body
PF: predicated region fallthrough
CT: control target
= control target key end

     0   :  { %s7_s6 = smov 3  ;;  %s21_s9 = smov 3  ;;  %vm4_vm0 = vcmask 64512   ;;  %vm11_vm1 = vcmask 1048512   ;;  %vm18_vm2 = vcmask 982912   ;;  %vm25_vm3 = vcmask 917312   ;;  %s225_s0 = inlined_call_operand.vmem [shape: s32[4,8,8,1], index: 0, kind: input, shape index: {}]   ;;  %s226_s1 = inlined_call_operand.vmem [shape: s32[256], index: 1, kind: output, shape index: {}]  }
   0x1   :  { %v119_v0 = vld [vmem:[%s225_s0 + $0xf] ss:$16 sm:%s7_s6]   ;;  %s149_s10 = smov 120   ;;  %v121_v1 = vld [vmem:[%s225_s0 + $0xd] ss:$16 sm:%s21_s9]   ;;  %s14_s13 = smov 3 }
   0x2   :  { %9 = vrot.lane.b32.xlu0 %v119_v0, %s149_s10  ;;  %s150_s14 = smov 104   ;;  %v120_v2 = vld [vmem:[%s225_s0 + $0xe] ss:$16 sm:%s14_s13]   ;;  %s28_s17 = smov 3  ;;  %vm32_vm4 = vcmask 851712   ;;  %vm39_vm5 = vcmask 786112  }
   0x3   :  { %23 = vrot.lane.b32.xlu1 %v121_v1, %s150_s14  ;;  %v122_v3 = vld [vmem:[%s225_s0 + $0xc] ss:$16 sm:%s28_s17]   ;;  %s35_s20 = smov 3  ;;  %s42_s21 = smov 3  ;;  %vm46_vm6 = vcmask 720512   ;;  %vm53_vm7 = vcmask 654912  }
   0x4   :  { %s151_s22 = smov 112   ;;  %s152_s23 = smov 96   ;;  %v123_v4 = vld [vmem:[%s225_s0 + $0xb] ss:$16 sm:%s35_s20]   ;;  %v124_v5 = vld [vmem:[%s225_s0 + $0xa] ss:$16 sm:%s42_s21]  }
   0x5   :  { %s49_s28 = smov 3  ;;  %s56_s29 = smov 3  ;;  %vm60_vm8 = vcmask 589312   ;;  %vm67_vm9 = vcmask 523712   ;;  %vm74_vm10 = vcmask 458112   ;;  %vm81_vm11 = vcmask 392512  }
   0x6   :  { %16 = vrot.lane.b32.xlu0 %v120_v2, %s151_s22  ;;  %s153_s30 = smov 88   ;;  %s154_s2 = smov 80   ;;  %v125_v6 = vld [vmem:[%s225_s0 + $0x9] ss:$16 sm:%s49_s28]   ;;  %vm88_vm12 = vcmask 326912   ;;  %vm95_vm13 = vcmask 261312  }
   0x7   :  { %30 = vrot.lane.b32.xlu1 %v122_v3, %s152_s23  ;;  %v126_v7 = vld [vmem:[%s225_s0 + $0x8] ss:$16 sm:%s56_s29]   ;;  %s63_s7 = smov 3  ;;  %s70_s8 = smov 3  ;;  %vm102_vm14 = vcmask 195712   ;;  %vm109_vm15 = vcmask 130112  }
   0x8   :  { %s155_s9 = smov 72   ;;  %s156_s10 = smov 64   ;;  %v127_v8 = vld [vmem:[%s225_s0 + $0x7] ss:$16 sm:%s63_s7]   ;;  %v128_v9 = vld [vmem:[%s225_s0 + $0x6] ss:$16 sm:%s70_s8]  }
   0x9   :  { %s2_s13 = smov 3  ;;  %s77_s16 = smov 3 }
   0xa   :  { %37 = vrot.lane.b32.xlu0 %v123_v4, %s153_s30  ;;  %v3_v10 = vld [vmem:[%s225_s0] ss:$16 sm:%s2_s13]   ;;  %s84_s19 = smov 3  ;;  %s157_s20 = smov 56  }
   0xb   :  { %44 = vrot.lane.b32.xlu1 %v124_v5, %s154_s2  ;;  %5 = vst.msk [vmem:[#allocation0] sm:$0x3] %vm4_vm0, %v3_v10   ;;  %s158_s21 = smov 48   ;;  %v129_v11 = vld [vmem:[%s225_s0 + $0x5] ss:$16 sm:%s77_s16]   ;;  %s91_s26 = smov 3 }
   0xc   :  { %v130_v12 = vld [vmem:[%s225_s0 + $0x4] ss:$16 sm:%s84_s19]   ;;  %s98_s27 = smov 3  ;;  %s159_s28 = smov 40   ;;  %v131_v13 = vld [vmem:[%s225_s0 + $0x3] ss:$16 sm:%s91_s26]  }
   0xd   :  { %s160_s29 = smov 32   ;;  %v132_v14 = vld [vmem:[%s225_s0 + $0x2] ss:$16 sm:%s98_s27]   ;;  %s105_s5 = smov 3 }
   0xe   :  { %51 = vrot.lane.b32.xlu0 %v125_v6, %s155_s9  ;;  %s161_s6 = smov 24   ;;  %s162_s7 = smov 16   ;;  %v133_v15 = vld [vmem:[%s225_s0 + $0x1] ss:$16 sm:%s105_s5]  }
   0xf   :  { %58 = vrot.lane.b32.xlu1 %v126_v7, %s156_s10  ;;  %s163_s0 = smov 8  }
  0x12   :  { %65 = vrot.lane.b32.xlu0 %v127_v8, %s157_s20 }
  0x13   :  { %72 = vrot.lane.b32.xlu1 %v128_v9, %s158_s21 }
  0x16   :  { %79 = vrot.lane.b32.xlu0 %v129_v11, %s159_s28 }
  0x17   :  { %86 = vrot.lane.b32.xlu1 %v130_v12, %s160_s29 }
  0x1a   :  { %93 = vrot.lane.b32.xlu0 %v131_v13, %s161_s6 }
  0x1b   :  { %100 = vrot.lane.b32.xlu1 %v132_v14, %s162_s7 }
  0x1e   :  { %107 = vrot.lane.b32.xlu0 %v133_v15, %s163_s0 }
  0x74   :  { %v10_v16 = vpop.permute.xlu0 %9  }
  0x75   :  { %12 = vst.msk [vmem:[#allocation0] sm:$0x3] %vm11_vm1, %v10_v16   ;;  %v24_v17 = vpop.permute.xlu1 %23  }
  0x78   :  { %v17_v18 = vpop.permute.xlu0 %16  }
  0x79   :  { %19 = vst.msk [vmem:[#allocation0] sm:$0x3] %vm18_vm2, %v17_v18   ;;  %v31_v19 = vpop.permute.xlu1 %30  }
  0x7a   :  { %26 = vst.msk [vmem:[#allocation0] sm:$0x3] %vm25_vm3, %v24_v17  }
  0x7b   :  { %33 = vst.msk [vmem:[#allocation0] sm:$0x3] %vm32_vm4, %v31_v19  }
  0x7c   :  { %v38_v20 = vpop.permute.xlu0 %37  }
  0x7d   :  { %40 = vst.msk [vmem:[#allocation0] sm:$0x3] %vm39_vm5, %v38_v20   ;;  %v45_v21 = vpop.permute.xlu1 %44  }
  0x7e   :  { %47 = vst.msk [vmem:[#allocation0] sm:$0x3] %vm46_vm6, %v45_v21  }
  0x80   :  { %v52_v22 = vpop.permute.xlu0 %51  }
  0x81   :  { %54 = vst.msk [vmem:[#allocation0] sm:$0x3] %vm53_vm7, %v52_v22   ;;  %v59_v23 = vpop.permute.xlu1 %58  }
  0x82   :  { %61 = vst.msk [vmem:[#allocation0] sm:$0x3] %vm60_vm8, %v59_v23  }
  0x84   :  { %v66_v24 = vpop.permute.xlu0 %65  }
  0x85   :  { %68 = vst.msk [vmem:[#allocation0] sm:$0x3] %vm67_vm9, %v66_v24   ;;  %v73_v25 = vpop.permute.xlu1 %72  }
  0x86   :  { %75 = vst.msk [vmem:[#allocation0] sm:$0x3] %vm74_vm10, %v73_v25  }
  0x88   :  { %v80_v26 = vpop.permute.xlu0 %79  }
  0x89   :  { %82 = vst.msk [vmem:[#allocation0] sm:$0x3] %vm81_vm11, %v80_v26   ;;  %v87_v27 = vpop.permute.xlu1 %86  }
  0x8a   :  { %89 = vst.msk [vmem:[#allocation0] sm:$0x3] %vm88_vm12, %v87_v27  }
  0x8c   :  { %v94_v28 = vpop.permute.xlu0 %93  }
  0x8d   :  { %96 = vst.msk [vmem:[#allocation0] sm:$0x3] %vm95_vm13, %v94_v28   ;;  %v101_v29 = vpop.permute.xlu1 %100  }
  0x8e   :  { %103 = vst.msk [vmem:[#allocation0] sm:$0x3] %vm102_vm14, %v101_v29  }
  0x90   :  { %v108_v30 = vpop.permute.xlu0 %107  }
  0x91   :  { %110 = vst.msk [vmem:[#allocation0] sm:$0x3] %vm109_vm15, %v108_v30  }
  0x98   :  { %v115_v31 = vld [vmem:[#allocation0] sm:$0x3] }
  0x99   :  { %118 = vst [vmem:[%s226_s1] sm:$0x3] %v115_v31 }

// kernel: squeeze.11
= control target key start
LH: loop header
LB: loop body
LE: loop exit
PB: predicated region body
PF: predicated region fallthrough
CT: control target
= control target key end

     0   :  { %vm8_vm0 = vcmask 64512   ;;  %s40_s8 = smov 8   ;;  %s41_s9 = smov 16   ;;  %vm14_vm1 = vcmask 261312   ;;  %vm20_vm2 = vcmask 195712   ;;  %vm26_vm3 = vcmask 130112   ;;  %s58_s0 = inlined_call_operand.vmem [shape: s32[4,8], index: 0, kind: input, shape index: {}]   ;;  %s59_s1 = inlined_call_operand.vmem [shape: s32[32], index: 1, kind: output, shape index: {}]  }
   0x1   :  { %v5_v0 = vld [vmem:[%s58_s0] sm:$0xf]  ;;  %s39_s0 = smov 24  }
   0x2   :  { %6 = vst [vmem:[#allocation1] sm:$0xf] %v5_v0 }
   0x9   :  { %v11_v1 = vld [vmem:[#allocation1 + $0x3] sm:$0x1]   ;;  %v23_v2 = vld [vmem:[#allocation1 + $0x1] sm:$0x1]   ;;  %v7_v3 = vld [vmem:[#allocation1] sm:$0x1]  }
   0xa   :  { %12 = vrot.lane.b32.xlu0 %v11_v1, %s39_s0  ;;  %24 = vrot.lane.b32.xlu1 %v23_v2, %s40_s8  ;;  %v17_v4 = vld [vmem:[#allocation1 + $0x2] sm:$0x1]   ;;  %9 = vst.msk [vmem:[#allocation0] sm:$0x1] %vm8_vm0, %v7_v3  }
   0xe   :  { %18 = vrot.lane.b32.xlu0 %v17_v4, %s41_s9 }
  0x7c   :  { %v13_v5 = vpop.permute.xlu0 %12   ;;  %v25_v6 = vpop.permute.xlu1 %24  }
  0x7d   :  { %15 = vst.msk [vmem:[#allocation0] sm:$0x1] %vm14_vm1, %v13_v5  }
  0x80   :  { %v19_v7 = vpop.permute.xlu0 %18  }
  0x81   :  { %21 = vst.msk [vmem:[#allocation0] sm:$0x1] %vm20_vm2, %v19_v7  }
  0x82   :  { %27 = vst.msk [vmem:[#allocation0] sm:$0x1] %vm26_vm3, %v25_v6  }
  0x89   :  { %v32_v8 = vld [vmem:[#allocation0] sm:$0x1] }
  0x8a   :  { %35 = vst [vmem:[%s59_s1] sm:$0x1] %v32_v8 }

// kernel: user_model_forward.1
= control target key start
LH: loop header
LB: loop body
LE: loop exit
PB: predicated region body
PF: predicated region fallthrough
CT: control target
= control target key end

     0   :  { %s9958_s0 = inlined_call_operand.vmem [shape: s32[896,1], index: 0, kind: input, shape index: {}]   ;;  %s9959_s1 = inlined_call_operand.vmem [shape: s32[288,1], index: 1, kind: input, shape index: {}]   ;;  %s9960_s2 = inlined_call_operand.vmem [shape: s32[32,1], index: 2, kind: input, shape index: {}]   ;;  %s9961_s3 = inlined_call_operand.vmem [shape: f32[39,32], index: 3, kind: input, shape index: {}]   ;;  %s9962_s4 = inlined_call_operand.vmem [shape: f32[64,32], index: 4, kind: input, shape index: {}]   ;;  %s9963_s5 = inlined_call_operand.vmem [shape: f32[1,32], index: 5, kind: input, shape index: {}]   ;;  %s9964_s6 = inlined_call_operand.vmem [shape: f32[32,32], index: 6, kind: input, shape index: {}]   ;;  %s9965_s7 = inlined_call_operand.vmem [shape: f32[1,32], index: 7, kind: input, shape index: {}]   ;;  %s9966_s8 = inlined_call_operand.vmem [shape: f32[64,32], index: 8, kind: input, shape index: {}]   ;;  %s9967_s9 = inlined_call_operand.vmem [shape: f32[1,32], index: 9, kind: input, shape index: {}]   ;;  %s9968_s10 = inlined_call_operand.vmem [shape: f32[1,32], index: 10, kind: input, shape index: {}]   ;;  %s9969_s11 = inlined_call_operand.<no memory space> [shape: f32[1,1], index: 11, kind: input, shape index: {}]   ;;  %s9970_s12 = inlined_call_operand.vmem [shape: f32[32,32], index: 12, kind: input, shape index: {}]   ;;  %s9971_s13 = inlined_call_operand.vmem [shape: f32[1,32], index: 13, kind: input, shape index: {}]   ;;  %s9972_s14 = inlined_call_operand.vmem [shape: f32[64,32], index: 14, kind: input, shape index: {}]   ;;  %s9973_s15 = inlined_call_operand.vmem [shape: f32[1,32], index: 15, kind: input, shape index: {}]   ;;  %s9974_s16 = inlined_call_operand.vmem [shape: f32[1,32], index: 16, kind: input, shape index: {}]   ;;  %s9975_s18 = inlined_call_operand.vmem [shape: f32[32,32], index: 18, kind: input, shape index: {}]   ;;  %s9976_s19 = inlined_call_operand.vmem [shape: f32[1,32], index: 19, kind: input, shape index: {}]   ;;  %s9977_s20 = inlined_call_operand.vmem [shape: f32[64,32], index: 20, kind: input, shape index: {}]   ;;  %s9978_s21 = inlined_call_operand.vmem [shape: f32[1,32], index: 21, kind: input, shape index: {}]   ;;  %s9979_s22 = inlined_call_operand.vmem [shape: f32[32,32], index: 22, kind: input, shape index: {}]   ;;  %s9980_s23 = inlined_call_operand.vmem [shape: f32[1,32], index: 23, kind: input, shape index: {}]   ;;  %s9981_s24 = inlined_call_operand.vmem [shape: f32[32,32], index: 24, kind: input, shape index: {}]   ;;  %s9982_s25 = inlined_call_operand.vmem [shape: f32[1,32], index: 25, kind: input, shape index: {}]   ;;  %s9983_s26 = inlined_call_operand.hbm [shape: f32[4,32], index: 26, kind: output, shape index: {}]   ;;  %s9984_s17 = inlined_call_operand.<no memory space> [shape: f32[1,1], index: 17, kind: input, shape index: {}]  }
   0x1   :  { %10032 = sst [smem:[#allocation43_spill]] %s9958_s0  ;;  %v31_v0 = vstv %s9969_s11  ;;  %v33_v1 = vstv %s9984_s17 }
   0x2   :  { %10033 = sst [smem:[#allocation44_spill]] %s9959_s1  ;;  %32 = vst [vmem:[#allocation2] sm:$0x1] %v31_v0  ;;  %34 = vst [vmem:[#allocation3] sm:$0x1] %v33_v1 }
   0x3   :  { %10034 = sst [smem:[#allocation45_spill]] %s9960_s2 }
   0x4   :  { %10035 = sst [smem:[#allocation46_spill]] %s9961_s3 }
   0x5   :  { %10036 = sst [smem:[#allocation47_spill]] %s9962_s4 }
   0x6   :  { %10037 = sst [smem:[#allocation48_spill]] %s9963_s5 }
   0x7   :  { %10038 = sst [smem:[#allocation49_spill]] %s9964_s6 }
   0x8   :  { %10039 = sst [smem:[#allocation50_spill]] %s9965_s7 }
   0x9   :  { %10040 = sst [smem:[#allocation51_spill]] %s9966_s8 }
   0xa   :  { %10041 = sst [smem:[#allocation52_spill]] %s9967_s9 }
   0xb   :  { %10042 = sst [smem:[#allocation53_spill]] %s9968_s10 }
   0xc   :  { %s10043_s29 = sld [smem:[#allocation43_spill]]  ;;  %v7396_v4 = vmov 0   ;;  %vm1104_vm0 = vcmask 1046528  }
   0xd   :  { %7210 = vset.pattern.permute.xlu1 %v7396_v4  ;;  %7209 = vset.pattern.permute.xlu0 %v7396_v4  ;;  %s10044_s6 = sld [smem:[#allocation46_spill]] }
  0x12   :  { %v90_v2 = vld [vmem:[%s10043_s29 + $0x10] sm:$0xff]  ;;  %v88_v3 = vld [vmem:[%s10043_s29] sm:$0xff]  ;;  %v91_v5 = vld [vmem:[%s10043_s29 + $0x18] sm:$0xff] }
  0x13   :  { %209 = vperm.xlu1 %7210, %v90_v2   ;;  %203 = vperm.xlu0 %7209, %v88_v3   ;;  %v89_v6 = vld [vmem:[%s10043_s29 + $0x8] sm:$0xff]  ;;  %v92_v8 = vld [vmem:[%s10043_s29 + $0x20] sm:$0xff]  ;;  %v95_v9 = vld [vmem:[%s10043_s29 + $0x38] sm:$0xff] }
  0x14   :  { %v93_v7 = vld [vmem:[%s10043_s29 + $0x28] sm:$0xff]  ;;  %v94_v10 = vld [vmem:[%s10043_s29 + $0x30] sm:$0xff]  ;;  %v96_v12 = vld [vmem:[%s10043_s29 + $0x40] sm:$0xff] }
  0x15   :  { %v97_v11 = vld [vmem:[%s10043_s29 + $0x48] sm:$0xff]  ;;  %v99_v13 = vld [vmem:[%s10043_s29 + $0x58] sm:$0xff]  ;;  %v98_v14 = vld [vmem:[%s10043_s29 + $0x50] sm:$0xff] }
  0x16   :  { %v766_v15 = vld [vmem:[%s10044_s6 + $0x20] sm:$0x7f]  ;;  %v765_v16 = vld [vmem:[%s10044_s6 + $0x18] sm:$0xff]  ;;  %v101_v17 = vld [vmem:[%s10043_s29 + $0x68] sm:$0xff] }
  0x17   :  { %212 = vperm.xlu1 %7210, %v91_v5   ;;  %206 = vperm.xlu0 %7209, %v89_v6   ;;  %v100_v18 = vld [vmem:[%s10043_s29 + $0x60] sm:$0xff]  ;;  %v764_v19 = vld [vmem:[%s10044_s6 + $0x10] sm:$0xff]  ;;  %v763_v20 = vld [vmem:[%s10044_s6 + $0x8] sm:$0xff] }
  0x18   :  { %6611 = vmatprep.subr.msk.mxu0 %vm1104_vm0, %v766_v15  ;;  %v103_v21 = vld [vmem:[%s10043_s29 + $0x78] sm:$0xff]  ;;  %v102_v22 = vld [vmem:[%s10043_s29 + $0x70] sm:$0xff] }
  0x19   :  { %6612 = vmatpush3.msk.msra.mxu0 %vm1104_vm0, %v766_v15 }
  0x1a   :  { %6613 = vmatprep.subr.mxu0 %v765_v16 }
  0x1b   :  { %218 = vperm.xlu1 %7210, %v93_v7   ;;  %215 = vperm.xlu0 %7209, %v92_v8  }
  0x1c   :  { %6614 = vmatpush3.msra.mxu0 %v765_v16 }
  0x1d   :  { %6615 = vmatprep.subr.mxu0 %v764_v19 }
  0x1f   :  { %224 = vperm.xlu1 %7210, %v95_v9   ;;  %221 = vperm.xlu0 %7209, %v94_v10  }
  0x23   :  { %230 = vperm.xlu1 %7210, %v97_v11   ;;  %227 = vperm.xlu0 %7209, %v96_v12  }
  0x27   :  { %236 = vperm.xlu1 %7210, %v99_v13   ;;  %233 = vperm.xlu0 %7209, %v98_v14  }
  0x2b   :  { %242 = vperm.xlu1 %7210, %v101_v17   ;;  %239 = vperm.xlu0 %7209, %v100_v18  }
  0x2c   :  { %35 = vsyncpa [#allocation5], 0  ;;  %6616 = vmatpush3.msra.mxu0 %v764_v19  ;;  %v762_v23 = vld [vmem:[%s10044_s6] sm:$0xff]  ;;  %v105_v24 = vld [vmem:[%s10043_s29 + $0x88] sm:$0xff]  ;;  %v200_v4 = vlaneseq  ;;  %vm767_vm1 = vcmask 318464   ;;  %v9994_v12 = vmov 0.0  }
  0x2d   :  { %6617 = vmatprep.subr.mxu0 %v763_v20  ;;  %v104_v25 = vld [vmem:[%s10043_s29 + $0x80] sm:$0xff]  ;;  %v107_v26 = vld [vmem:[%s10043_s29 + $0x98] sm:$0xff]  ;;  %v106_v27 = vld [vmem:[%s10043_s29 + $0x90] sm:$0xff]  ;;  %s10045_s3 = sld [smem:[#allocation47_spill]]  ;;  %s7399_s4 = smov [#allocation4]  }
  0x2e   :  { %6618 = vmatpush3.msra.mxu0 %v763_v20  ;;  %v109_v28 = vld [vmem:[%s10043_s29 + $0xa8] sm:$0xff]  ;;  %v108_v29 = vld [vmem:[%s10043_s29 + $0xa0] sm:$0xff]  ;;  %v111_v30 = vld [vmem:[%s10043_s29 + $0xb8] sm:$0xff]  ;;  %v7742_v7 = vand.u32 127, %v200_v4  ;;  %s10047_s9 = sld [smem:[#allocation51_spill]]  ;;  %s5912_s6 = sshll.u32 %s7399_s4, 4  ;;  %s5913_s6 = int_to_ptr.vmem [resolvable:$true] %s5912_s6 }
  0x2f   :  { %248 = vperm.xlu1 %7210, %v103_v21   ;;  %245 = vperm.xlu0 %7209, %v102_v22   ;;  %v110_v31 = vld [vmem:[%s10043_s29 + $0xb0] sm:$0xff]  ;;  %v113_v32 = vld [vmem:[%s10043_s29 + $0xc8] sm:$0xff]  ;;  %v112_v33 = vld [vmem:[%s10043_s29 + $0xc0] sm:$0xff]  ;;  %s10048_s7 = sld [smem:[#allocation48_spill]]  ;;  %p7379_p1 = scmp.lt.s32.totalorder %s5913_s6, %s5913_s6 }
  0x30   :  { %6619 = vmatprep.subr.mxu0 %v762_v23  ;;  %v115_v34 = vld [vmem:[%s10043_s29 + $0xd8] sm:$0xff]  ;;  %v114_v35 = vld [vmem:[%s10043_s29 + $0xd0] sm:$0xff]  ;;  %v117_v36 = vld [vmem:[%s10043_s29 + $0xe8] sm:$0xff]  ;;  %s10049_s1 = sld [smem:[#allocation50_spill]] }
  0x31   :  { %6620 = vmatpush3.msra.mxu0 %v762_v23  ;;  %v116_v37 = vld [vmem:[%s10043_s29 + $0xe0] sm:$0xff]  ;;  %v119_v38 = vld [vmem:[%s10043_s29 + $0xf8] sm:$0xff]  ;;  %v118_v39 = vld [vmem:[%s10043_s29 + $0xf0] sm:$0xff]  ;;  %s10086_s0 = sld [smem:[#allocation52_spill]] }
  0x32   :  { %v121_v40 = vld [vmem:[%s10043_s29 + $0x108] sm:$0xff]  ;;  %v120_v41 = vld [vmem:[%s10043_s29 + $0x100] sm:$0xff]  ;;  %v123_v42 = vld [vmem:[%s10043_s29 + $0x118] sm:$0xff]  ;;  %s10087_s17 = sld [smem:[#allocation53_spill]] }
  0x33   :  { %254 = vperm.xlu1 %7210, %v105_v24   ;;  %251 = vperm.xlu0 %7209, %v104_v25   ;;  %v122_v43 = vld [vmem:[%s10043_s29 + $0x110] sm:$0xff]  ;;  %v125_v44 = vld [vmem:[%s10043_s29 + $0x128] sm:$0xff]  ;;  %v124_v45 = vld [vmem:[%s10043_s29 + $0x120] sm:$0xff]  ;;  %s10088_s5 = sld [smem:[#allocation44_spill]] }
  0x34   :  { %v127_v46 = vld [vmem:[%s10043_s29 + $0x138] sm:$0xff]  ;;  %v126_v47 = vld [vmem:[%s10043_s29 + $0x130] sm:$0xff]  ;;  %v129_v48 = vld [vmem:[%s10043_s29 + $0x148] sm:$0xff]  ;;  %s10122_s27 = sld [smem:[#allocation45_spill]] }
  0x35   :  { %v128_v49 = vld [vmem:[%s10043_s29 + $0x140] sm:$0xff]  ;;  %v131_v50 = vld [vmem:[%s10043_s29 + $0x158] sm:$0xff]  ;;  %v130_v51 = vld [vmem:[%s10043_s29 + $0x150] sm:$0xff] }
  0x36   :  { %v133_v52 = vld [vmem:[%s10043_s29 + $0x168] sm:$0xff]  ;;  %v132_v53 = vld [vmem:[%s10043_s29 + $0x160] sm:$0xff]  ;;  %v135_v54 = vld [vmem:[%s10043_s29 + $0x178] sm:$0xff] }
  0x37   :  { %260 = vperm.xlu1 %7210, %v107_v26   ;;  %257 = vperm.xlu0 %7209, %v106_v27   ;;  %v134_v55 = vld [vmem:[%s10043_s29 + $0x170] sm:$0xff]  ;;  %v137_v56 = vld [vmem:[%s10043_s29 + $0x188] sm:$0xff]  ;;  %v136_v57 = vld [vmem:[%s10043_s29 + $0x180] sm:$0xff] }
  0x38   :  { %v139_v58 = vld [vmem:[%s10043_s29 + $0x198] sm:$0xff]  ;;  %v138_v59 = vld [vmem:[%s10043_s29 + $0x190] sm:$0xff]  ;;  %v141_v60 = vld [vmem:[%s10043_s29 + $0x1a8] sm:$0xff] }
  0x39   :  { %v140_v61 = vld [vmem:[%s10043_s29 + $0x1a0] sm:$0xff]  ;;  %v143_v62 = vld [vmem:[%s10043_s29 + $0x1b8] sm:$0xff]  ;;  %v142_v63 = vld [vmem:[%s10043_s29 + $0x1b0] sm:$0xff] }
  0x3a   :  { %v145_v0 = vld [vmem:[%s10043_s29 + $0x1c8] sm:$0xff]  ;;  %v144_v1 = vld [vmem:[%s10043_s29 + $0x1c0] sm:$0xff]  ;;  %v147_v2 = vld [vmem:[%s10043_s29 + $0x1d8] sm:$0xff] }
  0x3b   :  { %266 = vperm.xlu1 %7210, %v109_v28   ;;  %263 = vperm.xlu0 %7209, %v108_v29   ;;  %v146_v3 = vld [vmem:[%s10043_s29 + $0x1d0] sm:$0xff]  ;;  %v149_v5 = vld [vmem:[%s10043_s29 + $0x1e8] sm:$0xff]  ;;  %v148_v6 = vld [vmem:[%s10043_s29 + $0x1e0] sm:$0xff] }
  0x3c   :  { %v151_v8 = vld [vmem:[%s10043_s29 + $0x1f8] sm:$0xff]  ;;  %v150_v9 = vld [vmem:[%s10043_s29 + $0x1f0] sm:$0xff]  ;;  %v153_v14 = vld [vmem:[%s10043_s29 + $0x208] sm:$0xff] }
  0x3d   :  { %v152_v15 = vld [vmem:[%s10043_s29 + $0x200] sm:$0xff]  ;;  %v155_v20 = vld [vmem:[%s10043_s29 + $0x218] sm:$0xff]  ;;  %v154_v21 = vld [vmem:[%s10043_s29 + $0x210] sm:$0xff] }
  0x3e   :  { %v157_v26 = vld [vmem:[%s10043_s29 + $0x228] sm:$0xff]  ;;  %v156_v27 = vld [vmem:[%s10043_s29 + $0x220] sm:$0xff]  ;;  %v171_v4 = vld [vmem:[%s10043_s29 + $0x298] sm:$0xff] }
  0x3f   :  { %272 = vperm.xlu1 %7210, %v111_v30   ;;  %269 = vperm.xlu0 %7209, %v110_v31  }
  0x43   :  { %278 = vperm.xlu1 %7210, %v113_v32   ;;  %275 = vperm.xlu0 %7209, %v112_v33   ;;  %v159_v32 = vld [vmem:[%s10043_s29 + $0x238] sm:$0xff]  ;;  %v158_v33 = vld [vmem:[%s10043_s29 + $0x230] sm:$0xff] }
  0x47   :  { %284 = vperm.xlu1 %7210, %v115_v34   ;;  %281 = vperm.xlu0 %7209, %v114_v35  }
  0x4b   :  { %290 = vperm.xlu1 %7210, %v117_v36   ;;  %287 = vperm.xlu0 %7209, %v116_v37  }
  0x4f   :  { %296 = vperm.xlu1 %7210, %v119_v38   ;;  %293 = vperm.xlu0 %7209, %v118_v39   ;;  %v161_v38 = vld [vmem:[%s10043_s29 + $0x248] sm:$0xff]  ;;  %v160_v39 = vld [vmem:[%s10043_s29 + $0x240] sm:$0xff] }
  0x53   :  { %302 = vperm.xlu1 %7210, %v121_v40   ;;  %299 = vperm.xlu0 %7209, %v120_v41  }
  0x57   :  { %308 = vperm.xlu1 %7210, %v123_v42   ;;  %305 = vperm.xlu0 %7209, %v122_v43  }
  0x5b   :  { %314 = vperm.xlu1 %7210, %v125_v44   ;;  %311 = vperm.xlu0 %7209, %v124_v45   ;;  %v163_v44 = vld [vmem:[%s10043_s29 + $0x258] sm:$0xff]  ;;  %v162_v45 = vld [vmem:[%s10043_s29 + $0x250] sm:$0xff] }
  0x5f   :  { %320 = vperm.xlu1 %7210, %v127_v46   ;;  %317 = vperm.xlu0 %7209, %v126_v47  }
  0x63   :  { %326 = vperm.xlu1 %7210, %v129_v48   ;;  %323 = vperm.xlu0 %7209, %v128_v49  }
  0x67   :  { %332 = vperm.xlu1 %7210, %v131_v50   ;;  %329 = vperm.xlu0 %7209, %v130_v51   ;;  %v165_v50 = vld [vmem:[%s10043_s29 + $0x268] sm:$0xff]  ;;  %v164_v51 = vld [vmem:[%s10043_s29 + $0x260] sm:$0xff] }
  0x6b   :  { %338 = vperm.xlu1 %7210, %v133_v52   ;;  %335 = vperm.xlu0 %7209, %v132_v53  }
  0x6f   :  { %344 = vperm.xlu1 %7210, %v135_v54   ;;  %341 = vperm.xlu0 %7209, %v134_v55  }
  0x73   :  { %350 = vperm.xlu1 %7210, %v137_v56   ;;  %347 = vperm.xlu0 %7209, %v136_v57   ;;  %v167_v56 = vld [vmem:[%s10043_s29 + $0x278] sm:$0xff]  ;;  %v166_v57 = vld [vmem:[%s10043_s29 + $0x270] sm:$0xff] }
  0x77   :  { %356 = vperm.xlu1 %7210, %v139_v58   ;;  %353 = vperm.xlu0 %7209, %v138_v59  }
  0x7b   :  { %362 = vperm.xlu1 %7210, %v141_v60   ;;  %359 = vperm.xlu0 %7209, %v140_v61  }
  0x7f   :  { %368 = vperm.xlu1 %7210, %v143_v62   ;;  %365 = vperm.xlu0 %7209, %v142_v63   ;;  %v169_v62 = vld [vmem:[%s10043_s29 + $0x288] sm:$0xff]  ;;  %v168_v63 = vld [vmem:[%s10043_s29 + $0x280] sm:$0xff] }
  0x83   :  { %374 = vperm.xlu1 %7210, %v145_v0   ;;  %371 = vperm.xlu0 %7209, %v144_v1  }
  0x87   :  { %380 = vperm.xlu1 %7210, %v147_v2   ;;  %377 = vperm.xlu0 %7209, %v146_v3  }
  0x8b   :  { %386 = vperm.xlu1 %7210, %v149_v5   ;;  %383 = vperm.xlu0 %7209, %v148_v6   ;;  %v170_v5 = vld [vmem:[%s10043_s29 + $0x290] sm:$0xff] }
  0x8e   :  { %v210_v10 = vpop.permute.xlu1 %209  ;;  %v204_v11 = vpop.permute.xlu0 %203 }
  0x8f   :  { %392 = vperm.xlu1 %7210, %v151_v8   ;;  %389 = vperm.xlu0 %7209, %v150_v9   ;;  %vm538_vm2 = vcmp.eq.s32.totalorder %v204_v11, %v7742_v7  ;;  %vm540_vm3 = vcmp.eq.s32.totalorder %v210_v10, %v7742_v7  ;;  %v173_v11 = vld [vmem:[%s10043_s29 + $0x2a8] sm:$0xff] }
  0x90   :  { %v650_v13 = vsel %vm538_vm2, 1.0, %v9994_v12  ;;  %v652_v18 = vsel %vm540_vm3, 1.0, %v9994_v12 }
  0x91   :  { %6621 = vmatprep.mubr.msk.f32.mxu0 %vm767_vm1, %v650_v13  ;;  %v172_v13 = vld [vmem:[%s10043_s29 + $0x2a0] sm:$0xff] }
  0x92   :  { %v213_v16 = vpop.permute.xlu1 %212  ;;  %v207_v17 = vpop.permute.xlu0 %206 }
  0x93   :  { %vm539_vm4 = vcmp.eq.s32.totalorder %v207_v17, %v7742_v7  ;;  %398 = vperm.xlu1 %7210, %v153_v14   ;;  %395 = vperm.xlu0 %7209, %v152_v15   ;;  %vm541_vm5 = vcmp.eq.s32.totalorder %v213_v16, %v7742_v7 }
  0x94   :  { %v651_v19 = vsel %vm539_vm4, 1.0, %v9994_v12  ;;  %v653_v24 = vsel %vm541_vm5, 1.0, %v9994_v12 }
  0x95   :  { %6622 = vmatmul.mubr.msk.f32.vlgmr.msra.gmra.mxu0 %vm767_vm1, %v651_v19  ;;  %v174_v19 = vld [vmem:[%s10043_s29 + $0x2b0] sm:$0xff] }
  0x96   :  { %v219_v22 = vpop.permute.xlu1 %218  ;;  %6624 = vmatprep.mubr.msk.f32.mxu0 %vm767_vm1, %v652_v18  ;;  %v216_v23 = vpop.permute.xlu0 %215  ;;  %v175_v18 = vld [vmem:[%s10043_s29 + $0x2b8] sm:$0xff] }
  0x97   :  { %vm542_vm6 = vcmp.eq.s32.totalorder %v216_v23, %v7742_v7  ;;  %404 = vperm.xlu1 %7210, %v155_v20   ;;  %401 = vperm.xlu0 %7209, %v154_v21   ;;  %vm543_vm7 = vcmp.eq.s32.totalorder %v219_v22, %v7742_v7 }
  0x98   :  { %v654_v25 = vsel %vm542_vm6, 1.0, %v9994_v12  ;;  %v655_v30 = vsel %vm543_vm7, 1.0, %v9994_v12 }
  0x99   :  { %6625 = vmatmul.mubr.msk.f32.gmra.mxu0 %vm767_vm1, %v653_v24  ;;  %v177_v24 = vld [vmem:[%s10043_s29 + $0x2c8] sm:$0xff] }
  0x9a   :  { %v225_v28 = vpop.permute.xlu1 %224  ;;  %6627 = vmatprep.mubr.msk.f32.mxu0 %vm767_vm1, %v654_v25  ;;  %v222_v29 = vpop.permute.xlu0 %221  ;;  %v176_v25 = vld [vmem:[%s10043_s29 + $0x2c0] sm:$0xff] }
  0x9b   :  { %vm544_vm8 = vcmp.eq.s32.totalorder %v222_v29, %v7742_v7  ;;  %410 = vperm.xlu1 %7210, %v157_v26   ;;  %407 = vperm.xlu0 %7209, %v156_v27   ;;  %vm545_vm9 = vcmp.eq.s32.totalorder %v225_v28, %v7742_v7 }
  0x9c   :  { %v656_v31 = vsel %vm544_vm8, 1.0, %v9994_v12  ;;  %v657_v36 = vsel %vm545_vm9, 1.0, %v9994_v12 }
  0x9d   :  { %6628 = vmatmul.mubr.msk.f32.gmra.mxu0 %vm767_vm1, %v655_v30  ;;  %v179_v30 = vld [vmem:[%s10043_s29 + $0x2d8] sm:$0xff] }
  0x9e   :  { %v231_v34 = vpop.permute.xlu1 %230  ;;  %6630 = vmatprep.mubr.msk.f32.mxu0 %vm767_vm1, %v656_v31  ;;  %v228_v35 = vpop.permute.xlu0 %227  ;;  %v178_v31 = vld [vmem:[%s10043_s29 + $0x2d0] sm:$0xff] }
  0x9f   :  { %vm546_vm10 = vcmp.eq.s32.totalorder %v228_v35, %v7742_v7  ;;  %416 = vperm.xlu1 %7210, %v159_v32   ;;  %413 = vperm.xlu0 %7209, %v158_v33   ;;  %vm547_vm11 = vcmp.eq.s32.totalorder %v231_v34, %v7742_v7 }
  0xa0   :  { %v658_v37 = vsel %vm546_vm10, 1.0, %v9994_v12  ;;  %v659_v42 = vsel %vm547_vm11, 1.0, %v9994_v12 }
  0xa1   :  { %6631 = vmatmul.mubr.msk.f32.gmra.mxu0 %vm767_vm1, %v657_v36  ;;  %v181_v36 = vld [vmem:[%s10043_s29 + $0x2e8] sm:$0xff] }
  0xa2   :  { %v237_v40 = vpop.permute.xlu1 %236  ;;  %6633 = vmatprep.mubr.msk.f32.mxu0 %vm767_vm1, %v658_v37  ;;  %v234_v41 = vpop.permute.xlu0 %233  ;;  %v180_v37 = vld [vmem:[%s10043_s29 + $0x2e0] sm:$0xff] }
  0xa3   :  { %vm548_vm12 = vcmp.eq.s32.totalorder %v234_v41, %v7742_v7  ;;  %422 = vperm.xlu1 %7210, %v161_v38   ;;  %419 = vperm.xlu0 %7209, %v160_v39   ;;  %vm549_vm13 = vcmp.eq.s32.totalorder %v237_v40, %v7742_v7 }
  0xa4   :  { %v660_v43 = vsel %vm548_vm12, 1.0, %v9994_v12  ;;  %v661_v48 = vsel %vm549_vm13, 1.0, %v9994_v12 }
  0xa5   :  { %6634 = vmatmul.mubr.msk.f32.gmra.mxu0 %vm767_vm1, %v659_v42  ;;  %v183_v42 = vld [vmem:[%s10043_s29 + $0x2f8] sm:$0xff] }
  0xa6   :  { %v243_v46 = vpop.permute.xlu1 %242  ;;  %6636 = vmatprep.mubr.msk.f32.mxu0 %vm767_vm1, %v660_v43  ;;  %v240_v47 = vpop.permute.xlu0 %239  ;;  %v182_v43 = vld [vmem:[%s10043_s29 + $0x2f0] sm:$0xff] }
  0xa7   :  { %vm550_vm14 = vcmp.eq.s32.totalorder %v240_v47, %v7742_v7  ;;  %428 = vperm.xlu1 %7210, %v163_v44   ;;  %425 = vperm.xlu0 %7209, %v162_v45   ;;  %vm551_vm15 = vcmp.eq.s32.totalorder %v243_v46, %v7742_v7 }
  0xa8   :  { %v662_v49 = vsel %vm550_vm14, 1.0, %v9994_v12  ;;  %v663_v54 = vsel %vm551_vm15, 1.0, %v9994_v12 }
  0xa9   :  { %6637 = vmatmul.mubr.msk.f32.gmra.mxu0 %vm767_vm1, %v661_v48  ;;  %v185_v48 = vld [vmem:[%s10043_s29 + $0x308] sm:$0xff] }
  0xaa   :  { %v249_v52 = vpop.permute.xlu1 %248  ;;  %6639 = vmatprep.mubr.msk.f32.mxu0 %vm767_vm1, %v662_v49  ;;  %v246_v53 = vpop.permute.xlu0 %245  ;;  %v184_v49 = vld [vmem:[%s10043_s29 + $0x300] sm:$0xff] }
  0xab   :  { %vm552_vm0 = vcmp.eq.s32.totalorder %v246_v53, %v7742_v7  ;;  %434 = vperm.xlu1 %7210, %v165_v50   ;;  %431 = vperm.xlu0 %7209, %v164_v51   ;;  %vm553_vm2 = vcmp.eq.s32.totalorder %v249_v52, %v7742_v7 }
  0xac   :  { %v664_v55 = vsel %vm552_vm0, 1.0, %v9994_v12  ;;  %v665_v60 = vsel %vm553_vm2, 1.0, %v9994_v12 }
  0xad   :  { %6640 = vmatmul.mubr.msk.f32.gmra.mxu0 %vm767_vm1, %v663_v54  ;;  %v187_v54 = vld [vmem:[%s10043_s29 + $0x318] sm:$0xff] }
  0xae   :  { %v255_v58 = vpop.permute.xlu1 %254  ;;  %6642 = vmatprep.mubr.msk.f32.mxu0 %vm767_vm1, %v664_v55  ;;  %v252_v59 = vpop.permute.xlu0 %251  ;;  %v186_v55 = vld [vmem:[%s10043_s29 + $0x310] sm:$0xff] }
  0xaf   :  { %vm554_vm3 = vcmp.eq.s32.totalorder %v252_v59, %v7742_v7  ;;  %440 = vperm.xlu1 %7210, %v167_v56   ;;  %437 = vperm.xlu0 %7209, %v166_v57   ;;  %vm555_vm4 = vcmp.eq.s32.totalorder %v255_v58, %v7742_v7 }
  0xb0   :  { %v666_v61 = vsel %vm554_vm3, 1.0, %v9994_v12  ;;  %v667_v2 = vsel %vm555_vm4, 1.0, %v9994_v12 }
  0xb1   :  { %6643 = vmatmul.mubr.msk.f32.gmra.mxu0 %vm767_vm1, %v665_v60  ;;  %v189_v60 = vld [vmem:[%s10043_s29 + $0x328] sm:$0xff] }
  0xb2   :  { %v261_v0 = vpop.permute.xlu1 %260  ;;  %6645 = vmatprep.mubr.msk.f32.mxu0 %vm767_vm1, %v666_v61  ;;  %v258_v1 = vpop.permute.xlu0 %257  ;;  %v188_v61 = vld [vmem:[%s10043_s29 + $0x320] sm:$0xff] }
  0xb3   :  { %vm556_vm5 = vcmp.eq.s32.totalorder %v258_v1, %v7742_v7  ;;  %446 = vperm.xlu1 %7210, %v169_v62   ;;  %443 = vperm.xlu0 %7209, %v168_v63   ;;  %vm557_vm6 = vcmp.eq.s32.totalorder %v261_v0, %v7742_v7 }
  0xb4   :  { %v668_v3 = vsel %vm556_vm5, 1.0, %v9994_v12  ;;  %v669_v9 = vsel %vm557_vm6, 1.0, %v9994_v12 }
  0xb5   :  { %6646 = vmatmul.mubr.msk.f32.gmra.mxu0 %vm767_vm1, %v667_v2  ;;  %v191_v2 = vld [vmem:[%s10043_s29 + $0x338] sm:$0xff] }
  0xb6   :  { %v267_v6 = vpop.permute.xlu1 %266  ;;  %6648 = vmatprep.mubr.msk.f32.mxu0 %vm767_vm1, %v668_v3  ;;  %v264_v8 = vpop.permute.xlu0 %263  ;;  %v190_v3 = vld [vmem:[%s10043_s29 + $0x330] sm:$0xff] }
  0xb7   :  { %vm558_vm7 = vcmp.eq.s32.totalorder %v264_v8, %v7742_v7  ;;  %452 = vperm.xlu1 %7210, %v171_v4   ;;  %449 = vperm.xlu0 %7209, %v170_v5   ;;  %vm559_vm8 = vcmp.eq.s32.totalorder %v267_v6, %v7742_v7 }
  0xb8   :  { %v670_v10 = vsel %vm558_vm7, 1.0, %v9994_v12  ;;  %v671_v16 = vsel %vm559_vm8, 1.0, %v9994_v12 }
  0xb9   :  { %6649 = vmatmul.mubr.msk.f32.gmra.mxu0 %vm767_vm1, %v669_v9  ;;  %v193_v9 = vld [vmem:[%s10043_s29 + $0x348] sm:$0xff] }
  0xba   :  { %v273_v14 = vpop.permute.xlu1 %272  ;;  %6651 = vmatprep.mubr.msk.f32.mxu0 %vm767_vm1, %v670_v10  ;;  %v270_v15 = vpop.permute.xlu0 %269  ;;  %v192_v10 = vld [vmem:[%s10043_s29 + $0x340] sm:$0xff] }
  0xbb   :  { %vm560_vm9 = vcmp.eq.s32.totalorder %v270_v15, %v7742_v7  ;;  %458 = vperm.xlu1 %7210, %v173_v11   ;;  %455 = vperm.xlu0 %7209, %v172_v13   ;;  %vm561_vm10 = vcmp.eq.s32.totalorder %v273_v14, %v7742_v7 }
  0xbc   :  { %v672_v17 = vsel %vm560_vm9, 1.0, %v9994_v12  ;;  %v673_v22 = vsel %vm561_vm10, 1.0, %v9994_v12 }
  0xbd   :  { %6652 = vmatmul.mubr.msk.f32.gmra.mxu0 %vm767_vm1, %v671_v16  ;;  %v195_v16 = vld [vmem:[%s10043_s29 + $0x358] sm:$0xff] }
  0xbe   :  { %v279_v20 = vpop.permute.xlu1 %278  ;;  %6654 = vmatprep.mubr.msk.f32.mxu0 %vm767_vm1, %v672_v17  ;;  %v276_v21 = vpop.permute.xlu0 %275  ;;  %v194_v17 = vld [vmem:[%s10043_s29 + $0x350] sm:$0xff] }
  0xbf   :  { %vm562_vm11 = vcmp.eq.s32.totalorder %v276_v21, %v7742_v7  ;;  %464 = vperm.xlu1 %7210, %v175_v18   ;;  %461 = vperm.xlu0 %7209, %v174_v19   ;;  %vm563_vm12 = vcmp.eq.s32.totalorder %v279_v20, %v7742_v7 }
  0xc0   :  { %v674_v23 = vsel %vm562_vm11, 1.0, %v9994_v12  ;;  %v675_v28 = vsel %vm563_vm12, 1.0, %v9994_v12 }
  0xc1   :  { %6655 = vmatmul.mubr.msk.f32.gmra.mxu0 %vm767_vm1, %v673_v22  ;;  %v197_v22 = vld [vmem:[%s10043_s29 + $0x368] sm:$0xff] }
  0xc2   :  { %v285_v26 = vpop.permute.xlu1 %284  ;;  %6657 = vmatprep.mubr.msk.f32.mxu0 %vm767_vm1, %v674_v23  ;;  %v282_v27 = vpop.permute.xlu0 %281  ;;  %v196_v23 = vld [vmem:[%s10043_s29 + $0x360] sm:$0xff] }
  0xc3   :  { %vm564_vm13 = vcmp.eq.s32.totalorder %v282_v27, %v7742_v7  ;;  %470 = vperm.xlu1 %7210, %v177_v24   ;;  %467 = vperm.xlu0 %7209, %v176_v25   ;;  %vm565_vm14 = vcmp.eq.s32.totalorder %v285_v26, %v7742_v7 }
  0xc4   :  { %v676_v29 = vsel %vm564_vm13, 1.0, %v9994_v12  ;;  %v677_v34 = vsel %vm565_vm14, 1.0, %v9994_v12 }
  0xc5   :  { %6658 = vmatmul.mubr.msk.f32.gmra.mxu0 %vm767_vm1, %v675_v28  ;;  %v199_v28 = vld [vmem:[%s10043_s29 + $0x378] sm:$0xff] }
  0xc6   :  { %v291_v32 = vpop.permute.xlu1 %290  ;;  %6660 = vmatprep.mubr.msk.f32.mxu0 %vm767_vm1, %v676_v29  ;;  %v288_v33 = vpop.permute.xlu0 %287  ;;  %v198_v29 = vld [vmem:[%s10043_s29 + $0x370] sm:$0xff] }
  0xc7   :  { %vm566_vm15 = vcmp.eq.s32.totalorder %v288_v33, %v7742_v7  ;;  %476 = vperm.xlu1 %7210, %v179_v30   ;;  %473 = vperm.xlu0 %7209, %v178_v31   ;;  %vm567_vm0 = vcmp.eq.s32.totalorder %v291_v32, %v7742_v7 }
  0xc8   :  { %v678_v35 = vsel %vm566_vm15, 1.0, %v9994_v12  ;;  %v679_v40 = vsel %vm567_vm0, 1.0, %v9994_v12 }
  0xc9   :  { %6661 = vmatmul.mubr.msk.f32.gmra.mxu0 %vm767_vm1, %v677_v34 }
  0xca   :  { %v297_v38 = vpop.permute.xlu1 %296  ;;  %6663 = vmatprep.mubr.msk.f32.mxu0 %vm767_vm1, %v678_v35  ;;  %v294_v39 = vpop.permute.xlu0 %293 }
  0xcb   :  { %vm568_vm2 = vcmp.eq.s32.totalorder %v294_v39, %v7742_v7  ;;  %482 = vperm.xlu1 %7210, %v181_v36   ;;  %479 = vperm.xlu0 %7209, %v180_v37   ;;  %vm569_vm3 = vcmp.eq.s32.totalorder %v297_v38, %v7742_v7 }
  0xcc   :  { %v680_v41 = vsel %vm568_vm2, 1.0, %v9994_v12  ;;  %v681_v46 = vsel %vm569_vm3, 1.0, %v9994_v12 }
  0xcd   :  { %6664 = vmatmul.mubr.msk.f32.gmra.mxu0 %vm767_vm1, %v679_v40 }
  0xce   :  { %v303_v44 = vpop.permute.xlu1 %302  ;;  %6666 = vmatprep.mubr.msk.f32.mxu0 %vm767_vm1, %v680_v41  ;;  %v300_v45 = vpop.permute.xlu0 %299 }
  0xcf   :  { %vm570_vm4 = vcmp.eq.s32.totalorder %v300_v45, %v7742_v7  ;;  %488 = vperm.xlu1 %7210, %v183_v42   ;;  %485 = vperm.xlu0 %7209, %v182_v43   ;;  %vm571_vm5 = vcmp.eq.s32.totalorder %v303_v44, %v7742_v7 }
  0xd0   :  { %v682_v47 = vsel %vm570_vm4, 1.0, %v9994_v12  ;;  %v683_v52 = vsel %vm571_vm5, 1.0, %v9994_v12 }
  0xd1   :  { %6667 = vmatmul.mubr.msk.f32.gmra.mxu0 %vm767_vm1, %v681_v46 }
  0xd2   :  { %v309_v50 = vpop.permute.xlu1 %308  ;;  %6669 = vmatprep.mubr.msk.f32.mxu0 %vm767_vm1, %v682_v47  ;;  %v306_v51 = vpop.permute.xlu0 %305 }
  0xd3   :  { %vm572_vm6 = vcmp.eq.s32.totalorder %v306_v51, %v7742_v7  ;;  %494 = vperm.xlu1 %7210, %v185_v48   ;;  %491 = vperm.xlu0 %7209, %v184_v49   ;;  %vm573_vm7 = vcmp.eq.s32.totalorder %v309_v50, %v7742_v7 }
  0xd4   :  { %v684_v53 = vsel %vm572_vm6, 1.0, %v9994_v12  ;;  %v685_v58 = vsel %vm573_vm7, 1.0, %v9994_v12 }
  0xd5   :  { %6670 = vmatmul.mubr.msk.f32.gmra.mxu0 %vm767_vm1, %v683_v52 }
  0xd6   :  { %v315_v56 = vpop.permute.xlu1 %314  ;;  %6672 = vmatprep.mubr.msk.f32.mxu0 %vm767_vm1, %v684_v53  ;;  %v312_v57 = vpop.permute.xlu0 %311 }
  0xd7   :  { %vm574_vm8 = vcmp.eq.s32.totalorder %v312_v57, %v7742_v7  ;;  %500 = vperm.xlu1 %7210, %v187_v54   ;;  %497 = vperm.xlu0 %7209, %v186_v55   ;;  %vm575_vm9 = vcmp.eq.s32.totalorder %v315_v56, %v7742_v7 }
  0xd8   :  { %v686_v59 = vsel %vm574_vm8, 1.0, %v9994_v12  ;;  %v687_v0 = vsel %vm575_vm9, 1.0, %v9994_v12 }
  0xd9   :  { %6673 = vmatmul.mubr.msk.f32.gmra.mxu0 %vm767_vm1, %v685_v58 }
  0xda   :  { %v321_v62 = vpop.permute.xlu1 %320  ;;  %6675 = vmatprep.mubr.msk.f32.mxu0 %vm767_vm1, %v686_v59  ;;  %v318_v63 = vpop.permute.xlu0 %317 }
  0xdb   :  { %vm576_vm10 = vcmp.eq.s32.totalorder %v318_v63, %v7742_v7  ;;  %506 = vperm.xlu1 %7210, %v189_v60   ;;  %503 = vperm.xlu0 %7209, %v188_v61   ;;  %vm577_vm11 = vcmp.eq.s32.totalorder %v321_v62, %v7742_v7 }
  0xdc   :  { %v688_v1 = vsel %vm576_vm10, 1.0, %v9994_v12  ;;  %v689_v6 = vsel %vm577_vm11, 1.0, %v9994_v12 }
  0xdd   :  { %6676 = vmatmul.mubr.msk.f32.gmra.mxu0 %vm767_vm1, %v687_v0 }
  0xde   :  { %v327_v4 = vpop.permute.xlu1 %326  ;;  %6678 = vmatprep.mubr.msk.f32.mxu0 %vm767_vm1, %v688_v1  ;;  %v324_v5 = vpop.permute.xlu0 %323 }
  0xdf   :  { %vm578_vm12 = vcmp.eq.s32.totalorder %v324_v5, %v7742_v7  ;;  %512 = vperm.xlu1 %7210, %v191_v2   ;;  %509 = vperm.xlu0 %7209, %v190_v3   ;;  %vm579_vm13 = vcmp.eq.s32.totalorder %v327_v4, %v7742_v7 }
  0xe0   :  { %v690_v8 = vsel %vm578_vm12, 1.0, %v9994_v12  ;;  %v691_v14 = vsel %vm579_vm13, 1.0, %v9994_v12 }
  0xe1   :  { %6679 = vmatmul.mubr.msk.f32.gmra.mxu0 %vm767_vm1, %v689_v6 }
  0xe2   :  { %v333_v11 = vpop.permute.xlu1 %332  ;;  %6681 = vmatprep.mubr.msk.f32.mxu0 %vm767_vm1, %v690_v8  ;;  %v330_v13 = vpop.permute.xlu0 %329 }
  0xe3   :  { %vm580_vm14 = vcmp.eq.s32.totalorder %v330_v13, %v7742_v7  ;;  %518 = vperm.xlu1 %7210, %v193_v9   ;;  %515 = vperm.xlu0 %7209, %v192_v10   ;;  %vm581_vm15 = vcmp.eq.s32.totalorder %v333_v11, %v7742_v7  ;;  %v1740_v9 = vld [vmem:[%s10045_s3 + $0x38] sm:$0xff]  ;;  %v1739_v13 = vld [vmem:[%s10045_s3 + $0x30] sm:$0xff] }
  0xe4   :  { %v692_v15 = vsel %vm580_vm14, 1.0, %v9994_v12  ;;  %v693_v20 = vsel %vm581_vm15, 1.0, %v9994_v12  ;;  %6789 = vmatprep.subr.mxu1 %v1740_v9 }
  0xe5   :  { %6682 = vmatmul.mubr.msk.f32.gmra.mxu0 %vm767_vm1, %v691_v14  ;;  %6790 = vmatpush3.msra.mxu1 %v1740_v9 }
  0xe6   :  { %v339_v18 = vpop.permute.xlu1 %338  ;;  %6684 = vmatprep.mubr.msk.f32.mxu0 %vm767_vm1, %v692_v15  ;;  %v336_v19 = vpop.permute.xlu0 %335  ;;  %6791 = vmatprep.subr.mxu1 %v1739_v13 }
  0xe7   :  { %vm582_vm0 = vcmp.eq.s32.totalorder %v336_v19, %v7742_v7  ;;  %524 = vperm.xlu1 %7210, %v195_v16   ;;  %521 = vperm.xlu0 %7209, %v194_v17   ;;  %vm583_vm2 = vcmp.eq.s32.totalorder %v339_v18, %v7742_v7  ;;  %v1738_v16 = vld [vmem:[%s10045_s3 + $0x28] sm:$0xff]  ;;  %v1737_v19 = vld [vmem:[%s10045_s3 + $0x20] sm:$0xff] }
  0xe8   :  { %v694_v21 = vsel %vm582_vm0, 1.0, %v9994_v12  ;;  %v695_v26 = vsel %vm583_vm2, 1.0, %v9994_v12  ;;  %6792 = vmatpush3.msra.mxu1 %v1739_v13 }
  0xe9   :  { %6685 = vmatmul.mubr.msk.f32.gmra.mxu0 %vm767_vm1, %v693_v20  ;;  %6793 = vmatprep.subr.mxu1 %v1738_v16 }
  0xea   :  { %v345_v24 = vpop.permute.xlu1 %344  ;;  %6687 = vmatprep.mubr.msk.f32.mxu0 %vm767_vm1, %v694_v21  ;;  %v342_v25 = vpop.permute.xlu0 %341  ;;  %6794 = vmatpush3.msra.mxu1 %v1738_v16 }
  0xeb   :  { %vm584_vm3 = vcmp.eq.s32.totalorder %v342_v25, %v7742_v7  ;;  %530 = vperm.xlu1 %7210, %v197_v22   ;;  %527 = vperm.xlu0 %7209, %v196_v23   ;;  %vm585_vm4 = vcmp.eq.s32.totalorder %v345_v24, %v7742_v7  ;;  %v8126_v24 = vld [vmem:[%s10045_s3 + $0x18] sm:$0xff] }
  0xec   :  { %v696_v27 = vsel %vm584_vm3, 1.0, %v9994_v12  ;;  %v697_v32 = vsel %vm585_vm4, 1.0, %v9994_v12  ;;  %6795 = vmatprep.subr.mxu1 %v1737_v19 }
  0xed   :  { %6688 = vmatmul.mubr.msk.f32.gmra.mxu0 %vm767_vm1, %v695_v26  ;;  %6796 = vmatpush3.msra.mxu1 %v1737_v19 }
  0xee   :  { %v351_v30 = vpop.permute.xlu1 %350  ;;  %6690 = vmatprep.mubr.msk.f32.mxu0 %vm767_vm1, %v696_v27  ;;  %v348_v31 = vpop.permute.xlu0 %347  ;;  %6851 = vmatprep.subr.mxu1 %v8126_v24 }
  0xef   :  { %vm586_vm5 = vcmp.eq.s32.totalorder %v348_v31, %v7742_v7  ;;  %536 = vperm.xlu1 %7210, %v199_v28   ;;  %533 = vperm.xlu0 %7209, %v198_v29   ;;  %vm587_vm6 = vcmp.eq.s32.totalorder %v351_v30, %v7742_v7 }
  0xf0   :  { %v698_v33 = vsel %vm586_vm5, 1.0, %v9994_v12  ;;  %v699_v36 = vsel %vm587_vm6, 1.0, %v9994_v12 }
  0xf1   :  { %6691 = vmatmul.mubr.msk.f32.gmra.mxu0 %vm767_vm1, %v697_v32 }
  0xf2   :  { %v357_v34 = vpop.permute.xlu1 %356  ;;  %6693 = vmatprep.mubr.msk.f32.mxu0 %vm767_vm1, %v698_v33  ;;  %v354_v35 = vpop.permute.xlu0 %353 }
  0xf3   :  { %vm588_vm7 = vcmp.eq.s32.totalorder %v354_v35, %v7742_v7  ;;  %vm589_vm8 = vcmp.eq.s32.totalorder %v357_v34, %v7742_v7 }
  0xf4   :  { %v700_v37 = vsel %vm588_vm7, 1.0, %v9994_v12  ;;  %v701_v40 = vsel %vm589_vm8, 1.0, %v9994_v12 }
  0xf5   :  { %6694 = vmatmul.mubr.msk.f32.gmra.mxu0 %vm767_vm1, %v699_v36 }
  0xf6   :  { %v363_v38 = vpop.permute.xlu1 %362  ;;  %6696 = vmatprep.mubr.msk.f32.mxu0 %vm767_vm1, %v700_v37  ;;  %v360_v39 = vpop.permute.xlu0 %359 }
  0xf7   :  { %vm590_vm9 = vcmp.eq.s32.totalorder %v360_v39, %v7742_v7  ;;  %vm591_vm10 = vcmp.eq.s32.totalorder %v363_v38, %v7742_v7 }
  0xf8   :  { %v702_v41 = vsel %vm590_vm9, 1.0, %v9994_v12  ;;  %v703_v44 = vsel %vm591_vm10, 1.0, %v9994_v12 }
  0xf9   :  { %6697 = vmatmul.mubr.msk.f32.gmra.mxu0 %vm767_vm1, %v701_v40 }
  0xfa   :  { %v369_v42 = vpop.permute.xlu1 %368  ;;  %6699 = vmatprep.mubr.msk.f32.mxu0 %vm767_vm1, %v702_v41  ;;  %v366_v43 = vpop.permute.xlu0 %365 }
  0xfb   :  { %vm592_vm11 = vcmp.eq.s32.totalorder %v366_v43, %v7742_v7  ;;  %vm593_vm12 = vcmp.eq.s32.totalorder %v369_v42, %v7742_v7 }
  0xfc   :  { %v704_v45 = vsel %vm592_vm11, 1.0, %v9994_v12  ;;  %v705_v48 = vsel %vm593_vm12, 1.0, %v9994_v12 }
  0xfd   :  { %6700 = vmatmul.mubr.msk.f32.gmra.mxu0 %vm767_vm1, %v703_v44 }
  0xfe   :  { %v375_v46 = vpop.permute.xlu1 %374  ;;  %6702 = vmatprep.mubr.msk.f32.mxu0 %vm767_vm1, %v704_v45  ;;  %v372_v47 = vpop.permute.xlu0 %371 }
  0xff   :  { %vm594_vm13 = vcmp.eq.s32.totalorder %v372_v47, %v7742_v7  ;;  %vm595_vm14 = vcmp.eq.s32.totalorder %v375_v46, %v7742_v7 }
 0x100   :  { %v706_v49 = vsel %vm594_vm13, 1.0, %v9994_v12  ;;  %v707_v52 = vsel %vm595_vm14, 1.0, %v9994_v12 }
 0x101   :  { %6703 = vmatmul.mubr.msk.f32.gmra.mxu0 %vm767_vm1, %v705_v48 }
 0x102   :  { %v381_v50 = vpop.permute.xlu1 %380  ;;  %6705 = vmatprep.mubr.msk.f32.mxu0 %vm767_vm1, %v706_v49  ;;  %v378_v51 = vpop.permute.xlu0 %377 }
 0x103   :  { %vm596_vm15 = vcmp.eq.s32.totalorder %v378_v51, %v7742_v7  ;;  %vm597_vm0 = vcmp.eq.s32.totalorder %v381_v50, %v7742_v7 }
 0x104   :  { %v708_v53 = vsel %vm596_vm15, 1.0, %v9994_v12  ;;  %v709_v56 = vsel %vm597_vm0, 1.0, %v9994_v12 }
 0x105   :  { %6706 = vmatmul.mubr.msk.f32.gmra.mxu0 %vm767_vm1, %v707_v52 }
 0x106   :  { %v387_v54 = vpop.permute.xlu1 %386  ;;  %6708 = vmatprep.mubr.msk.f32.mxu0 %vm767_vm1, %v708_v53  ;;  %v384_v55 = vpop.permute.xlu0 %383 }
 0x107   :  { %vm598_vm2 = vcmp.eq.s32.totalorder %v384_v55, %v7742_v7  ;;  %vm599_vm3 = vcmp.eq.s32.totalorder %v387_v54, %v7742_v7 }
 0x108   :  { %v710_v57 = vsel %vm598_vm2, 1.0, %v9994_v12  ;;  %v711_v60 = vsel %vm599_vm3, 1.0, %v9994_v12 }
 0x109   :  { %6709 = vmatmul.mubr.msk.f32.gmra.mxu0 %vm767_vm1, %v709_v56 }
 0x10a   :  { %v393_v58 = vpop.permute.xlu1 %392  ;;  %6711 = vmatprep.mubr.msk.f32.mxu0 %vm767_vm1, %v710_v57  ;;  %v390_v59 = vpop.permute.xlu0 %389 }
 0x10b   :  { %vm600_vm4 = vcmp.eq.s32.totalorder %v390_v59, %v7742_v7  ;;  %vm601_vm5 = vcmp.eq.s32.totalorder %v393_v58, %v7742_v7 }
 0x10c   :  { %v712_v61 = vsel %vm600_vm4, 1.0, %v9994_v12  ;;  %v713_v0 = vsel %vm601_vm5, 1.0, %v9994_v12 }
 0x10d   :  { %6712 = vmatmul.mubr.msk.f32.gmra.mxu0 %vm767_vm1, %v711_v60 }
 0x10e   :  { %v399_v62 = vpop.permute.xlu1 %398  ;;  %6714 = vmatprep.mubr.msk.f32.mxu0 %vm767_vm1, %v712_v61  ;;  %v396_v63 = vpop.permute.xlu0 %395 }
 0x10f   :  { %vm602_vm6 = vcmp.eq.s32.totalorder %v396_v63, %v7742_v7  ;;  %vm603_vm7 = vcmp.eq.s32.totalorder %v399_v62, %v7742_v7 }
 0x110   :  { %v714_v1 = vsel %vm602_vm6, 1.0, %v9994_v12  ;;  %v715_v4 = vsel %vm603_vm7, 1.0, %v9994_v12 }
 0x111   :  { %6715 = vmatmul.mubr.msk.f32.gmra.mxu0 %vm767_vm1, %v713_v0 }
 0x112   :  { %v405_v2 = vpop.permute.xlu1 %404  ;;  %6717 = vmatprep.mubr.msk.f32.mxu0 %vm767_vm1, %v714_v1  ;;  %v402_v3 = vpop.permute.xlu0 %401 }
 0x113   :  { %vm604_vm8 = vcmp.eq.s32.totalorder %v402_v3, %v7742_v7  ;;  %vm605_vm9 = vcmp.eq.s32.totalorder %v405_v2, %v7742_v7 }
 0x114   :  { %v716_v5 = vsel %vm604_vm8, 1.0, %v9994_v12  ;;  %v717_v10 = vsel %vm605_vm9, 1.0, %v9994_v12 }
 0x115   :  { %6718 = vmatmul.mubr.msk.f32.gmra.mxu0 %vm767_vm1, %v715_v4 }
 0x116   :  { %v411_v6 = vpop.permute.xlu1 %410  ;;  %6720 = vmatprep.mubr.msk.f32.mxu0 %vm767_vm1, %v716_v5  ;;  %v408_v8 = vpop.permute.xlu0 %407 }
 0x117   :  { %vm606_vm10 = vcmp.eq.s32.totalorder %v408_v8, %v7742_v7  ;;  %vm607_vm11 = vcmp.eq.s32.totalorder %v411_v6, %v7742_v7 }
 0x118   :  { %v718_v11 = vsel %vm606_vm10, 1.0, %v9994_v12  ;;  %v719_v17 = vsel %vm607_vm11, 1.0, %v9994_v12 }
 0x119   :  { %6721 = vmatmul.mubr.msk.f32.gmra.mxu0 %vm767_vm1, %v717_v10 }
 0x11a   :  { %v417_v14 = vpop.permute.xlu1 %416  ;;  %6723 = vmatprep.mubr.msk.f32.mxu0 %vm767_vm1, %v718_v11  ;;  %v414_v15 = vpop.permute.xlu0 %413 }
 0x11b   :  { %vm608_vm12 = vcmp.eq.s32.totalorder %v414_v15, %v7742_v7  ;;  %vm609_vm13 = vcmp.eq.s32.totalorder %v417_v14, %v7742_v7 }
 0x11c   :  { %v720_v18 = vsel %vm608_vm12, 1.0, %v9994_v12  ;;  %v721_v22 = vsel %vm609_vm13, 1.0, %v9994_v12 }
 0x11d   :  { %6724 = vmatmul.mubr.msk.f32.gmra.mxu0 %vm767_vm1, %v719_v17 }
 0x11e   :  { %v423_v20 = vpop.permute.xlu1 %422  ;;  %6726 = vmatprep.mubr.msk.f32.mxu0 %vm767_vm1, %v720_v18  ;;  %v420_v21 = vpop.permute.xlu0 %419 }
 0x11f   :  { %vm610_vm14 = vcmp.eq.s32.totalorder %v420_v21, %v7742_v7  ;;  %vm611_vm15 = vcmp.eq.s32.totalorder %v423_v20, %v7742_v7 }
 0x120   :  { %v722_v23 = vsel %vm610_vm14, 1.0, %v9994_v12  ;;  %v723_v27 = vsel %vm611_vm15, 1.0, %v9994_v12 }
 0x121   :  { %6727 = vmatmul.mubr.msk.f32.gmra.mxu0 %vm767_vm1, %v721_v22 }
 0x122   :  { %v429_v25 = vpop.permute.xlu1 %428  ;;  %6729 = vmatprep.mubr.msk.f32.mxu0 %vm767_vm1, %v722_v23  ;;  %v426_v26 = vpop.permute.xlu0 %425 }
 0x123   :  { %vm612_vm0 = vcmp.eq.s32.totalorder %v426_v26, %v7742_v7  ;;  %vm613_vm2 = vcmp.eq.s32.totalorder %v429_v25, %v7742_v7 }
 0x124   :  { %v724_v28 = vsel %vm612_vm0, 1.0, %v9994_v12  ;;  %v725_v31 = vsel %vm613_vm2, 1.0, %v9994_v12 }
 0x125   :  { %6730 = vmatmul.mubr.msk.f32.gmra.mxu0 %vm767_vm1, %v723_v27 }
 0x126   :  { %v435_v29 = vpop.permute.xlu1 %434  ;;  %6732 = vmatprep.mubr.msk.f32.mxu0 %vm767_vm1, %v724_v28  ;;  %v432_v30 = vpop.permute.xlu0 %431 }
 0x127   :  { %vm614_vm3 = vcmp.eq.s32.totalorder %v432_v30, %v7742_v7  ;;  %vm615_vm4 = vcmp.eq.s32.totalorder %v435_v29, %v7742_v7 }
 0x128   :  { %v726_v32 = vsel %vm614_vm3, 1.0, %v9994_v12  ;;  %v727_v35 = vsel %vm615_vm4, 1.0, %v9994_v12 }
 0x129   :  { %6733 = vmatmul.mubr.msk.f32.gmra.mxu0 %vm767_vm1, %v725_v31 }
 0x12a   :  { %v441_v33 = vpop.permute.xlu1 %440  ;;  %6735 = vmatprep.mubr.msk.f32.mxu0 %vm767_vm1, %v726_v32  ;;  %v438_v34 = vpop.permute.xlu0 %437 }
 0x12b   :  { %vm616_vm5 = vcmp.eq.s32.totalorder %v438_v34, %v7742_v7  ;;  %vm617_vm6 = vcmp.eq.s32.totalorder %v441_v33, %v7742_v7 }
 0x12c   :  { %v728_v36 = vsel %vm616_vm5, 1.0, %v9994_v12  ;;  %v729_v39 = vsel %vm617_vm6, 1.0, %v9994_v12 }
 0x12d   :  { %6736 = vmatmul.mubr.msk.f32.gmra.mxu0 %vm767_vm1, %v727_v35 }
 0x12e   :  { %v447_v37 = vpop.permute.xlu1 %446  ;;  %6738 = vmatprep.mubr.msk.f32.mxu0 %vm767_vm1, %v728_v36  ;;  %v444_v38 = vpop.permute.xlu0 %443 }
 0x12f   :  { %vm618_vm7 = vcmp.eq.s32.totalorder %v444_v38, %v7742_v7  ;;  %vm619_vm8 = vcmp.eq.s32.totalorder %v447_v37, %v7742_v7 }
 0x130   :  { %v730_v40 = vsel %vm618_vm7, 1.0, %v9994_v12  ;;  %v731_v43 = vsel %vm619_vm8, 1.0, %v9994_v12 }
 0x131   :  { %6739 = vmatmul.mubr.msk.f32.gmra.mxu0 %vm767_vm1, %v729_v39 }
 0x132   :  { %v453_v41 = vpop.permute.xlu1 %452  ;;  %6741 = vmatprep.mubr.msk.f32.mxu0 %vm767_vm1, %v730_v40  ;;  %v450_v42 = vpop.permute.xlu0 %449 }
 0x133   :  { %vm620_vm9 = vcmp.eq.s32.totalorder %v450_v42, %v7742_v7  ;;  %vm621_vm10 = vcmp.eq.s32.totalorder %v453_v41, %v7742_v7 }
 0x134   :  { %v732_v44 = vsel %vm620_vm9, 1.0, %v9994_v12  ;;  %v733_v47 = vsel %vm621_vm10, 1.0, %v9994_v12 }
 0x135   :  { %6742 = vmatmul.mubr.msk.f32.gmra.mxu0 %vm767_vm1, %v731_v43 }
 0x136   :  { %v459_v45 = vpop.permute.xlu1 %458  ;;  %6744 = vmatprep.mubr.msk.f32.mxu0 %vm767_vm1, %v732_v44  ;;  %v456_v46 = vpop.permute.xlu0 %455 }
 0x137   :  { %vm622_vm11 = vcmp.eq.s32.totalorder %v456_v46, %v7742_v7  ;;  %vm623_vm12 = vcmp.eq.s32.totalorder %v459_v45, %v7742_v7 }
 0x138   :  { %v734_v48 = vsel %vm622_vm11, 1.0, %v9994_v12  ;;  %v735_v51 = vsel %vm623_vm12, 1.0, %v9994_v12 }
 0x139   :  { %6745 = vmatmul.mubr.msk.f32.gmra.mxu0 %vm767_vm1, %v733_v47 }
 0x13a   :  { %v465_v49 = vpop.permute.xlu1 %464  ;;  %6747 = vmatprep.mubr.msk.f32.mxu0 %vm767_vm1, %v734_v48  ;;  %v462_v50 = vpop.permute.xlu0 %461 }
 0x13b   :  { %vm624_vm13 = vcmp.eq.s32.totalorder %v462_v50, %v7742_v7  ;;  %vm625_vm14 = vcmp.eq.s32.totalorder %v465_v49, %v7742_v7 }
 0x13c   :  { %v736_v52 = vsel %vm624_vm13, 1.0, %v9994_v12  ;;  %v737_v55 = vsel %vm625_vm14, 1.0, %v9994_v12 }
 0x13d   :  { %6748 = vmatmul.mubr.msk.f32.gmra.mxu0 %vm767_vm1, %v735_v51 }
 0x13e   :  { %v471_v53 = vpop.permute.xlu1 %470  ;;  %6750 = vmatprep.mubr.msk.f32.mxu0 %vm767_vm1, %v736_v52  ;;  %v468_v54 = vpop.permute.xlu0 %467 }
 0x13f   :  { %vm626_vm15 = vcmp.eq.s32.totalorder %v468_v54, %v7742_v7  ;;  %vm627_vm0 = vcmp.eq.s32.totalorder %v471_v53, %v7742_v7 }
 0x140   :  { %v738_v56 = vsel %vm626_vm15, 1.0, %v9994_v12  ;;  %v739_v59 = vsel %vm627_vm0, 1.0, %v9994_v12 }
 0x141   :  { %6751 = vmatmul.mubr.msk.f32.gmra.mxu0 %vm767_vm1, %v737_v55 }
 0x142   :  { %v477_v57 = vpop.permute.xlu1 %476  ;;  %6753 = vmatprep.mubr.msk.f32.mxu0 %vm767_vm1, %v738_v56  ;;  %v474_v58 = vpop.permute.xlu0 %473 }
 0x143   :  { %vm628_vm2 = vcmp.eq.s32.totalorder %v474_v58, %v7742_v7  ;;  %vm629_vm3 = vcmp.eq.s32.totalorder %v477_v57, %v7742_v7 }
 0x144   :  { %v740_v60 = vsel %vm628_vm2, 1.0, %v9994_v12  ;;  %v741_v63 = vsel %vm629_vm3, 1.0, %v9994_v12 }
 0x145   :  { %6754 = vmatmul.mubr.msk.f32.gmra.mxu0 %vm767_vm1, %v739_v59 }
 0x146   :  { %v483_v61 = vpop.permute.xlu1 %482  ;;  %6756 = vmatprep.mubr.msk.f32.mxu0 %vm767_vm1, %v740_v60  ;;  %v480_v62 = vpop.permute.xlu0 %479 }
 0x147   :  { %vm630_vm4 = vcmp.eq.s32.totalorder %v480_v62, %v7742_v7  ;;  %vm631_vm5 = vcmp.eq.s32.totalorder %v483_v61, %v7742_v7 }
 0x148   :  { %v742_v0 = vsel %vm630_vm4, 1.0, %v9994_v12  ;;  %v743_v3 = vsel %vm631_vm5, 1.0, %v9994_v12 }
 0x149   :  { %6757 = vmatmul.mubr.msk.f32.gmra.mxu0 %vm767_vm1, %v741_v63 }
 0x14a   :  { %v489_v1 = vpop.permute.xlu1 %488  ;;  %6759 = vmatprep.mubr.msk.f32.mxu0 %vm767_vm1, %v742_v0  ;;  %v486_v2 = vpop.permute.xlu0 %485 }
 0x14b   :  { %vm632_vm6 = vcmp.eq.s32.totalorder %v486_v2, %v7742_v7  ;;  %vm633_vm7 = vcmp.eq.s32.totalorder %v489_v1, %v7742_v7 }
 0x14c   :  { %v744_v4 = vsel %vm632_vm6, 1.0, %v9994_v12  ;;  %v745_v8 = vsel %vm633_vm7, 1.0, %v9994_v12 }
 0x14d   :  { %6760 = vmatmul.mubr.msk.f32.gmra.mxu0 %vm767_vm1, %v743_v3 }
 0x14e   :  { %v495_v5 = vpop.permute.xlu1 %494  ;;  %6762 = vmatprep.mubr.msk.f32.mxu0 %vm767_vm1, %v744_v4  ;;  %v492_v6 = vpop.permute.xlu0 %491 }
 0x14f   :  { %vm634_vm8 = vcmp.eq.s32.totalorder %v492_v6, %v7742_v7  ;;  %vm635_vm9 = vcmp.eq.s32.totalorder %v495_v5, %v7742_v7 }
 0x150   :  { %v746_v9 = vsel %vm634_vm8, 1.0, %v9994_v12  ;;  %v747_v13 = vsel %vm635_vm9, 1.0, %v9994_v12 }
 0x151   :  { %6763 = vmatmul.mubr.msk.f32.gmra.mxu0 %vm767_vm1, %v745_v8 }
 0x152   :  { %v501_v10 = vpop.permute.xlu1 %500  ;;  %6765 = vmatprep.mubr.msk.f32.mxu0 %vm767_vm1, %v746_v9  ;;  %v498_v11 = vpop.permute.xlu0 %497 }
 0x153   :  { %vm636_vm10 = vcmp.eq.s32.totalorder %v498_v11, %v7742_v7  ;;  %vm637_vm11 = vcmp.eq.s32.totalorder %v501_v10, %v7742_v7 }
 0x154   :  { %v748_v14 = vsel %vm636_vm10, 1.0, %v9994_v12  ;;  %v749_v19 = vsel %vm637_vm11, 1.0, %v9994_v12 }
 0x155   :  { %v8208_v15 = vpop.f32.mrf.mxu0  ;;  %6766 = vmatmul.mubr.msk.f32.gmra.mxu0 %vm767_vm1, %v747_v13 }
 0x156   :  { %v507_v16 = vpop.permute.xlu1 %506  ;;  %6768 = vmatprep.mubr.msk.f32.mxu0 %vm767_vm1, %v748_v14  ;;  %v504_v17 = vpop.permute.xlu0 %503 }
 0x157   :  { %vm638_vm12 = vcmp.eq.s32.totalorder %v504_v17, %v7742_v7  ;;  %v8213_v18 = vpop.f32.mrf.mxu0  ;;  %vm639_vm13 = vcmp.eq.s32.totalorder %v507_v16, %v7742_v7  ;;  %v1735_v17 = vld [vmem:[%s10045_s3 + $0x10] sm:$0xff] }
 0x158   :  { %v750_v20 = vsel %vm638_vm12, 1.0, %v9994_v12  ;;  %v751_v26 = vsel %vm639_vm13, 1.0, %v9994_v12 }
 0x159   :  { %v8218_v21 = vpop.f32.mrf.mxu0  ;;  %6769 = vmatmul.mubr.msk.f32.gmra.mxu0 %vm767_vm1, %v749_v19 }
 0x15a   :  { %v513_v22 = vpop.permute.xlu1 %512  ;;  %6771 = vmatprep.mubr.msk.f32.mxu0 %vm767_vm1, %v750_v20  ;;  %v510_v23 = vpop.permute.xlu0 %509  ;;  %v1734_v20 = vld [vmem:[%s10045_s3 + $0x8] sm:$0xff] }
 0x15b   :  { %vm640_vm14 = vcmp.eq.s32.totalorder %v510_v23, %v7742_v7  ;;  %v8223_v25 = vpop.f32.mrf.mxu0  ;;  %vm641_vm15 = vcmp.eq.s32.totalorder %v513_v22, %v7742_v7  ;;  %v1733_v23 = vld [vmem:[%s10045_s3] sm:$0xff]  ;;  %s10046_s3 = sld [smem:[#allocation49_spill]] }
 0x15c   :  { %v752_v27 = vsel %vm640_vm14, 1.0, %v9994_v12  ;;  %v753_v32 = vsel %vm641_vm15, 1.0, %v9994_v12 }
 0x15d   :  { %v8228_v28 = vpop.f32.mrf.mxu0  ;;  %6772 = vmatmul.mubr.msk.f32.gmra.mxu0 %vm767_vm1, %v751_v26 }
 0x15e   :  { %v519_v29 = vpop.permute.xlu1 %518  ;;  %6774 = vmatprep.mubr.msk.f32.mxu0 %vm767_vm1, %v752_v27  ;;  %v516_v30 = vpop.permute.xlu0 %515 }
 0x15f   :  { %vm642_vm0 = vcmp.eq.s32.totalorder %v516_v30, %v7742_v7  ;;  %v8233_v31 = vpop.f32.mrf.mxu0  ;;  %vm643_vm2 = vcmp.eq.s32.totalorder %v519_v29, %v7742_v7 }
 0x160   :  { %v754_v33 = vsel %vm642_vm0, 1.0, %v9994_v12  ;;  %v755_v38 = vsel %vm643_vm2, 1.0, %v9994_v12 }
 0x161   :  { %v8238_v34 = vpop.f32.mrf.mxu0  ;;  %6775 = vmatmul.mubr.msk.f32.gmra.mxu0 %vm767_vm1, %v753_v32 }
 0x162   :  { %v525_v35 = vpop.permute.xlu1 %524  ;;  %6777 = vmatprep.mubr.msk.f32.mxu0 %vm767_vm1, %v754_v33  ;;  %v522_v36 = vpop.permute.xlu0 %521 }
 0x163   :  { %vm644_vm3 = vcmp.eq.s32.totalorder %v522_v36, %v7742_v7  ;;  %v8243_v37 = vpop.f32.mrf.mxu0  ;;  %vm645_vm4 = vcmp.eq.s32.totalorder %v525_v35, %v7742_v7 }
 0x164   :  { %v756_v39 = vsel %vm644_vm3, 1.0, %v9994_v12  ;;  %v757_v44 = vsel %vm645_vm4, 1.0, %v9994_v12 }
 0x165   :  { %v8248_v40 = vpop.f32.mrf.mxu0  ;;  %6778 = vmatmul.mubr.msk.f32.gmra.mxu0 %vm767_vm1, %v755_v38 }
 0x166   :  { %v531_v41 = vpop.permute.xlu1 %530  ;;  %6780 = vmatprep.mubr.msk.f32.mxu0 %vm767_vm1, %v756_v39  ;;  %v528_v42 = vpop.permute.xlu0 %527 }
 0x167   :  { %vm646_vm5 = vcmp.eq.s32.totalorder %v528_v42, %v7742_v7  ;;  %v8253_v43 = vpop.f32.mrf.mxu0  ;;  %vm647_vm6 = vcmp.eq.s32.totalorder %v531_v41, %v7742_v7 }
 0x168   :  { %v758_v45 = vsel %vm646_vm5, 1.0, %v9994_v12  ;;  %v759_v50 = vsel %vm647_vm6, 1.0, %v9994_v12 }
 0x169   :  { %v8258_v46 = vpop.f32.mrf.mxu0  ;;  %6781 = vmatmul.mubr.msk.f32.gmra.mxu0 %vm767_vm1, %v757_v44 }
 0x16a   :  { %v537_v47 = vpop.permute.xlu1 %536  ;;  %6783 = vmatprep.mubr.msk.f32.mxu0 %vm767_vm1, %v758_v45  ;;  %v534_v48 = vpop.permute.xlu0 %533 }
 0x16b   :  { %vm648_vm7 = vcmp.eq.s32.totalorder %v534_v48, %v7742_v7  ;;  %v8263_v49 = vpop.f32.mrf.mxu0  ;;  %vm649_vm8 = vcmp.eq.s32.totalorder %v537_v47, %v7742_v7 }
 0x16c   :  { %v760_v51 = vsel %vm648_vm7, 1.0, %v9994_v12  ;;  %v761_v54 = vsel %vm649_vm8, 1.0, %v9994_v12 }
 0x16d   :  { %v8268_v52 = vpop.f32.mrf.mxu0  ;;  %6784 = vmatmul.mubr.msk.f32.gmra.mxu0 %vm767_vm1, %v759_v50 }
 0x16e   :  { %6786 = vmatprep.mubr.msk.f32.mxu0 %vm767_vm1, %v760_v51 }
 0x16f   :  { %v8272_v53 = vpop.f32.mrf.mxu0 }
 0x171   :  { %v8275_v55 = vpop.f32.mrf.mxu0  ;;  %6787 = vmatmul.mubr.msk.f32.gmra.mxu0 %vm767_vm1, %v761_v54  ;;  %vm1741_vm1 = vcmask 261120  }
 0x173   :  { %v8278_v56 = vpop.f32.mrf.mxu0 }
 0x175   :  { %v8280_v57 = vpop.f32.mrf.mxu0 }
 0x177   :  { %v8282_v58 = vpop.f32.mrf.mxu0 }
 0x179   :  { %v8284_v7 = vpop.f32.mrf.mxu0 }
 0x17b   :  { %v8286_v59 = vpop.f32.mrf.mxu0 }
 0x17d   :  { %v8288_v60 = vpop.f32.mrf.mxu0 }
 0x17f   :  { %v8290_v61 = vpop.f32.mrf.mxu0 }
 0x181   :  { %v8292_v62 = vpop.f32.mrf.mxu0 }
 0x183   :  { %v8294_v63 = vpop.f32.mrf.mxu0 }
 0x185   :  { %v8296_v0 = vpop.f32.mrf.mxu0 }
 0x187   :  { %v8298_v1 = vpop.f32.mrf.mxu0 }
 0x189   :  { %v8300_v2 = vpop.f32.mrf.mxu0 }
 0x18b   :  { %v8302_v3 = vpop.f32.mrf.mxu0 }
 0x18d   :  { %v8304_v4 = vpop.f32.mrf.mxu0 }
 0x18f   :  { %v8306_v5 = vpop.f32.mrf.mxu0 }
 0x191   :  { %v8308_v6 = vpop.f32.mrf.mxu0 }
 0x193   :  { %v8310_v8 = vpop.f32.mrf.mxu0 }
 0x195   :  { %v8312_v9 = vpop.f32.mrf.mxu0 }
 0x197   :  { %v8314_v10 = vpop.f32.mrf.mxu0 }
 0x199   :  { %v8316_v11 = vpop.f32.mrf.mxu0 }
 0x19b   :  { %v8318_v13 = vpop.f32.mrf.mxu0 }
 0x19d   :  { %v6677_v14 = vpop.f32.mrf.mxu0 }
 0x19f   :  { %v1354_v16 = vpop.f32.mrf.mxu0 }
 0x1a0   :  { %6797 = vmatprep.mubr.msk.f32.mxu1 %vm1741_vm1, %v1354_v16 }
 0x1a1   :  { %v6680_v19 = vpop.f32.mrf.mxu0  ;;  %6798 = vmatmul.mubr.msk.f32.vlgmr.msra.gmra.mxu1 %vm1741_vm1, %v6677_v14 }
 0x1a2   :  { %6852 = vmatpush3.msra.mxu1 %v8126_v24 }
 0x1a3   :  { %v1364_v22 = vpop.f32.mrf.mxu0  ;;  %6853 = vmatprep.subr.mxu1 %v1735_v17 }
 0x1a4   :  { %6800 = vmatprep.mubr.msk.f32.mxu1 %vm1741_vm1, %v1364_v22  ;;  %6854 = vmatpush3.msra.mxu1 %v1735_v17 }
 0x1a5   :  { %v6683_v26 = vpop.f32.mrf.mxu0  ;;  %6801 = vmatmul.mubr.msk.f32.gmra.mxu1 %vm1741_vm1, %v6680_v19  ;;  %6855 = vmatprep.subr.mxu1 %v1734_v20 }
 0x1a6   :  { %6856 = vmatpush3.msra.mxu1 %v1734_v20 }
 0x1a7   :  { %v1374_v27 = vpop.f32.mrf.mxu0  ;;  %6857 = vmatprep.subr.mxu1 %v1733_v23 }
 0x1a8   :  { %6803 = vmatprep.mubr.msk.f32.mxu1 %vm1741_vm1, %v1374_v27  ;;  %6858 = vmatpush3.msra.mxu1 %v1733_v23 }
 0x1a9   :  { %v6686_v24 = vpop.f32.mrf.mxu0  ;;  %6804 = vmatmul.mubr.msk.f32.gmra.mxu1 %vm1741_vm1, %v6683_v26 }
 0x1ab   :  { %v1384_v29 = vpop.f32.mrf.mxu0 }
 0x1ac   :  { %6806 = vmatprep.mubr.msk.f32.mxu1 %vm1741_vm1, %v1384_v29 }
 0x1ad   :  { %v6689_v30 = vpop.f32.mrf.mxu0  ;;  %6807 = vmatmul.mubr.msk.f32.gmra.mxu1 %vm1741_vm1, %v6686_v24 }
 0x1af   :  { %v1394_v32 = vpop.f32.mrf.mxu0 }
 0x1b0   :  { %6809 = vmatprep.mubr.msk.f32.mxu1 %vm1741_vm1, %v1394_v32  ;;  %v2530_v32 = vld [vmem:[%s10046_s3 + $0x18] sm:$0xff] }
 0x1b1   :  { %v6692_v33 = vpop.f32.mrf.mxu0  ;;  %6810 = vmatmul.mubr.msk.f32.gmra.mxu1 %vm1741_vm1, %v6689_v30  ;;  %6913 = vmatprep.subr.mxu1 %v2530_v32 }
 0x1b3   :  { %v1404_v35 = vpop.f32.mrf.mxu0 }
 0x1b4   :  { %6812 = vmatprep.mubr.msk.f32.mxu1 %vm1741_vm1, %v1404_v35 }
 0x1b5   :  { %v6695_v36 = vpop.f32.mrf.mxu0  ;;  %6813 = vmatmul.mubr.msk.f32.gmra.mxu1 %vm1741_vm1, %v6692_v33 }
 0x1b7   :  { %v1414_v38 = vpop.f32.mrf.mxu0 }
 0x1b8   :  { %6815 = vmatprep.mubr.msk.f32.mxu1 %vm1741_vm1, %v1414_v38 }
 0x1b9   :  { %v6698_v39 = vpop.f32.mrf.mxu0  ;;  %6816 = vmatmul.mubr.msk.f32.gmra.mxu1 %vm1741_vm1, %v6695_v36 }
 0x1bb   :  { %v1424_v41 = vpop.f32.mrf.mxu0 }
 0x1bc   :  { %6818 = vmatprep.mubr.msk.f32.mxu1 %vm1741_vm1, %v1424_v41 }
 0x1bd   :  { %v6701_v42 = vpop.f32.mrf.mxu0  ;;  %6819 = vmatmul.mubr.msk.f32.gmra.mxu1 %vm1741_vm1, %v6698_v39 }
 0x1bf   :  { %v1434_v44 = vpop.f32.mrf.mxu0 }
 0x1c0   :  { %6821 = vmatprep.mubr.msk.f32.mxu1 %vm1741_vm1, %v1434_v44 }
 0x1c1   :  { %v6704_v45 = vpop.f32.mrf.mxu0  ;;  %6822 = vmatmul.mubr.msk.f32.gmra.mxu1 %vm1741_vm1, %v6701_v42 }
 0x1c3   :  { %v1444_v47 = vpop.f32.mrf.mxu0 }
 0x1c4   :  { %6824 = vmatprep.mubr.msk.f32.mxu1 %vm1741_vm1, %v1444_v47  ;;  %v8525_v47 = vld [vmem:[%s10048_s7] ss:$0 sm:$0xff] }
 0x1c5   :  { %v6707_v48 = vpop.f32.mrf.mxu0  ;;  %6825 = vmatmul.mubr.msk.f32.gmra.mxu1 %vm1741_vm1, %v6704_v45 }
 0x1c7   :  { %v1454_v50 = vpop.f32.mrf.mxu0 }
 0x1c8   :  { %6827 = vmatprep.mubr.msk.f32.mxu1 %vm1741_vm1, %v1454_v50 }
 0x1c9   :  { %v6710_v51 = vpop.f32.mrf.mxu0  ;;  %6828 = vmatmul.mubr.msk.f32.gmra.mxu1 %vm1741_vm1, %v6707_v48 }
 0x1cb   :  { %v1464_v54 = vpop.f32.mrf.mxu0 }
 0x1cc   :  { %6830 = vmatprep.mubr.msk.f32.mxu1 %vm1741_vm1, %v1464_v54 }
 0x1cd   :  { %v6713_v14 = vpop.f32.mrf.mxu0  ;;  %6831 = vmatmul.mubr.msk.f32.gmra.mxu1 %vm1741_vm1, %v6710_v51 }
 0x1cf   :  { %v1474_v16 = vpop.f32.mrf.mxu0 }
 0x1d0   :  { %6833 = vmatprep.mubr.msk.f32.mxu1 %vm1741_vm1, %v1474_v16 }
 0x1d1   :  { %v6716_v17 = vpop.f32.mrf.mxu0  ;;  %6834 = vmatmul.mubr.msk.f32.gmra.mxu1 %vm1741_vm1, %v6713_v14 }
 0x1d3   :  { %v1484_v19 = vpop.f32.mrf.mxu0 }
 0x1d4   :  { %6836 = vmatprep.mubr.msk.f32.mxu1 %vm1741_vm1, %v1484_v19 }
 0x1d5   :  { %v6719_v20 = vpop.f32.mrf.mxu0  ;;  %6837 = vmatmul.mubr.msk.f32.gmra.mxu1 %vm1741_vm1, %v6716_v17 }
 0x1d7   :  { %v1494_v22 = vpop.f32.mrf.mxu0 }
 0x1d8   :  { %6839 = vmatprep.mubr.msk.f32.mxu1 %vm1741_vm1, %v1494_v22 }
 0x1d9   :  { %v6722_v23 = vpop.f32.mrf.mxu0  ;;  %6840 = vmatmul.mubr.msk.f32.gmra.mxu1 %vm1741_vm1, %v6719_v20 }
 0x1db   :  { %v1504_v26 = vpop.f32.mrf.mxu0 }
 0x1dc   :  { %6842 = vmatprep.mubr.msk.f32.mxu1 %vm1741_vm1, %v1504_v26 }
 0x1dd   :  { %v6725_v27 = vpop.f32.mrf.mxu0  ;;  %6843 = vmatmul.mubr.msk.f32.gmra.mxu1 %vm1741_vm1, %v6722_v23 }
 0x1df   :  { %v1514_v24 = vpop.f32.mrf.mxu0 }
 0x1e0   :  { %6845 = vmatprep.mubr.msk.f32.mxu1 %vm1741_vm1, %v1514_v24 }
 0x1e1   :  { %v6728_v29 = vpop.f32.mrf.mxu0  ;;  %6846 = vmatmul.mubr.msk.f32.gmra.mxu1 %vm1741_vm1, %v6725_v27 }
 0x1e3   :  { %v1524_v30 = vpop.f32.mrf.mxu0 }
 0x1e4   :  { %6848 = vmatprep.mubr.msk.f32.mxu1 %vm1741_vm1, %v1524_v30  ;;  %v2897_v30 = vld [vmem:[%s10047_s9 + $0x30] sm:$0xff] }
 0x1e5   :  { %6849 = vmatmul.mubr.msk.f32.gmra.mxu1 %vm1741_vm1, %v6728_v29  ;;  %v8529_v17 = vpop.f32.mrf.mxu0 }
 0x1e6   :  { %6859 = vmatprep.mubr.msk.f32.mxu1 %vm1741_vm1, %v8213_v18  ;;  %v2528_v18 = vld [vmem:[%s10046_s3 + $0x8] sm:$0xff] }
 0x1e9   :  { %6860 = vmatmul.mubr.msk.f32.vlgmr.msra.gmra.mxu1 %vm1741_vm1, %v8208_v15  ;;  %v2529_v15 = vld [vmem:[%s10046_s3 + $0x10] sm:$0xff] }
 0x1ea   :  { %6862 = vmatprep.mubr.msk.f32.mxu1 %vm1741_vm1, %v8223_v25  ;;  %6914 = vmatpush3.msra.mxu1 %v2530_v32  ;;  %v2527_v25 = vld [vmem:[%s10046_s3] sm:$0xff]  ;;  %v8537_v32 = vpop.f32.mrf.mxu0 }
 0x1eb   :  { %6915 = vmatprep.subr.mxu1 %v2529_v15 }
 0x1ec   :  { %6916 = vmatpush3.msra.mxu1 %v2529_v15 }
 0x1ed   :  { %6863 = vmatmul.mubr.msk.f32.gmra.mxu1 %vm1741_vm1, %v8218_v21  ;;  %6917 = vmatprep.subr.mxu1 %v2528_v18  ;;  %v2894_v21 = vld [vmem:[%s10047_s9 + $0x18] sm:$0xff] }
 0x1ee   :  { %6865 = vmatprep.mubr.msk.f32.mxu1 %vm1741_vm1, %v8233_v31  ;;  %6918 = vmatpush3.msra.mxu1 %v2528_v18 }
 0x1ef   :  { %7037 = vmatprep.subr.mxu0 %v2894_v21  ;;  %6919 = vmatprep.subr.mxu1 %v2527_v25 }
 0x1f0   :  { %7038 = vmatpush3.msra.mxu0 %v2894_v21  ;;  %6920 = vmatpush3.msra.mxu1 %v2527_v25  ;;  %v2896_v25 = vld [vmem:[%s10047_s9 + $0x28] sm:$0xff] }
 0x1f1   :  { %6866 = vmatmul.mubr.msk.f32.gmra.mxu1 %vm1741_vm1, %v8228_v28  ;;  %v2893_v28 = vld [vmem:[%s10047_s9 + $0x10] sm:$0xff] }
 0x1f2   :  { %6868 = vmatprep.mubr.msk.f32.mxu1 %vm1741_vm1, %v8243_v37  ;;  %7039 = vmatprep.subr.mxu0 %v2893_v28 }
 0x1f3   :  { %7040 = vmatpush3.msra.mxu0 %v2893_v28 }
 0x1f5   :  { %6869 = vmatmul.mubr.msk.f32.gmra.mxu1 %vm1741_vm1, %v8238_v34 }
 0x1f6   :  { %6871 = vmatprep.mubr.msk.f32.mxu1 %vm1741_vm1, %v8253_v43 }
 0x1f9   :  { %6872 = vmatmul.mubr.msk.f32.gmra.mxu1 %vm1741_vm1, %v8248_v40 }
 0x1fa   :  { %6874 = vmatprep.mubr.msk.f32.mxu1 %vm1741_vm1, %v8263_v49 }
 0x1fd   :  { %6875 = vmatmul.mubr.msk.f32.gmra.mxu1 %vm1741_vm1, %v8258_v46 }
 0x1fe   :  { %6877 = vmatprep.mubr.msk.f32.mxu1 %vm1741_vm1, %v8272_v53 }
 0x201   :  { %6878 = vmatmul.mubr.msk.f32.gmra.mxu1 %vm1741_vm1, %v8268_v52 }
 0x202   :  { %6880 = vmatprep.mubr.msk.f32.mxu1 %vm1741_vm1, %v8278_v56 }
 0x205   :  { %6881 = vmatmul.mubr.msk.f32.gmra.mxu1 %vm1741_vm1, %v8275_v55  ;;  %v2898_v55 = vld [vmem:[%s10047_s9 + $0x38] sm:$0xff] }
 0x206   :  { %6883 = vmatprep.mubr.msk.f32.mxu1 %vm1741_vm1, %v8282_v58  ;;  %6975 = vmatprep.subr.mxu1 %v2898_v55 }
 0x209   :  { %6884 = vmatmul.mubr.msk.f32.gmra.mxu1 %vm1741_vm1, %v8280_v57 }
 0x20a   :  { %6886 = vmatprep.mubr.msk.f32.mxu1 %vm1741_vm1, %v8286_v59 }
 0x20d   :  { %6887 = vmatmul.mubr.msk.f32.gmra.mxu1 %vm1741_vm1, %v8284_v7 }
 0x20e   :  { %6889 = vmatprep.mubr.msk.f32.mxu1 %vm1741_vm1, %v8290_v61 }
 0x211   :  { %6890 = vmatmul.mubr.msk.f32.gmra.mxu1 %vm1741_vm1, %v8288_v60 }
 0x212   :  { %6892 = vmatprep.mubr.msk.f32.mxu1 %vm1741_vm1, %v8294_v63 }
 0x215   :  { %6893 = vmatmul.mubr.msk.f32.gmra.mxu1 %vm1741_vm1, %v8292_v62 }
 0x216   :  { %6895 = vmatprep.mubr.msk.f32.mxu1 %vm1741_vm1, %v8298_v1 }
 0x219   :  { %6896 = vmatmul.mubr.msk.f32.gmra.mxu1 %vm1741_vm1, %v8296_v0 }
 0x21a   :  { %6898 = vmatprep.mubr.msk.f32.mxu1 %vm1741_vm1, %v8302_v3 }
 0x21d   :  { %6899 = vmatmul.mubr.msk.f32.gmra.mxu1 %vm1741_vm1, %v8300_v2  ;;  %v2892_v2 = vld [vmem:[%s10047_s9 + $0x8] sm:$0xff] }
 0x21e   :  { %6901 = vmatprep.mubr.msk.f32.mxu1 %vm1741_vm1, %v8306_v5  ;;  %7041 = vmatprep.subr.mxu0 %v2892_v2 }
 0x21f   :  { %7042 = vmatpush3.msra.mxu0 %v2892_v2 }
 0x221   :  { %6902 = vmatmul.mubr.msk.f32.gmra.mxu1 %vm1741_vm1, %v8304_v4 }
 0x222   :  { %6904 = vmatprep.mubr.msk.f32.mxu1 %vm1741_vm1, %v8310_v8 }
 0x225   :  { %6905 = vmatmul.mubr.msk.f32.gmra.mxu1 %vm1741_vm1, %v8308_v6 }
 0x226   :  { %6907 = vmatprep.mubr.msk.f32.mxu1 %vm1741_vm1, %v8314_v10 }
 0x229   :  { %6908 = vmatmul.mubr.msk.f32.gmra.mxu1 %vm1741_vm1, %v8312_v9 }
 0x22a   :  { %6910 = vmatprep.mubr.msk.f32.mxu1 %vm1741_vm1, %v8318_v13 }
 0x22d   :  { %6911 = vmatmul.mubr.msk.f32.gmra.mxu1 %vm1741_vm1, %v8316_v11 }
 0x261   :  { %v6799_v31 = vpop.f32.mrf.mxu1 }
 0x263   :  { %v1916_v34 = vpop.f32.mrf.mxu1 }
 0x265   :  { %v6802_v37 = vpop.f32.mrf.mxu1 }
 0x267   :  { %v1926_v40 = vpop.f32.mrf.mxu1 }
 0x269   :  { %v6805_v43 = vpop.f32.mrf.mxu1 }
 0x26b   :  { %v1936_v46 = vpop.f32.mrf.mxu1 }
 0x26d   :  { %v8456_v49 = vpop.f32.mrf.mxu1 }
 0x26f   :  { %v8458_v52 = vpop.f32.mrf.mxu1 }
 0x271   :  { %v8460_v53 = vpop.f32.mrf.mxu1 }
 0x273   :  { %v8465_v56 = vpop.f32.mrf.mxu1 }
 0x275   :  { %v8467_v57 = vpop.f32.mrf.mxu1 }
 0x277   :  { %v8469_v58 = vpop.f32.mrf.mxu1 }
 0x279   :  { %v8471_v7 = vpop.f32.mrf.mxu1 }
 0x27b   :  { %v8473_v59 = vpop.f32.mrf.mxu1 }
 0x27d   :  { %v8475_v60 = vpop.f32.mrf.mxu1 }
 0x27f   :  { %v8477_v61 = vpop.f32.mrf.mxu1 }
 0x281   :  { %v8479_v62 = vpop.f32.mrf.mxu1 }
 0x283   :  { %v8481_v63 = vpop.f32.mrf.mxu1 }
 0x285   :  { %v8483_v0 = vpop.f32.mrf.mxu1 }
 0x287   :  { %v8485_v1 = vpop.f32.mrf.mxu1 }
 0x289   :  { %v8490_v3 = vpop.f32.mrf.mxu1 }
 0x28b   :  { %v8492_v4 = vpop.f32.mrf.mxu1 }
 0x28d   :  { %v8494_v5 = vpop.f32.mrf.mxu1 }
 0x28f   :  { %v8496_v6 = vpop.f32.mrf.mxu1 }
 0x291   :  { %v8498_v8 = vpop.f32.mrf.mxu1 }
 0x293   :  { %v8500_v9 = vpop.f32.mrf.mxu1 }
 0x295   :  { %v8502_v10 = vpop.f32.mrf.mxu1 }
 0x297   :  { %v8504_v11 = vpop.f32.mrf.mxu1 }
 0x299   :  { %v8506_v13 = vpop.f32.mrf.mxu1 }
 0x29b   :  { %v8508_v33 = vpop.f32.mrf.mxu1 }
 0x29d   :  { %v8510_v35 = vpop.f32.mrf.mxu1 }
 0x29f   :  { %v8512_v36 = vpop.f32.mrf.mxu1 }
 0x2a1   :  { %v8514_v38 = vpop.f32.mrf.mxu1 }
 0x2a3   :  { %v8516_v39 = vpop.f32.mrf.mxu1 }
 0x2a5   :  { %v8518_v41 = vpop.f32.mrf.mxu1 }
 0x2a7   :  { %v8520_v42 = vpop.f32.mrf.mxu1 }
 0x2a9   :  { %v6861_v44 = vpop.f32.mrf.mxu1 }
 0x2aa   :  { %v2275_v45 = vadd.f32 %v6861_v44, %v6799_v31 }
 0x2ab   :  { %v2269_v48 = vpop.f32.mrf.mxu1 }
 0x2ac   :  { %v2270_v50 = vadd.f32 %v2269_v48, %v1916_v34  ;;  %v2456_v51 = vadd.f32 %v8525_v47, %v2275_v45 }
 0x2ad   :  { %v6864_v54 = vpop.f32.mrf.mxu1 }
 0x2ae   :  { %v2455_v14 = vadd.f32 %v8525_v47, %v2270_v50  ;;  %v2285_v16 = vadd.f32 %v6864_v54, %v6802_v37  ;;  %v2492_v23 = vmax.f32 %v2456_v51, 0.0 }
 0x2af   :  { %v2279_v19 = vpop.f32.mrf.mxu1 }
 0x2b0   :  { %v2491_v20 = vmax.f32 %v2455_v14, 0.0  ;;  %v2280_v22 = vadd.f32 %v2279_v19, %v1926_v40  ;;  %v2458_v26 = vadd.f32 %v8525_v47, %v2285_v16 }
 0x2b1   :  { %v6867_v27 = vpop.f32.mrf.mxu1 }
 0x2b2   :  { %v2457_v24 = vadd.f32 %v8525_v47, %v2280_v22  ;;  %v2295_v29 = vadd.f32 %v6867_v27, %v6805_v43  ;;  %6921 = vmatprep.mubr.msk.f32.mxu1 %vm1741_vm1, %v2491_v20  ;;  %v2494_v28 = vmax.f32 %v2458_v26, 0.0  ;;  %v2895_v43 = vld [vmem:[%s10047_s9 + $0x20] sm:$0xff] }
 0x2b3   :  { %v2289_v15 = vpop.f32.mrf.mxu1  ;;  %6922 = vmatmul.mubr.msk.f32.vlgmr.msra.gmra.mxu1 %vm1741_vm1, %v2492_v23 }
 0x2b4   :  { %v2493_v18 = vmax.f32 %v2457_v24, 0.0  ;;  %v2290_v21 = vadd.f32 %v2289_v15, %v1936_v46  ;;  %6976 = vmatpush3.msra.mxu1 %v2898_v55  ;;  %v2460_v31 = vadd.f32 %v8525_v47, %v2295_v29  ;;  %v8550_v46 = vpop.f32.mrf.mxu0  ;;  %v2891_v24 = vld [vmem:[%s10047_s9] sm:$0xff] }
 0x2b5   :  { %v6870_v34 = vpop.f32.mrf.mxu1  ;;  %6977 = vmatprep.subr.mxu1 %v2897_v30  ;;  %7043 = vmatprep.subr.mxu0 %v2891_v24 }
 0x2b6   :  { %v2459_v37 = vadd.f32 %v8525_v47, %v2290_v21  ;;  %v2305_v40 = vadd.f32 %v6870_v34, %v8456_v49  ;;  %6924 = vmatprep.mubr.msk.f32.mxu1 %vm1741_vm1, %v2493_v18  ;;  %6978 = vmatpush3.msra.mxu1 %v2897_v30  ;;  %v2496_v45 = vmax.f32 %v2460_v31, 0.0  ;;  %v8558_v54 = vpop.f32.mrf.mxu0 }
 0x2b7   :  { %v2299_v55 = vpop.f32.mrf.mxu1  ;;  %6925 = vmatmul.mubr.msk.f32.gmra.mxu1 %vm1741_vm1, %v2494_v28  ;;  %6979 = vmatprep.subr.mxu1 %v2896_v25 }
 0x2b8   :  { %v2495_v2 = vmax.f32 %v2459_v37, 0.0  ;;  %v2300_v44 = vadd.f32 %v2299_v55, %v8458_v52  ;;  %6980 = vmatpush3.msra.mxu1 %v2896_v25  ;;  %v2462_v49 = vadd.f32 %v8525_v47, %v2305_v40  ;;  %v8567_v26 = vpop.f32.mrf.mxu0  ;;  %7044 = vmatpush3.msra.mxu0 %v2891_v24 }
 0x2b9   :  { %v6873_v48 = vpop.f32.mrf.mxu1  ;;  %6981 = vmatprep.subr.mxu1 %v2895_v43 }
 0x2ba   :  { %v2461_v50 = vadd.f32 %v8525_v47, %v2300_v44  ;;  %v2315_v51 = vadd.f32 %v6873_v48, %v8460_v53  ;;  %6927 = vmatprep.mubr.msk.f32.mxu1 %vm1741_vm1, %v2495_v2  ;;  %6982 = vmatpush3.msra.mxu1 %v2895_v43  ;;  %v2498_v19 = vmax.f32 %v2462_v49, 0.0  ;;  %v8578_v25 = vpop.f32.mrf.mxu0 }
 0x2bb   :  { %v2309_v14 = vpop.f32.mrf.mxu1  ;;  %6928 = vmatmul.mubr.msk.f32.gmra.mxu1 %vm1741_vm1, %v2496_v45  ;;  %7099 = vmatprep.subr.mxu1 %v9994_v12 }
 0x2bc   :  { %v2497_v52 = vmax.f32 %v2461_v50, 0.0  ;;  %v2310_v16 = vadd.f32 %v2309_v14, %v8465_v56  ;;  %v2464_v20 = vadd.f32 %v8525_v47, %v2315_v51 }
 0x2bd   :  { %v6876_v22 = vpop.f32.mrf.mxu1 }
 0x2be   :  { %v2463_v23 = vadd.f32 %v8525_v47, %v2310_v16  ;;  %v2325_v53 = vadd.f32 %v6876_v22, %v8467_v57  ;;  %6930 = vmatprep.mubr.msk.f32.mxu1 %vm1741_vm1, %v2497_v52  ;;  %v2500_v30 = vmax.f32 %v2464_v20, 0.0 }
 0x2bf   :  { %v2319_v27 = vpop.f32.mrf.mxu1  ;;  %6931 = vmatmul.mubr.msk.f32.gmra.mxu1 %vm1741_vm1, %v2498_v19 }
 0x2c0   :  { %v2499_v56 = vmax.f32 %v2463_v23, 0.0  ;;  %v2320_v29 = vadd.f32 %v2319_v27, %v8469_v58  ;;  %v2466_v15 = vadd.f32 %v8525_v47, %v2325_v53 }
 0x2c1   :  { %v6879_v18 = vpop.f32.mrf.mxu1 }
 0x2c2   :  { %v2465_v57 = vadd.f32 %v8525_v47, %v2320_v29  ;;  %v2335_v21 = vadd.f32 %v6879_v18, %v8471_v7  ;;  %6933 = vmatprep.mubr.msk.f32.mxu1 %vm1741_vm1, %v2499_v56  ;;  %v2502_v34 = vmax.f32 %v2466_v15, 0.0  ;;  %v8586_v7 = vpop.f32.mrf.mxu0 }
 0x2c3   :  { %v2329_v28 = vpop.f32.mrf.mxu1  ;;  %6934 = vmatmul.mubr.msk.f32.gmra.mxu1 %vm1741_vm1, %v2500_v30 }
 0x2c4   :  { %v2501_v31 = vmax.f32 %v2465_v57, 0.0  ;;  %v2330_v58 = vadd.f32 %v2329_v28, %v8473_v59  ;;  %v2468_v37 = vadd.f32 %v8525_v47, %v2335_v21 }
 0x2c5   :  { %v6882_v40 = vpop.f32.mrf.mxu1 }
 0x2c6   :  { %v2467_v43 = vadd.f32 %v8525_v47, %v2330_v58  ;;  %v2345_v55 = vadd.f32 %v6882_v40, %v8475_v60  ;;  %6936 = vmatprep.mubr.msk.f32.mxu1 %vm1741_vm1, %v2501_v31  ;;  %v2504_v49 = vmax.f32 %v2468_v37, 0.0  ;;  %v8594_v60 = vpop.f32.mrf.mxu0 }
 0x2c7   :  { %v2339_v2 = vpop.f32.mrf.mxu1  ;;  %6937 = vmatmul.mubr.msk.f32.gmra.mxu1 %vm1741_vm1, %v2502_v34 }
 0x2c8   :  { %v2503_v44 = vmax.f32 %v2467_v43, 0.0  ;;  %v2340_v45 = vadd.f32 %v2339_v2, %v8477_v61  ;;  %v2470_v59 = vadd.f32 %v8525_v47, %v2345_v55 }
 0x2c9   :  { %v6885_v48 = vpop.f32.mrf.mxu1 }
 0x2ca   :  { %v2469_v50 = vadd.f32 %v8525_v47, %v2340_v45  ;;  %v2355_v51 = vadd.f32 %v6885_v48, %v8479_v62  ;;  %6939 = vmatprep.mubr.msk.f32.mxu1 %vm1741_vm1, %v2503_v44  ;;  %v2506_v19 = vmax.f32 %v2470_v59, 0.0  ;;  %v8602_v62 = vpop.f32.mrf.mxu0 }
 0x2cb   :  { %v2349_v14 = vpop.f32.mrf.mxu1  ;;  %6940 = vmatmul.mubr.msk.f32.gmra.mxu1 %vm1741_vm1, %v2504_v49 }
 0x2cc   :  { %v2505_v52 = vmax.f32 %v2469_v50, 0.0  ;;  %v2350_v16 = vadd.f32 %v2349_v14, %v8481_v63  ;;  %v2472_v61 = vadd.f32 %v8525_v47, %v2355_v51 }
 0x2cd   :  { %v6888_v20 = vpop.f32.mrf.mxu1 }
 0x2ce   :  { %v2471_v22 = vadd.f32 %v8525_v47, %v2350_v16  ;;  %v2365_v23 = vadd.f32 %v6888_v20, %v8483_v0  ;;  %6942 = vmatprep.mubr.msk.f32.mxu1 %vm1741_vm1, %v2505_v52  ;;  %v2508_v56 = vmax.f32 %v2472_v61, 0.0  ;;  %v8610_v0 = vpop.f32.mrf.mxu0 }
 0x2cf   :  { %v2359_v53 = vpop.f32.mrf.mxu1  ;;  %6943 = vmatmul.mubr.msk.f32.gmra.mxu1 %vm1741_vm1, %v2506_v19 }
 0x2d0   :  { %v2507_v27 = vmax.f32 %v2471_v22, 0.0  ;;  %v2360_v24 = vadd.f32 %v2359_v53, %v8485_v1  ;;  %v2474_v63 = vadd.f32 %v8525_v47, %v2365_v23 }
 0x2d1   :  { %v6891_v29 = vpop.f32.mrf.mxu1 }
 0x2d2   :  { %v2473_v30 = vadd.f32 %v8525_v47, %v2360_v24  ;;  %v2375_v15 = vadd.f32 %v6891_v29, %v8490_v3  ;;  %6945 = vmatprep.mubr.msk.f32.mxu1 %vm1741_vm1, %v2507_v27  ;;  %v2510_v28 = vmax.f32 %v2474_v63, 0.0  ;;  %v8618_v3 = vpop.f32.mrf.mxu0 }
 0x2d3   :  { %v2369_v18 = vpop.f32.mrf.mxu1  ;;  %6946 = vmatmul.mubr.msk.f32.gmra.mxu1 %vm1741_vm1, %v2508_v56 }
 0x2d4   :  { %v2509_v57 = vmax.f32 %v2473_v30, 0.0  ;;  %v2370_v21 = vadd.f32 %v2369_v18, %v8492_v4  ;;  %v2476_v1 = vadd.f32 %v8525_v47, %v2375_v15 }
 0x2d5   :  { %v6894_v31 = vpop.f32.mrf.mxu1 }
 0x2d6   :  { %v2475_v58 = vadd.f32 %v8525_v47, %v2370_v21  ;;  %v2385_v34 = vadd.f32 %v6894_v31, %v8494_v5  ;;  %6948 = vmatprep.mubr.msk.f32.mxu1 %vm1741_vm1, %v2509_v57  ;;  %v2512_v55 = vmax.f32 %v2476_v1, 0.0  ;;  %v8626_v5 = vpop.f32.mrf.mxu0 }
 0x2d7   :  { %v2379_v37 = vpop.f32.mrf.mxu1  ;;  %6949 = vmatmul.mubr.msk.f32.gmra.mxu1 %vm1741_vm1, %v2510_v28 }
 0x2d8   :  { %v2511_v40 = vmax.f32 %v2475_v58, 0.0  ;;  %v2380_v43 = vadd.f32 %v2379_v37, %v8496_v6  ;;  %v2478_v4 = vadd.f32 %v8525_v47, %v2385_v34 }
 0x2d9   :  { %v6897_v2 = vpop.f32.mrf.mxu1 }
 0x2da   :  { %v2477_v44 = vadd.f32 %v8525_v47, %v2380_v43  ;;  %v2395_v45 = vadd.f32 %v6897_v2, %v8498_v8  ;;  %6951 = vmatprep.mubr.msk.f32.mxu1 %vm1741_vm1, %v2511_v40  ;;  %v2514_v50 = vmax.f32 %v2478_v4, 0.0  ;;  %v8634_v8 = vpop.f32.mrf.mxu0 }
 0x2db   :  { %v2389_v49 = vpop.f32.mrf.mxu1  ;;  %6952 = vmatmul.mubr.msk.f32.gmra.mxu1 %vm1741_vm1, %v2512_v55 }
 0x2dc   :  { %v2513_v59 = vmax.f32 %v2477_v44, 0.0  ;;  %v2390_v48 = vadd.f32 %v2389_v49, %v8500_v9  ;;  %v2480_v6 = vadd.f32 %v8525_v47, %v2395_v45 }
 0x2dd   :  { %v6900_v51 = vpop.f32.mrf.mxu1 }
 0x2de   :  { %v2479_v14 = vadd.f32 %v8525_v47, %v2390_v48  ;;  %v2405_v52 = vadd.f32 %v6900_v51, %v8502_v10  ;;  %6954 = vmatprep.mubr.msk.f32.mxu1 %vm1741_vm1, %v2513_v59  ;;  %v2516_v20 = vmax.f32 %v2480_v6, 0.0  ;;  %v8642_v10 = vpop.f32.mrf.mxu0 }
 0x2df   :  { %v2399_v16 = vpop.f32.mrf.mxu1  ;;  %6955 = vmatmul.mubr.msk.f32.gmra.mxu1 %vm1741_vm1, %v2514_v50 }
 0x2e0   :  { %v2515_v19 = vmax.f32 %v2479_v14, 0.0  ;;  %v2400_v61 = vadd.f32 %v2399_v16, %v8504_v11  ;;  %v2482_v9 = vadd.f32 %v8525_v47, %v2405_v52 }
 0x2e1   :  { %v6903_v22 = vpop.f32.mrf.mxu1 }
 0x2e2   :  { %v2481_v23 = vadd.f32 %v8525_v47, %v2400_v61  ;;  %v2415_v53 = vadd.f32 %v6903_v22, %v8506_v13  ;;  %6957 = vmatprep.mubr.msk.f32.mxu1 %vm1741_vm1, %v2515_v19  ;;  %v2518_v63 = vmax.f32 %v2482_v9, 0.0  ;;  %v6752_v13 = vpop.f32.mrf.mxu0  ;;  %v8726_v61 = vld [vmem:[%s10049_s1] ss:$0 sm:$0xff] }
 0x2e3   :  { %v2409_v27 = vpop.f32.mrf.mxu1  ;;  %6958 = vmatmul.mubr.msk.f32.gmra.mxu1 %vm1741_vm1, %v2516_v20 }
 0x2e4   :  { %v2517_v24 = vmax.f32 %v2481_v23, 0.0  ;;  %v2410_v56 = vadd.f32 %v2409_v27, %v8508_v33  ;;  %v2484_v11 = vadd.f32 %v8525_v47, %v2415_v53  ;;  %v5119_v53 = vld [vmem:[%s9972_s14 + $0x30] sm:$0xff] }
 0x2e5   :  { %v6906_v29 = vpop.f32.mrf.mxu1 }
 0x2e6   :  { %v2483_v30 = vadd.f32 %v8525_v47, %v2410_v56  ;;  %v2425_v15 = vadd.f32 %v6906_v29, %v8510_v35  ;;  %6960 = vmatprep.mubr.msk.f32.mxu1 %vm1741_vm1, %v2517_v24  ;;  %v2520_v28 = vmax.f32 %v2484_v11, 0.0  ;;  %v1604_v35 = vpop.f32.mrf.mxu0  ;;  %v5118_v24 = vld [vmem:[%s9972_s14 + $0x28] sm:$0xff]  ;;  %v5117_v11 = vld [vmem:[%s9972_s14 + $0x20] sm:$0xff] }
 0x2e7   :  { %v2419_v18 = vpop.f32.mrf.mxu1  ;;  %6961 = vmatmul.mubr.msk.f32.gmra.mxu1 %vm1741_vm1, %v2518_v63 }
 0x2e8   :  { %v2519_v57 = vmax.f32 %v2483_v30, 0.0  ;;  %v2420_v21 = vadd.f32 %v2419_v18, %v8512_v36  ;;  %v2486_v33 = vadd.f32 %v8525_v47, %v2425_v15 }
 0x2e9   :  { %v6909_v1 = vpop.f32.mrf.mxu1 }
 0x2ea   :  { %v2485_v31 = vadd.f32 %v8525_v47, %v2420_v21  ;;  %v2435_v58 = vadd.f32 %v6909_v1, %v8514_v38  ;;  %6963 = vmatprep.mubr.msk.f32.mxu1 %vm1741_vm1, %v2519_v57  ;;  %v2522_v43 = vmax.f32 %v2486_v33, 0.0  ;;  %v6755_v38 = vpop.f32.mrf.mxu0 }
 0x2eb   :  { %v2429_v34 = vpop.f32.mrf.mxu1  ;;  %6964 = vmatmul.mubr.msk.f32.gmra.mxu1 %vm1741_vm1, %v2520_v28 }
 0x2ec   :  { %v2521_v37 = vmax.f32 %v2485_v31, 0.0  ;;  %v2430_v40 = vadd.f32 %v2429_v34, %v8516_v39  ;;  %v2488_v36 = vadd.f32 %v8525_v47, %v2435_v58  ;;  %v1614_v50 = vpop.f32.mrf.mxu0 }
 0x2ed   :  { %v6912_v55 = vpop.f32.mrf.mxu1 }
 0x2ee   :  { %v2487_v4 = vadd.f32 %v8525_v47, %v2430_v40  ;;  %v2445_v2 = vadd.f32 %v6912_v55, %v8518_v41  ;;  %6966 = vmatprep.mubr.msk.f32.mxu1 %vm1741_vm1, %v2521_v37  ;;  %v2524_v59 = vmax.f32 %v2488_v36, 0.0  ;;  %v6758_v51 = vpop.f32.mrf.mxu0 }
 0x2ef   :  { %v2439_v44 = vpop.f32.mrf.mxu1  ;;  %6967 = vmatmul.mubr.msk.f32.gmra.mxu1 %vm1741_vm1, %v2522_v43 }
 0x2f0   :  { %v2523_v45 = vmax.f32 %v2487_v4, 0.0  ;;  %v2440_v49 = vadd.f32 %v2439_v44, %v8520_v42  ;;  %v2490_v39 = vadd.f32 %v8525_v47, %v2445_v2  ;;  %v1624_v42 = vpop.f32.mrf.mxu0 }
 0x2f2   :  { %v2489_v48 = vadd.f32 %v8525_v47, %v2440_v49  ;;  %6969 = vmatprep.mubr.msk.f32.mxu1 %vm1741_vm1, %v2523_v45  ;;  %v2526_v6 = vmax.f32 %v2490_v39, 0.0  ;;  %v6761_v47 = vpop.f32.mrf.mxu0 }
 0x2f3   :  { %6970 = vmatmul.mubr.msk.f32.gmra.mxu1 %vm1741_vm1, %v2524_v59 }
 0x2f4   :  { %v2525_v41 = vmax.f32 %v2489_v48, 0.0  ;;  %v1634_v14 = vpop.f32.mrf.mxu0 }
 0x2f6   :  { %6972 = vmatprep.mubr.msk.f32.mxu1 %vm1741_vm1, %v2525_v41 }
 0x2f7   :  { %6973 = vmatmul.mubr.msk.f32.gmra.mxu1 %vm1741_vm1, %v2526_v6 }
 0x2f8   :  { %6983 = vmatprep.mubr.msk.f32.mxu1 %vm1741_vm1, %v8537_v32  ;;  %v6764_v32 = vpop.f32.mrf.mxu0 }
 0x2fb   :  { %6984 = vmatmul.mubr.msk.f32.vlgmr.msra.gmra.mxu1 %vm1741_vm1, %v8529_v17  ;;  %v1644_v17 = vpop.f32.mrf.mxu0 }
 0x2fc   :  { %6986 = vmatprep.mubr.msk.f32.mxu1 %vm1741_vm1, %v8558_v54 }
 0x2ff   :  { %6987 = vmatmul.mubr.msk.f32.gmra.mxu1 %vm1741_vm1, %v8550_v46  ;;  %v6767_v46 = vpop.f32.mrf.mxu0 }
 0x300   :  { %6989 = vmatprep.mubr.msk.f32.mxu1 %vm1741_vm1, %v8578_v25 }
 0x301   :  { %v1654_v54 = vpop.f32.mrf.mxu0 }
 0x303   :  { %6990 = vmatmul.mubr.msk.f32.gmra.mxu1 %vm1741_vm1, %v8567_v26  ;;  %v6770_v26 = vpop.f32.mrf.mxu0 }
 0x304   :  { %6992 = vmatprep.mubr.msk.f32.mxu1 %vm1741_vm1, %v8594_v60 }
 0x305   :  { %v1664_v25 = vpop.f32.mrf.mxu0 }
 0x307   :  { %6993 = vmatmul.mubr.msk.f32.gmra.mxu1 %vm1741_vm1, %v8586_v7  ;;  %v6773_v7 = vpop.f32.mrf.mxu0 }
 0x308   :  { %6995 = vmatprep.mubr.msk.f32.mxu1 %vm1741_vm1, %v8610_v0 }
 0x309   :  { %v1674_v60 = vpop.f32.mrf.mxu0 }
 0x30b   :  { %6996 = vmatmul.mubr.msk.f32.gmra.mxu1 %vm1741_vm1, %v8602_v62  ;;  %v6776_v62 = vpop.f32.mrf.mxu0 }
 0x30c   :  { %6998 = vmatprep.mubr.msk.f32.mxu1 %vm1741_vm1, %v8626_v5 }
 0x30d   :  { %v1684_v0 = vpop.f32.mrf.mxu0 }
 0x30f   :  { %6999 = vmatmul.mubr.msk.f32.gmra.mxu1 %vm1741_vm1, %v8618_v3  ;;  %v6779_v3 = vpop.f32.mrf.mxu0 }
 0x310   :  { %7001 = vmatprep.mubr.msk.f32.mxu1 %vm1741_vm1, %v8642_v10 }
 0x311   :  { %v1694_v5 = vpop.f32.mrf.mxu0 }
 0x313   :  { %7002 = vmatmul.mubr.msk.f32.gmra.mxu1 %vm1741_vm1, %v8634_v8  ;;  %v6782_v52 = vpop.f32.mrf.mxu0  ;;  %v5120_v8 = vld [vmem:[%s9972_s14 + $0x38] sm:$0xff] }
 0x314   :  { %7004 = vmatprep.mubr.msk.f32.mxu1 %vm1741_vm1, %v1604_v35  ;;  %7122 = vmatprep.subr.mxu0 %v5120_v8 }
 0x315   :  { %v1704_v16 = vpop.f32.mrf.mxu0 }
 0x317   :  { %7005 = vmatmul.mubr.msk.f32.gmra.mxu1 %vm1741_vm1, %v6752_v13 }
 0x318   :  { %7007 = vmatprep.mubr.msk.f32.mxu1 %vm1741_vm1, %v1614_v50 }
 0x31b   :  { %7008 = vmatmul.mubr.msk.f32.gmra.mxu1 %vm1741_vm1, %v6755_v38 }
 0x31c   :  { %7010 = vmatprep.mubr.msk.f32.mxu1 %vm1741_vm1, %v1624_v42 }
 0x31f   :  { %7011 = vmatmul.mubr.msk.f32.gmra.mxu1 %vm1741_vm1, %v6758_v51 }
 0x320   :  { %7013 = vmatprep.mubr.msk.f32.mxu1 %vm1741_vm1, %v1634_v14 }
 0x323   :  { %7014 = vmatmul.mubr.msk.f32.gmra.mxu1 %vm1741_vm1, %v6761_v47 }
 0x324   :  { %7016 = vmatprep.mubr.msk.f32.mxu1 %vm1741_vm1, %v1644_v17 }
 0x327   :  { %7017 = vmatmul.mubr.msk.f32.gmra.mxu1 %vm1741_vm1, %v6764_v32 }
 0x328   :  { %7019 = vmatprep.mubr.msk.f32.mxu1 %vm1741_vm1, %v1654_v54 }
 0x32b   :  { %7020 = vmatmul.mubr.msk.f32.gmra.mxu1 %vm1741_vm1, %v6767_v46 }
 0x32c   :  { %7022 = vmatprep.mubr.msk.f32.mxu1 %vm1741_vm1, %v1664_v25 }
 0x32f   :  { %7023 = vmatmul.mubr.msk.f32.gmra.mxu1 %vm1741_vm1, %v6770_v26 }
 0x330   :  { %7025 = vmatprep.mubr.msk.f32.mxu1 %vm1741_vm1, %v1674_v60 }
 0x333   :  { %7026 = vmatmul.mubr.msk.f32.gmra.mxu1 %vm1741_vm1, %v6773_v7 }
 0x334   :  { %7028 = vmatprep.mubr.msk.f32.mxu1 %vm1741_vm1, %v1684_v0 }
 0x337   :  { %7029 = vmatmul.mubr.msk.f32.gmra.mxu1 %vm1741_vm1, %v6776_v62 }
 0x338   :  { %7031 = vmatprep.mubr.msk.f32.mxu1 %vm1741_vm1, %v1694_v5 }
 0x33b   :  { %7032 = vmatmul.mubr.msk.f32.gmra.mxu1 %vm1741_vm1, %v6779_v3 }
 0x33c   :  { %7034 = vmatprep.mubr.msk.f32.mxu1 %vm1741_vm1, %v1704_v16 }
 0x33f   :  { %7035 = vmatmul.mubr.msk.f32.gmra.mxu1 %vm1741_vm1, %v6782_v52 }
 0x373   :  { %v6923_v19 = vpop.f32.mrf.mxu1 }
 0x374   :  { %v8732_v22 = vadd.f32 %v6923_v19, %v8726_v61 }
 0x375   :  { %v2712_v20 = vpop.f32.mrf.mxu1 }
 0x376   :  { %v8729_v9 = vadd.f32 %v8726_v61, %v2712_v20  ;;  %10051 = vst [vmem:[#allocation8_spill] sm:$0xff] %v8732_v22 }
 0x377   :  { %v6926_v23 = vpop.f32.mrf.mxu1 }
 0x378   :  { %10050 = vst [vmem:[#allocation7_spill] sm:$0xff] %v8729_v9  ;;  %7045 = vmatprep.mubr.msk.f32.mxu0 %vm1741_vm1, %v8729_v9  ;;  %v8748_v56 = vadd.f32 %v6926_v23, %v8726_v61 }
 0x379   :  { %v2722_v10 = vpop.f32.mrf.mxu1  ;;  %7046 = vmatmul.mubr.msk.f32.vlgmr.msra.gmra.mxu0 %vm1741_vm1, %v8732_v22 }
 0x37a   :  { %v8742_v27 = vadd.f32 %v8726_v61, %v2722_v10  ;;  %7123 = vmatpush3.msra.mxu0 %v5120_v8  ;;  %10053 = vst [vmem:[#allocation10_spill] sm:$0xff] %v8748_v56 }
 0x37b   :  { %v6929_v63 = vpop.f32.mrf.mxu1  ;;  %7124 = vmatprep.subr.mxu0 %v5119_v53 }
 0x37c   :  { %10052 = vst [vmem:[#allocation9_spill] sm:$0xff] %v8742_v27  ;;  %7048 = vmatprep.mubr.msk.f32.mxu0 %vm1741_vm1, %v8742_v27  ;;  %7125 = vmatpush3.msra.mxu0 %v5119_v53  ;;  %v8761_v15 = vadd.f32 %v6929_v63, %v8726_v61  ;;  %v6785_v63 = vpop.f32.mrf.mxu0 }
 0x37d   :  { %v2732_v29 = vpop.f32.mrf.mxu1  ;;  %7049 = vmatmul.mubr.msk.f32.gmra.mxu0 %vm1741_vm1, %v8748_v56  ;;  %7126 = vmatprep.subr.mxu0 %v5118_v24 }
 0x37e   :  { %v8758_v30 = vadd.f32 %v8726_v61, %v2732_v29  ;;  %7127 = vmatpush3.msra.mxu0 %v5118_v24  ;;  %10055 = vst [vmem:[#allocation12_spill] sm:$0xff] %v8761_v15 }
 0x37f   :  { %v6932_v13 = vpop.f32.mrf.mxu1  ;;  %7128 = vmatprep.subr.mxu0 %v5117_v11 }
 0x380   :  { %10054 = vst [vmem:[#allocation11_spill] sm:$0xff] %v8758_v30  ;;  %7051 = vmatprep.mubr.msk.f32.mxu0 %vm1741_vm1, %v8758_v30  ;;  %7129 = vmatpush3.msra.mxu0 %v5117_v11  ;;  %v8771_v21 = vadd.f32 %v6932_v13, %v8726_v61 }
 0x381   :  { %v2742_v18 = vpop.f32.mrf.mxu1  ;;  %7052 = vmatmul.mubr.msk.f32.gmra.mxu0 %vm1741_vm1, %v8761_v15 }
 0x382   :  { %v8768_v57 = vadd.f32 %v8726_v61, %v2742_v18  ;;  %10057 = vst [vmem:[#allocation14_spill] sm:$0xff] %v8771_v21 }
 0x383   :  { %v6935_v28 = vpop.f32.mrf.mxu1 }
 0x384   :  { %10056 = vst [vmem:[#allocation13_spill] sm:$0xff] %v8768_v57  ;;  %7054 = vmatprep.mubr.msk.f32.mxu0 %vm1741_vm1, %v8768_v57  ;;  %v8781_v31 = vadd.f32 %v6935_v28, %v8726_v61  ;;  %v1714_v28 = vpop.f32.mrf.mxu0 }
 0x385   :  { %v2752_v33 = vpop.f32.mrf.mxu1  ;;  %7055 = vmatmul.mubr.msk.f32.gmra.mxu0 %vm1741_vm1, %v8771_v21 }
 0x386   :  { %v8778_v1 = vadd.f32 %v8726_v61, %v2752_v33  ;;  %10059 = vst [vmem:[#allocation16_spill] sm:$0xff] %v8781_v31 }
 0x387   :  { %v6938_v58 = vpop.f32.mrf.mxu1 }
 0x388   :  { %10058 = vst [vmem:[#allocation15_spill] sm:$0xff] %v8778_v1  ;;  %7057 = vmatprep.mubr.msk.f32.mxu0 %vm1741_vm1, %v8778_v1  ;;  %v8791_v37 = vadd.f32 %v6938_v58, %v8726_v61 }
 0x389   :  { %v2762_v35 = vpop.f32.mrf.mxu1  ;;  %7058 = vmatmul.mubr.msk.f32.gmra.mxu0 %vm1741_vm1, %v8781_v31 }
 0x38a   :  { %v8788_v34 = vadd.f32 %v8726_v61, %v2762_v35  ;;  %10061 = vst [vmem:[#allocation18_spill] sm:$0xff] %v8791_v37 }
 0x38b   :  { %v6941_v40 = vpop.f32.mrf.mxu1 }
 0x38c   :  { %10060 = vst [vmem:[#allocation17_spill] sm:$0xff] %v8788_v34  ;;  %7060 = vmatprep.mubr.msk.f32.mxu0 %vm1741_vm1, %v8788_v34  ;;  %v8801_v55 = vadd.f32 %v6941_v40, %v8726_v61  ;;  %v6788_v40 = vpop.f32.mrf.mxu0 }
 0x38d   :  { %v2772_v43 = vpop.f32.mrf.mxu1  ;;  %7061 = vmatmul.mubr.msk.f32.gmra.mxu0 %vm1741_vm1, %v8791_v37 }
 0x38e   :  { %v8798_v36 = vadd.f32 %v8726_v61, %v2772_v43  ;;  %10063 = vst [vmem:[#allocation20_spill] sm:$0xff] %v8801_v55  ;;  %v1724_v43 = vpop.f32.mrf.mxu0 }
 0x38f   :  { %v6944_v4 = vpop.f32.mrf.mxu1 }
 0x390   :  { %10062 = vst [vmem:[#allocation19_spill] sm:$0xff] %v8798_v36  ;;  %7063 = vmatprep.mubr.msk.f32.mxu0 %vm1741_vm1, %v8798_v36  ;;  %v8811_v44 = vadd.f32 %v6944_v4, %v8726_v61 }
 0x391   :  { %v2782_v2 = vpop.f32.mrf.mxu1  ;;  %7064 = vmatmul.mubr.msk.f32.gmra.mxu0 %vm1741_vm1, %v8801_v55 }
 0x392   :  { %v8808_v38 = vadd.f32 %v8726_v61, %v2782_v2  ;;  %10065 = vst [vmem:[#allocation22_spill] sm:$0xff] %v8811_v44 }
 0x393   :  { %v6947_v45 = vpop.f32.mrf.mxu1 }
 0x394   :  { %10064 = vst [vmem:[#allocation21_spill] sm:$0xff] %v8808_v38  ;;  %7066 = vmatprep.mubr.msk.f32.mxu0 %vm1741_vm1, %v8808_v38  ;;  %v8821_v39 = vadd.f32 %v6947_v45, %v8726_v61 }
 0x395   :  { %v2792_v49 = vpop.f32.mrf.mxu1  ;;  %7067 = vmatmul.mubr.msk.f32.gmra.mxu0 %vm1741_vm1, %v8811_v44 }
 0x396   :  { %v8818_v59 = vadd.f32 %v8726_v61, %v2792_v49  ;;  %10067 = vst [vmem:[#allocation24_spill] sm:$0xff] %v8821_v39 }
 0x397   :  { %v6950_v48 = vpop.f32.mrf.mxu1 }
 0x398   :  { %10066 = vst [vmem:[#allocation23_spill] sm:$0xff] %v8818_v59  ;;  %7069 = vmatprep.mubr.msk.f32.mxu0 %vm1741_vm1, %v8818_v59  ;;  %v8831_v6 = vadd.f32 %v6950_v48, %v8726_v61 }
 0x399   :  { %v2802_v50 = vpop.f32.mrf.mxu1  ;;  %7070 = vmatmul.mubr.msk.f32.gmra.mxu0 %vm1741_vm1, %v8821_v39 }
 0x39a   :  { %v8828_v41 = vadd.f32 %v8726_v61, %v2802_v50  ;;  %10069 = vst [vmem:[#allocation26_spill] sm:$0xff] %v8831_v6 }
 0x39b   :  { %v6953_v51 = vpop.f32.mrf.mxu1 }
 0x39c   :  { %10068 = vst [vmem:[#allocation25_spill] sm:$0xff] %v8828_v41  ;;  %7072 = vmatprep.mubr.msk.f32.mxu0 %vm1741_vm1, %v8828_v41  ;;  %v8841_v14 = vadd.f32 %v6953_v51, %v8726_v61 }
 0x39d   :  { %v2812_v42 = vpop.f32.mrf.mxu1  ;;  %7073 = vmatmul.mubr.msk.f32.gmra.mxu0 %vm1741_vm1, %v8831_v6 }
 0x39e   :  { %v8838_v47 = vadd.f32 %v8726_v61, %v2812_v42  ;;  %10071 = vst [vmem:[#allocation28_spill] sm:$0xff] %v8841_v14 }
 0x39f   :  { %v6956_v32 = vpop.f32.mrf.mxu1 }
 0x3a0   :  { %10070 = vst [vmem:[#allocation27_spill] sm:$0xff] %v8838_v47  ;;  %7075 = vmatprep.mubr.msk.f32.mxu0 %vm1741_vm1, %v8838_v47  ;;  %v8851_v54 = vadd.f32 %v6956_v32, %v8726_v61 }
 0x3a1   :  { %v2822_v17 = vpop.f32.mrf.mxu1  ;;  %7076 = vmatmul.mubr.msk.f32.gmra.mxu0 %vm1741_vm1, %v8841_v14 }
 0x3a2   :  { %v8848_v46 = vadd.f32 %v8726_v61, %v2822_v17  ;;  %10073 = vst [vmem:[#allocation30_spill] sm:$0xff] %v8851_v54 }
 0x3a3   :  { %v6959_v26 = vpop.f32.mrf.mxu1 }
 0x3a4   :  { %10072 = vst [vmem:[#allocation29_spill] sm:$0xff] %v8848_v46  ;;  %7078 = vmatprep.mubr.msk.f32.mxu0 %vm1741_vm1, %v8848_v46  ;;  %v8861_v60 = vadd.f32 %v6959_v26, %v8726_v61 }
 0x3a5   :  { %v2832_v25 = vpop.f32.mrf.mxu1  ;;  %7079 = vmatmul.mubr.msk.f32.gmra.mxu0 %vm1741_vm1, %v8851_v54 }
 0x3a6   :  { %v8858_v7 = vadd.f32 %v8726_v61, %v2832_v25  ;;  %10075 = vst [vmem:[#allocation32_spill] sm:$0xff] %v8861_v60 }
 0x3a7   :  { %v6962_v62 = vpop.f32.mrf.mxu1 }
 0x3a8   :  { %10074 = vst [vmem:[#allocation31_spill] sm:$0xff] %v8858_v7  ;;  %7081 = vmatprep.mubr.msk.f32.mxu0 %vm1741_vm1, %v8858_v7  ;;  %v8871_v5 = vadd.f32 %v6962_v62, %v8726_v61 }
 0x3a9   :  { %v2842_v0 = vpop.f32.mrf.mxu1  ;;  %7082 = vmatmul.mubr.msk.f32.gmra.mxu0 %vm1741_vm1, %v8861_v60 }
 0x3aa   :  { %v8868_v3 = vadd.f32 %v8726_v61, %v2842_v0  ;;  %10077 = vst [vmem:[#allocation34_spill] sm:$0xff] %v8871_v5 }
 0x3ab   :  { %v6965_v52 = vpop.f32.mrf.mxu1 }
 0x3ac   :  { %10076 = vst [vmem:[#allocation33_spill] sm:$0xff] %v8868_v3  ;;  %7084 = vmatprep.mubr.msk.f32.mxu0 %vm1741_vm1, %v8868_v3  ;;  %v8881_v19 = vadd.f32 %v6965_v52, %v8726_v61 }
 0x3ad   :  { %v2852_v8 = vpop.f32.mrf.mxu1  ;;  %7085 = vmatmul.mubr.msk.f32.gmra.mxu0 %vm1741_vm1, %v8871_v5 }
 0x3ae   :  { %v8878_v16 = vadd.f32 %v8726_v61, %v2852_v8  ;;  %10079 = vst [vmem:[#allocation36_spill] sm:$0xff] %v8881_v19 }
 0x3af   :  { %v6968_v20 = vpop.f32.mrf.mxu1 }
 0x3b0   :  { %10078 = vst [vmem:[#allocation35_spill] sm:$0xff] %v8878_v16  ;;  %7087 = vmatprep.mubr.msk.f32.mxu0 %vm1741_vm1, %v8878_v16  ;;  %v8891_v10 = vadd.f32 %v6968_v20, %v8726_v61  ;;  %v8936_v20 = vld [vmem:[%s10086_s0] ss:$0 sm:$0xff] }
 0x3b1   :  { %v2862_v23 = vpop.f32.mrf.mxu1  ;;  %7088 = vmatmul.mubr.msk.f32.gmra.mxu0 %vm1741_vm1, %v8881_v19 }
 0x3b2   :  { %v8888_v53 = vadd.f32 %v8726_v61, %v2862_v23  ;;  %10081 = vst [vmem:[#allocation38_spill] sm:$0xff] %v8891_v10 }
 0x3b3   :  { %v6971_v24 = vpop.f32.mrf.mxu1 }
 0x3b4   :  { %10080 = vst [vmem:[#allocation37_spill] sm:$0xff] %v8888_v53  ;;  %7090 = vmatprep.mubr.msk.f32.mxu0 %vm1741_vm1, %v8888_v53  ;;  %v8901_v13 = vadd.f32 %v6971_v24, %v8726_v61 }
 0x3b5   :  { %v2872_v11 = vpop.f32.mrf.mxu1  ;;  %7091 = vmatmul.mubr.msk.f32.gmra.mxu0 %vm1741_vm1, %v8891_v10 }
 0x3b6   :  { %v8898_v29 = vadd.f32 %v8726_v61, %v2872_v11  ;;  %10083 = vst [vmem:[#allocation40_spill] sm:$0xff] %v8901_v13 }
 0x3b7   :  { %v6974_v18 = vpop.f32.mrf.mxu1 }
 0x3b8   :  { %10082 = vst [vmem:[#allocation39_spill] sm:$0xff] %v8898_v29  ;;  %7093 = vmatprep.mubr.msk.f32.mxu0 %vm1741_vm1, %v8898_v29  ;;  %v8911_v35 = vadd.f32 %v6974_v18, %v8726_v61 }
 0x3b9   :  { %v2882_v33 = vpop.f32.mrf.mxu1  ;;  %7094 = vmatmul.mubr.msk.f32.gmra.mxu0 %vm1741_vm1, %v8901_v13 }
 0x3ba   :  { %v8908_v58 = vadd.f32 %v8726_v61, %v2882_v33  ;;  %10085 = vst [vmem:[#allocation42_spill] sm:$0xff] %v8911_v35  ;;  %v8944_v33 = vld [vmem:[%s10087_s17] ss:$0 sm:$0xff] }
 0x3bb   :  { %v6985_v4 = vpop.f32.mrf.mxu1 }
 0x3bc   :  { %10084 = vst [vmem:[#allocation41_spill] sm:$0xff] %v8908_v58  ;;  %7096 = vmatprep.mubr.msk.f32.mxu0 %vm1741_vm1, %v8908_v58 }
 0x3bd   :  { %7097 = vmatmul.mubr.msk.f32.gmra.mxu0 %vm1741_vm1, %v8911_v35  ;;  %v3073_v2 = vpop.f32.mrf.mxu1 }
 0x3be   :  { %7130 = vmatprep.mubr.msk.f32.mxu0 %vm1741_vm1, %v1714_v28 }
 0x3bf   :  { %v6988_v61 = vpop.f32.mrf.mxu1 }
 0x3c1   :  { %7131 = vmatmul.mubr.msk.f32.vlgmr.msra.gmra.mxu0 %vm1741_vm1, %v6785_v63  ;;  %v3083_v45 = vpop.f32.mrf.mxu1 }
 0x3c2   :  { %7133 = vmatprep.mubr.msk.f32.mxu0 %vm1741_vm1, %v1724_v43 }
 0x3c3   :  { %v6991_v49 = vpop.f32.mrf.mxu1 }
 0x3c5   :  { %7134 = vmatmul.mubr.msk.f32.gmra.mxu0 %vm1741_vm1, %v6788_v40  ;;  %v3093_v48 = vpop.f32.mrf.mxu1 }
 0x3c7   :  { %v6994_v50 = vpop.f32.mrf.mxu1 }
 0x3c9   :  { %v3103_v51 = vpop.f32.mrf.mxu1 }
 0x3cb   :  { %v6997_v42 = vpop.f32.mrf.mxu1 }
 0x3cd   :  { %v3113_v32 = vpop.f32.mrf.mxu1 }
 0x3cf   :  { %v8921_v17 = vpop.f32.mrf.mxu1 }
 0x3d1   :  { %v8923_v26 = vpop.f32.mrf.mxu1 }
 0x3d3   :  { %v8925_v25 = vpop.f32.mrf.mxu1 }
 0x3d5   :  { %v8927_v62 = vpop.f32.mrf.mxu1 }
 0x3d7   :  { %v8929_v0 = vpop.f32.mrf.mxu1 }
 0x3d9   :  { %v8931_v52 = vpop.f32.mrf.mxu1 }
 0x3db   :  { %v8938_v24 = vpop.f32.mrf.mxu1 }
 0x3dd   :  { %v8947_v35 = vpop.f32.mrf.mxu1 }
 0x439   :  { %v7047_v8 = vpop.f32.mrf.mxu0 }
 0x43a   :  { %v3432_v23 = vadd.f32 %v7047_v8, %v6985_v4 }
 0x43b   :  { %v3426_v63 = vpop.f32.mrf.mxu0 }
 0x43c   :  { %v3613_v11 = vadd.f32 %v8936_v20, %v3432_v23  ;;  %v3427_v18 = vadd.f32 %v3426_v63, %v3073_v2 }
 0x43d   :  { %v7050_v28 = vpop.f32.mrf.mxu0 }
 0x43e   :  { %v3649_v40 = vmax.f32 %v3613_v11, 0.0  ;;  %v3612_v43 = vadd.f32 %v8936_v20, %v3427_v18  ;;  %v3442_v12 = vadd.f32 %v7050_v28, %v6988_v61  ;;  %v8953_v11 = vpop.f32.mrf.mxu1 }
 0x43f   :  { %v3436_v58 = vpop.f32.mrf.mxu0 }
 0x440   :  { %v3648_v4 = vmax.f32 %v3612_v43, 0.0  ;;  %v3615_v8 = vadd.f32 %v8936_v20, %v3442_v12  ;;  %v3437_v13 = vadd.f32 %v3436_v58, %v3083_v45  ;;  %v3692_v23 = vmul.f32 %v8944_v33, %v3649_v40 }
 0x441   :  { %v7053_v2 = vpop.f32.mrf.mxu0 }
 0x442   :  { %v3651_v63 = vmax.f32 %v3615_v8, 0.0  ;;  %v3614_v29 = vadd.f32 %v8936_v20, %v3437_v13  ;;  %v3452_v10 = vadd.f32 %v7053_v2, %v6991_v49  ;;  %v3730_v19 = vsel %vm1741_vm1, %v3692_v23, 0.0  ;;  %v8960_v8 = vpop.f32.mrf.mxu1 }
 0x443   :  { %3731 = vadd.xlane.f32.xlu1 %v3730_v19  ;;  %v3446_v61 = vpop.f32.mrf.mxu0  ;;  %v3691_v18 = vmul.f32 %v8944_v33, %v3648_v4 }
 0x444   :  { %v3447_v28 = vadd.f32 %v3446_v61, %v3093_v48  ;;  %v3650_v43 = vmax.f32 %v3614_v29, 0.0  ;;  %v3617_v12 = vadd.f32 %v8936_v20, %v3452_v10  ;;  %v3694_v40 = vmul.f32 %v8944_v33, %v3651_v63 }
 0x445   :  { %v7056_v58 = vpop.f32.mrf.mxu0  ;;  %v3727_v45 = vsel %vm1741_vm1, %v3691_v18, 0.0 }
 0x446   :  { %v3616_v13 = vadd.f32 %v8936_v20, %v3447_v28  ;;  %v3462_v49 = vadd.f32 %v7056_v58, %v6994_v50  ;;  %3728 = vadd.xlane.f32.xlu0 %v3727_v45  ;;  %v3653_v48 = vmax.f32 %v3617_v12, 0.0  ;;  %v3736_v10 = vsel %vm1741_vm1, %v3694_v40, 0.0  ;;  %v8967_v28 = vpop.f32.mrf.mxu1 }
 0x447   :  { %v3456_v23 = vpop.f32.mrf.mxu0  ;;  %v3693_v61 = vmul.f32 %v8944_v33, %v3650_v43 }
 0x448   :  { %v3652_v19 = vmax.f32 %v3616_v13, 0.0  ;;  %v3619_v2 = vadd.f32 %v8936_v20, %v3462_v49  ;;  %v3457_v4 = vadd.f32 %v3456_v23, %v3103_v51 }
 0x449   :  { %v7059_v29 = vpop.f32.mrf.mxu0  ;;  %v3733_v43 = vsel %vm1741_vm1, %v3693_v61, 0.0 }
 0x44a   :  { %v3655_v18 = vmax.f32 %v3619_v2, 0.0  ;;  %v3618_v63 = vadd.f32 %v8936_v20, %v3457_v4  ;;  %v3472_v53 = vadd.f32 %v7059_v29, %v6997_v42  ;;  %3737 = vadd.xlane.f32.xlu0 %v3736_v10  ;;  %v3695_v50 = vmul.f32 %v8944_v33, %v3652_v19  ;;  %v8976_v4 = vpop.f32.mrf.mxu1 }
 0x44b   :  { %v3466_v58 = vpop.f32.mrf.mxu0  ;;  %v3696_v42 = vmul.f32 %v8944_v33, %v3653_v48 }
 0x44c   :  { %v3654_v45 = vmax.f32 %v3618_v63, 0.0  ;;  %v3621_v13 = vadd.f32 %v8936_v20, %v3472_v53  ;;  %v3467_v51 = vadd.f32 %v3466_v58, %v3113_v32  ;;  %v3739_v12 = vsel %vm1741_vm1, %v3695_v50, 0.0 }
 0x44d   :  { %v7062_v49 = vpop.f32.mrf.mxu0  ;;  %3740 = vadd.xlane.f32.xlu1 %v3739_v12  ;;  %v3698_v40 = vmul.f32 %v8944_v33, %v3655_v18  ;;  %v3742_v48 = vsel %vm1741_vm1, %v3696_v42, 0.0 }
 0x44e   :  { %v3657_v23 = vmax.f32 %v3621_v13, 0.0  ;;  %v3620_v19 = vadd.f32 %v8936_v20, %v3467_v51  ;;  %v3482_v2 = vadd.f32 %v7062_v49, %v8921_v17  ;;  %3734 = vadd.xlane.f32.xlu0 %v3733_v43  ;;  %v3697_v32 = vmul.f32 %v8944_v33, %v3654_v45  ;;  %v8986_v45 = vpop.f32.mrf.mxu1 }
 0x44f   :  { %v3476_v53 = vpop.f32.mrf.mxu0  ;;  %v3748_v18 = vsel %vm1741_vm1, %v3698_v40, 0.0 }
 0x450   :  { %v3656_v29 = vmax.f32 %v3620_v19, 0.0  ;;  %v3623_v10 = vadd.f32 %v8936_v20, %v3482_v2  ;;  %v3477_v61 = vadd.f32 %v3476_v53, %v8923_v26  ;;  %v3700_v50 = vmul.f32 %v8944_v33, %v3657_v23  ;;  %v8996_v53 = vpop.f32.mrf.mxu1 }
 0x451   :  { %v7065_v63 = vpop.f32.mrf.mxu0  ;;  %3749 = vadd.xlane.f32.xlu1 %v3748_v18  ;;  %v3745_v26 = vsel %vm1741_vm1, %v3697_v32, 0.0 }
 0x452   :  { %v3659_v17 = vmax.f32 %v3623_v10, 0.0  ;;  %v3622_v58 = vadd.f32 %v8936_v20, %v3477_v61  ;;  %v3492_v13 = vadd.f32 %v7065_v63, %v8925_v25  ;;  %3743 = vadd.xlane.f32.xlu0 %v3742_v48  ;;  %v3699_v49 = vmul.f32 %v8944_v33, %v3656_v29 }
 0x453   :  { %v3486_v51 = vpop.f32.mrf.mxu0  ;;  %v3754_v23 = vsel %vm1741_vm1, %v3700_v50, 0.0 }
 0x454   :  { %v3487_v12 = vadd.f32 %v3486_v51, %v8927_v62  ;;  %v3658_v43 = vmax.f32 %v3622_v58, 0.0  ;;  %v3625_v40 = vadd.f32 %v8936_v20, %v3492_v13  ;;  %v3702_v19 = vmul.f32 %v8944_v33, %v3659_v17  ;;  %v7021_v51 = vpop.f32.mrf.mxu1 }
 0x455   :  { %v7068_v42 = vpop.f32.mrf.mxu0  ;;  %3746 = vadd.xlane.f32.xlu1 %v3745_v26  ;;  %v3751_v61 = vsel %vm1741_vm1, %v3699_v49, 0.0 }
 0x456   :  { %v3624_v25 = vadd.f32 %v8936_v20, %v3487_v12  ;;  %v3502_v2 = vadd.f32 %v7068_v42, %v8929_v0  ;;  %3755 = vadd.xlane.f32.xlu0 %v3754_v23  ;;  %v3661_v18 = vmax.f32 %v3625_v40, 0.0  ;;  %v3760_v48 = vsel %vm1741_vm1, %v3702_v19, 0.0 }
 0x457   :  { %v3496_v62 = vpop.f32.mrf.mxu0  ;;  %v3701_v50 = vmul.f32 %v8944_v33, %v3658_v43 }
 0x458   :  { %v3660_v32 = vmax.f32 %v3624_v25, 0.0  ;;  %v3627_v29 = vadd.f32 %v8936_v20, %v3502_v2  ;;  %v3497_v10 = vadd.f32 %v3496_v62, %v8931_v52  ;;  %v3193_v62 = vpop.f32.mrf.mxu1 }
 0x459   :  { %v7071_v63 = vpop.f32.mrf.mxu0  ;;  %3752 = vadd.xlane.f32.xlu1 %v3751_v61  ;;  %v3757_v43 = vsel %vm1741_vm1, %v3701_v50, 0.0 }
 0x45a   :  { %v3663_v17 = vmax.f32 %v3627_v29, 0.0  ;;  %v3626_v0 = vadd.f32 %v8936_v20, %v3497_v10  ;;  %v3512_v58 = vadd.f32 %v7071_v63, %v8938_v24  ;;  %3761 = vadd.xlane.f32.xlu0 %v3760_v48  ;;  %v3703_v13 = vmul.f32 %v8944_v33, %v3660_v32 }
 0x45b   :  { %v3506_v12 = vpop.f32.mrf.mxu0  ;;  %v3704_v24 = vmul.f32 %v8944_v33, %v3661_v18 }
 0x45c   :  { %v3662_v52 = vmax.f32 %v3626_v0, 0.0  ;;  %v3629_v26 = vadd.f32 %v8936_v20, %v3512_v58  ;;  %v3507_v49 = vadd.f32 %v3506_v12, %v8947_v35  ;;  %v3763_v40 = vsel %vm1741_vm1, %v3703_v13, 0.0  ;;  %v7024_v58 = vpop.f32.mrf.mxu1 }
 0x45d   :  { %v7074_v42 = vpop.f32.mrf.mxu0  ;;  %3764 = vadd.xlane.f32.xlu1 %v3763_v40  ;;  %v3706_v23 = vmul.f32 %v8944_v33, %v3663_v17  ;;  %v3766_v18 = vsel %vm1741_vm1, %v3704_v24, 0.0 }
 0x45e   :  { %v3665_v19 = vmax.f32 %v3629_v26, 0.0  ;;  %v3628_v25 = vadd.f32 %v8936_v20, %v3507_v49  ;;  %v3522_v2 = vadd.f32 %v7074_v42, %v8953_v11  ;;  %3758 = vadd.xlane.f32.xlu0 %v3757_v43  ;;  %v3705_v35 = vmul.f32 %v8944_v33, %v3662_v52  ;;  %v3203_v24 = vpop.f32.mrf.mxu1 }
 0x45f   :  { %v3516_v32 = vpop.f32.mrf.mxu0  ;;  %v3772_v63 = vsel %vm1741_vm1, %v3706_v23, 0.0 }
 0x460   :  { %v3664_v29 = vmax.f32 %v3628_v25, 0.0  ;;  %v3631_v10 = vadd.f32 %v8936_v20, %v3522_v2  ;;  %v3517_v61 = vadd.f32 %v3516_v32, %v8960_v8  ;;  %v3708_v50 = vmul.f32 %v8944_v33, %v3665_v19 }
 0x461   :  { %v7077_v48 = vpop.f32.mrf.mxu0  ;;  %3773 = vadd.xlane.f32.xlu1 %v3772_v63  ;;  %v3769_v8 = vsel %vm1741_vm1, %v3705_v35, 0.0 }
 0x462   :  { %v3667_v17 = vmax.f32 %v3631_v10, 0.0  ;;  %v3630_v11 = vadd.f32 %v8936_v20, %v3517_v61  ;;  %v3532_v0 = vadd.f32 %v7077_v48, %v8967_v28  ;;  %3767 = vadd.xlane.f32.xlu0 %v3766_v18  ;;  %v3707_v52 = vmul.f32 %v8944_v33, %v3664_v29 }
 0x463   :  { %v3526_v13 = vpop.f32.mrf.mxu0  ;;  %v3778_v42 = vsel %vm1741_vm1, %v3708_v50, 0.0  ;;  %v7027_v50 = vpop.f32.mrf.mxu1 }
 0x464   :  { %v3527_v12 = vadd.f32 %v3526_v13, %v8976_v4  ;;  %v3666_v26 = vmax.f32 %v3630_v11, 0.0  ;;  %v3633_v49 = vadd.f32 %v8936_v20, %v3532_v0  ;;  %v3710_v43 = vmul.f32 %v8944_v33, %v3667_v17 }
 0x465   :  { %v7080_v40 = vpop.f32.mrf.mxu0  ;;  %3770 = vadd.xlane.f32.xlu1 %v3769_v8  ;;  %v3775_v32 = vsel %vm1741_vm1, %v3707_v52, 0.0 }
 0x466   :  { %v3632_v28 = vadd.f32 %v8936_v20, %v3527_v12  ;;  %v3542_v23 = vadd.f32 %v7080_v40, %v8986_v45  ;;  %3779 = vadd.xlane.f32.xlu0 %v3778_v42  ;;  %v3669_v35 = vmax.f32 %v3633_v49, 0.0  ;;  %v3784_v10 = vsel %vm1741_vm1, %v3710_v43, 0.0  ;;  %v3213_v42 = vpop.f32.mrf.mxu1 }
 0x467   :  { %v3536_v4 = vpop.f32.mrf.mxu0  ;;  %v3709_v61 = vmul.f32 %v8944_v33, %v3666_v26 }
 0x468   :  { %v3668_v19 = vmax.f32 %v3632_v28, 0.0  ;;  %v3635_v25 = vadd.f32 %v8936_v20, %v3542_v23  ;;  %v3537_v2 = vadd.f32 %v3536_v4, %v8996_v53  ;;  %v3712_v26 = vmul.f32 %v8944_v33, %v3669_v35 }
 0x469   :  { %v7083_v29 = vpop.f32.mrf.mxu0  ;;  %3776 = vadd.xlane.f32.xlu1 %v3775_v32  ;;  %v3781_v8 = vsel %vm1741_vm1, %v3709_v61, 0.0 }
 0x46a   :  { %v3671_v63 = vmax.f32 %v3635_v25, 0.0  ;;  %v3634_v45 = vadd.f32 %v8936_v20, %v3537_v2  ;;  %v3552_v48 = vadd.f32 %v7083_v29, %v7021_v51  ;;  %3785 = vadd.xlane.f32.xlu0 %v3784_v10  ;;  %v3711_v18 = vmul.f32 %v8944_v33, %v3668_v19  ;;  %v7030_v10 = vpop.f32.mrf.mxu1 }
 0x46b   :  { %v3546_v17 = vpop.f32.mrf.mxu0  ;;  %v3790_v2 = vsel %vm1741_vm1, %v3712_v26, 0.0 }
 0x46c   :  { %v3670_v11 = vmax.f32 %v3634_v45, 0.0  ;;  %v3637_v53 = vadd.f32 %v8936_v20, %v3552_v48  ;;  %v3547_v0 = vadd.f32 %v3546_v17, %v3193_v62  ;;  %v3787_v13 = vsel %vm1741_vm1, %v3711_v18, 0.0 }
 0x46d   :  { %v7086_v12 = vpop.f32.mrf.mxu0  ;;  %3788 = vadd.xlane.f32.xlu1 %v3787_v13  ;;  %v3714_v52 = vmul.f32 %v8944_v33, %v3671_v63  ;;  %v3223_v13 = vpop.f32.mrf.mxu1 }
 0x46e   :  { %v3673_v51 = vmax.f32 %v3637_v53, 0.0  ;;  %v3636_v49 = vadd.f32 %v8936_v20, %v3547_v0  ;;  %v3562_v40 = vadd.f32 %v7086_v12, %v7024_v58  ;;  %3782 = vadd.xlane.f32.xlu0 %v3781_v8  ;;  %v3713_v28 = vmul.f32 %v8944_v33, %v3670_v11 }
 0x46f   :  { %v3556_v43 = vpop.f32.mrf.mxu0  ;;  %v3796_v19 = vsel %vm1741_vm1, %v3714_v52, 0.0 }
 0x470   :  { %v3672_v62 = vmax.f32 %v3636_v49, 0.0  ;;  %v3639_v23 = vadd.f32 %v8936_v20, %v3562_v40  ;;  %v3557_v4 = vadd.f32 %v3556_v43, %v3203_v24  ;;  %v3716_v32 = vmul.f32 %v8944_v33, %v3673_v51 }
 0x471   :  { %v7089_v25 = vpop.f32.mrf.mxu0  ;;  %3797 = vadd.xlane.f32.xlu1 %v3796_v19  ;;  %v3793_v45 = vsel %vm1741_vm1, %v3713_v28, 0.0 }
 0x472   :  { %v3675_v35 = vmax.f32 %v3639_v23, 0.0  ;;  %v3638_v58 = vadd.f32 %v8936_v20, %v3557_v4  ;;  %v3572_v29 = vadd.f32 %v7089_v25, %v7027_v50  ;;  %3791 = vadd.xlane.f32.xlu0 %v3790_v2  ;;  %v3715_v24 = vmul.f32 %v8944_v33, %v3672_v62 }
 0x473   :  { %v3566_v61 = vpop.f32.mrf.mxu0  ;;  %v3802_v11 = vsel %vm1741_vm1, %v3716_v32, 0.0 }
 0x474   :  { %v3567_v63 = vadd.f32 %v3566_v61, %v3213_v42  ;;  %v3674_v48 = vmax.f32 %v3638_v58, 0.0  ;;  %v3641_v18 = vadd.f32 %v8936_v20, %v3572_v29  ;;  %v3718_v53 = vmul.f32 %v8944_v33, %v3675_v35  ;;  %v3879_v29 = vld [vmem:[%s10088_s5 + $0x8] sm:$0xff]  ;;  %v3881_v61 = vld [vmem:[%s10088_s5 + $0x18] sm:$0xff] }
 0x475   :  { %v7092_v17 = vpop.f32.mrf.mxu0  ;;  %3794 = vadd.xlane.f32.xlu1 %v3793_v45  ;;  %v3799_v26 = vsel %vm1741_vm1, %v3715_v24, 0.0  ;;  %vm3915_vm9 = vcmp.gt.s32.totalorder %v3879_v29, 0  ;;  %v3880_v45 = vld [vmem:[%s10088_s5 + $0x10] sm:$0xff]  ;;  %v3885_v24 = vld [vmem:[%s10088_s5 + $0x38] sm:$0xff]  ;;  %vm3917_vm11 = vcmp.gt.s32.totalorder %v3881_v61, 0  ;;  %v3894_v61 = vld [vmem:[%s10088_s5 + $0x80] sm:$0xff] }
 0x476   :  { %v3640_v0 = vadd.f32 %v8936_v20, %v3567_v63  ;;  %v3582_v50 = vadd.f32 %v7092_v17, %v7030_v10  ;;  %3803 = vadd.xlane.f32.xlu0 %v3802_v11  ;;  %v3677_v51 = vmax.f32 %v3641_v18, 0.0  ;;  %v3808_v40 = vsel %vm1741_vm1, %v3718_v53, 0.0  ;;  %v3878_v10 = vld [vmem:[%s10088_s5] sm:$0xff]  ;;  %v3883_v17 = vld [vmem:[%s10088_s5 + $0x28] sm:$0xff]  ;;  %v3884_v11 = vld [vmem:[%s10088_s5 + $0x30] sm:$0xff] }
 0x477   :  { %v3576_v12 = vpop.f32.mrf.mxu0  ;;  %v3717_v42 = vmul.f32 %v8944_v33, %v3674_v48  ;;  %v9081_v63 = vld [vmem:[#allocation2] ss:$0 sm:$0xff]  ;;  %vm3914_vm10 = vcmp.gt.s32.totalorder %v3878_v10, 0  ;;  %v3887_v53 = vld [vmem:[%s10088_s5 + $0x48] sm:$0xff]  ;;  %vm3916_vm13 = vcmp.gt.s32.totalorder %v3880_v45, 0  ;;  %vm3921_vm14 = vcmp.gt.s32.totalorder %v3885_v24, 0 }
 0x478   :  { %v3676_v8 = vmax.f32 %v3640_v0, 0.0  ;;  %v3577_v52 = vadd.f32 %v3576_v12, %v3223_v13  ;;  %v3643_v49 = vadd.f32 %v8936_v20, %v3582_v50  ;;  %v3720_v25 = vmul.f32 %v8944_v33, %v3677_v51  ;;  %v3886_v12 = vld [vmem:[%s10088_s5 + $0x40] sm:$0xff] }
 0x479   :  { %3800 = vadd.xlane.f32.xlu1 %v3799_v26  ;;  %v3805_v19 = vsel %vm1741_vm1, %v3717_v42, 0.0  ;;  %v10089_v0 = vmov 0.0   ;;  %vm3919_vm15 = vcmp.gt.s32.totalorder %v3883_v17, 0  ;;  %vm3920_vm0 = vcmp.gt.s32.totalorder %v3884_v11, 0  ;;  %v3898_v11 = vld [vmem:[%s10088_s5 + $0xa0] sm:$0xff] }
 0x47a   :  { %v3642_v43 = vadd.f32 %v8936_v20, %v3577_v52  ;;  %3809 = vadd.xlane.f32.xlu0 %v3808_v40  ;;  %v3719_v28 = vmul.f32 %v8944_v33, %v3676_v8  ;;  %v3679_v4 = vmax.f32 %v3643_v49, 0.0  ;;  %v3814_v20 = vsel %vm1741_vm1, %v3720_v25, 0.0  ;;  %v3889_v49 = vld [vmem:[%s10088_s5 + $0x58] sm:$0xff]  ;;  %v3890_v40 = vld [vmem:[%s10088_s5 + $0x60] sm:$0xff]  ;;  %v3892_v25 = vld [vmem:[%s10088_s5 + $0x70] sm:$0xff] }
 0x47b   :  { %v9100_v50 = vsel %vm3915_vm9, 1.0, %v10089_v0  ;;  %v9103_v13 = vsel %vm3914_vm10, 1.0, %v10089_v0  ;;  %v9109_v26 = vsel %vm3917_vm11, 1.0, %v10089_v0  ;;  %vm3923_vm2 = vcmp.gt.s32.totalorder %v3887_v53, 0  ;;  %v3896_v53 = vld [vmem:[%s10088_s5 + $0x90] sm:$0xff] }
 0x47c   :  { %v3678_v62 = vmax.f32 %v3642_v43, 0.0  ;;  %v3811_v23 = vsel %vm1741_vm1, %v3719_v28, 0.0  ;;  %v3722_v35 = vmul.f32 %v8944_v33, %v3679_v4  ;;  %v3888_v43 = vld [vmem:[%s10088_s5 + $0x50] sm:$0xff]  ;;  %v9125_v28 = vsel %vm3916_vm13, 1.0, %v10089_v0 }
 0x47d   :  { %3812 = vadd.xlane.f32.xlu1 %v3811_v23  ;;  %vm3922_vm3 = vcmp.gt.s32.totalorder %v3886_v12, 0  ;;  %v3893_v23 = vld [vmem:[%s10088_s5 + $0x78] sm:$0xff]  ;;  %vm3925_vm4 = vcmp.gt.s32.totalorder %v3889_v49, 0  ;;  %vm3926_vm5 = vcmp.gt.s32.totalorder %v3890_v40, 0  ;;  %vm3924_vm6 = vcmp.gt.s32.totalorder %v3888_v43, 0 }
 0x47e   :  { %3806 = vadd.xlane.f32.xlu0 %v3805_v19  ;;  %v3721_v2 = vmul.f32 %v8944_v33, %v3678_v62  ;;  %v3820_v58 = vsel %vm1741_vm1, %v3722_v35, 0.0  ;;  %v3882_v33 = vld [vmem:[%s10088_s5 + $0x20] sm:$0xff]  ;;  %v9128_v62 = vsel %vm3921_vm14, 1.0, %v10089_v0  ;;  %v3891_v19 = vld [vmem:[%s10088_s5 + $0x68] sm:$0xff]  ;;  %v9146_v35 = vsel %vm3923_vm2, 1.0, %v10089_v0  ;;  %v3901_v49 = vld [vmem:[%s10088_s5 + $0xb8] sm:$0xff] }
 0x47f   :  { %vm3918_vm12 = vcmp.gt.s32.totalorder %v3882_v33, 0  ;;  %v9153_v10 = vsel %vm3922_vm3, 1.0, %v10089_v0  ;;  %vm3929_vm7 = vcmp.gt.s32.totalorder %v3893_v23, 0  ;;  %v3897_v33 = vld [vmem:[%s10088_s5 + $0x98] sm:$0xff]  ;;  %v9163_v45 = vsel %vm3925_vm4, 1.0, %v10089_v0  ;;  %v3899_v23 = vld [vmem:[%s10088_s5 + $0xa8] sm:$0xff] }
 0x480   :  { %v3817_v32 = vsel %vm1741_vm1, %v3721_v2, 0.0  ;;  %v9112_v51 = vsel %vm3918_vm12, 1.0, %v10089_v0  ;;  %v9167_v24 = vsel %vm3926_vm5, 1.0, %v10089_v0  ;;  %vm3927_vm8 = vcmp.gt.s32.totalorder %v3891_v19, 0  ;;  %v3903_v19 = vld [vmem:[%s10088_s5 + $0xc8] sm:$0xff] }
 0x481   :  { %3818 = vadd.xlane.f32.xlu1 %v3817_v32  ;;  %v9140_v32 = vsel %vm3919_vm15, 1.0, %v10089_v0  ;;  %vm3928_vm9 = vcmp.gt.s32.totalorder %v3892_v25, 0  ;;  %vm4094_vm10 = vcmask 7168   ;;  %v9170_v17 = vsel %vm3924_vm6, 1.0, %v10089_v0 }
 0x482   :  { %3815 = vadd.xlane.f32.xlu0 %v3814_v20  ;;  %v9143_v20 = vsel %vm3920_vm0, 1.0, %v10089_v0  ;;  %vm3930_vm12 = vcmp.gt.s32.totalorder %v3894_v61, 0  ;;  %vm3933_vm13 = vcmp.gt.s32.totalorder %v3897_v33, 0  ;;  %v9193_v43 = vsel %vm3928_vm9, 1.0, %v10089_v0  ;;  %v3905_v61 = vld [vmem:[%s10088_s5 + $0xd8] sm:$0xff]  ;;  %v3906_v33 = vld [vmem:[%s10088_s5 + $0xe0] sm:$0xff] }
 0x483   :  { %vm3934_vm14 = vcmp.gt.s32.totalorder %v3898_v11, 0  ;;  %vm3932_vm15 = vcmp.gt.s32.totalorder %v3896_v53, 0  ;;  %vm3937_vm0 = vcmp.gt.s32.totalorder %v3901_v49, 0  ;;  %vm3935_vm2 = vcmp.gt.s32.totalorder %v3899_v23, 0  ;;  %v3908_v11 = vld [vmem:[%s10088_s5 + $0xf0] sm:$0xff]  ;;  %v3907_v23 = vld [vmem:[%s10088_s5 + $0xe8] sm:$0xff] }
 0x484   :  { %v9228_v49 = vsel %vm3934_vm14, 1.0, %v10089_v0  ;;  %vm3939_vm4 = vcmp.gt.s32.totalorder %v3903_v19, 0  ;;  %v9236_v16 = vsel %vm3937_vm0, 1.0, %v10089_v0  ;;  %v9246_v7 = vsel %vm3935_vm2, 1.0, %v10089_v0 }
 0x485   :  { %vm3941_vm6 = vcmp.gt.s32.totalorder %v3905_v61, 0  ;;  %v9258_v14 = vsel %vm3939_vm4, 1.0, %v10089_v0  ;;  %vm3944_vm9 = vcmp.gt.s32.totalorder %v3908_v11, 0  ;;  %vm4970_vm14 = vcmask 1041409  }
 0x486   :  { %3821 = vadd.xlane.f32.xlu0 %v3820_v58  ;;  %v3895_v58 = vld [vmem:[%s10088_s5 + $0x88] sm:$0xff]  ;;  %v9289_v39 = vsel %vm3944_vm9, 1.0, %v10089_v0  ;;  %vm4974_vm0 = vcmask 1043459   ;;  %vm4976_vm2 = vcmask 1044484   ;;  %vm4980_vm4 = vcmask 1046534  }
 0x487   :  { %vm3931_vm11 = vcmp.gt.s32.totalorder %v3895_v58, 0  ;;  %v3902_v58 = vld [vmem:[%s10088_s5 + $0xc0] sm:$0xff] }
 0x488   :  { %vm3938_vm5 = vcmp.gt.s32.totalorder %v3902_v58, 0 }
 0x489   :  { %v9266_v61 = vsel %vm3938_vm5, 1.0, %v10089_v0  ;;  %vm4982_vm5 = vcmask 1047559  }
 0x4cc   :  { %v3732_v48 = vpop.xlane.xlu1 %3731 }
 0x4cd   :  { %v3843_v18 = vadd.f32 %v9081_v63, %v3732_v48 }
 0x4cf   :  { %v3988_v8 = vmul.f32 1.442695, %v3843_v18  ;;  %v3729_v52 = vpop.xlane.xlu0 %3728 }
 0x4d0   :  { %v3842_v42 = vadd.f32 %v9081_v63, %v3729_v52  ;;  %v9181_v52 = vsel %vm3929_vm7, 1.0, %v10089_v0  ;;  %vm3942_vm7 = vcmp.gt.s32.totalorder %v3906_v33, 0 }
 0x4d1   :  { %7211 = vpow2.f32 %v3988_v8  ;;  %v9274_v19 = vsel %vm3942_vm7, 1.0, %v10089_v0 }
 0x4d2   :  { %v3986_v4 = vmul.f32 1.442695, %v3842_v42  ;;  %v9189_v42 = vsel %vm3927_vm8, 1.0, %v10089_v0 }
 0x4d3   :  { %v3738_v2 = vpop.xlane.xlu0 %3737 }
 0x4d4   :  { %7213 = vpow2.f32 %v3986_v4  ;;  %v3845_v29 = vadd.f32 %v9081_v63, %v3738_v2  ;;  %v3900_v4 = vld [vmem:[%s10088_s5 + $0xb0] sm:$0xff] }
 0x4d5   :  { %vm3936_vm3 = vcmp.gt.s32.totalorder %v3900_v4, 0 }
 0x4d6   :  { %v3992_v48 = vmul.f32 1.442695, %v3845_v29  ;;  %v3741_v18 = vpop.xlane.xlu1 %3740  ;;  %v9203_v29 = vsel %vm3931_vm11, 1.0, %v10089_v0  ;;  %vm3943_vm11 = vcmp.gt.s32.totalorder %v3907_v23, 0 }
 0x4d7   :  { %v3846_v12 = vadd.f32 %v9081_v63, %v3741_v18  ;;  %v3735_v8 = vpop.xlane.xlu0 %3734  ;;  %v9210_v18 = vsel %vm3930_vm12, 1.0, %v10089_v0 }
 0x4d8   :  { %7215 = vpow2.f32 %v3992_v48  ;;  %v3844_v40 = vadd.f32 %v9081_v63, %v3735_v8  ;;  %v9214_v8 = vsel %vm3933_vm13, 1.0, %v10089_v0  ;;  %vm7398_vm13 = vmmov 0  }
 0x4d9   :  { %v3994_v2 = vmul.f32 1.442695, %v3846_v12  ;;  %7107 = vmatprep.mubr.msk.f32.mxu1 %vm7398_vm13, %v10089_v0 }
 0x4da   :  { %v3990_v25 = vmul.f32 1.442695, %v3844_v40  ;;  %v3750_v48 = vpop.xlane.xlu1 %3749  ;;  %v9232_v40 = vsel %vm3932_vm15, 1.0, %v10089_v0  ;;  %vm4972_vm15 = vcmask 1042434  }
 0x4db   :  { %7217 = vpow2.f32 %v3994_v2  ;;  %v3849_v12 = vadd.f32 %v9081_v63, %v3750_v48  ;;  %v3744_v3 = vpop.xlane.xlu0 %3743 }
 0x4dc   :  { %7219 = vpow2.f32 %v3990_v25  ;;  %v3847_v48 = vadd.f32 %v9081_v63, %v3744_v3  ;;  %v3904_v25 = vld [vmem:[%s10088_s5 + $0xd0] sm:$0xff]  ;;  %v9250_v3 = vsel %vm3936_vm3, 1.0, %v10089_v0  ;;  %vm4978_vm3 = vcmask 1045509  }
 0x4dd   :  { %v4000_v2 = vmul.f32 1.442695, %v3849_v12  ;;  %vm3940_vm8 = vcmp.gt.s32.totalorder %v3904_v25, 0 }
 0x4de   :  { %v7212_v5 = vpop.eup %7211  ;;  %v3747_v53 = vpop.xlane.xlu1 %3746  ;;  %v9285_v59 = vsel %vm3940_vm8, 1.0, %v10089_v0 }
 0x4df   :  { %7221 = vpow2.f32 %v4000_v2  ;;  %v3848_v12 = vadd.f32 %v9081_v63, %v3747_v53  ;;  %v3756_v60 = vpop.xlane.xlu0 %3755  ;;  %v9254_v46 = vmul.f32 %v7212_v5, %v9100_v50  ;;  %v3996_v2 = vmul.f32 1.442695, %v3847_v48 }
 0x4e0   :  { %v3851_v4 = vadd.f32 %v9081_v63, %v3756_v60  ;;  %v9271_v50 = vsel %vm3941_vm6, 1.0, %v10089_v0  ;;  %v3909_v60 = vld [vmem:[%s10088_s5 + $0xf8] sm:$0xff] }
 0x4e1   :  { %v7214_v33 = vpop.eup %7213  ;;  %v4102_v5 = vsel %vm4094_vm10, %v9254_v46, 0.0  ;;  %v3998_v58 = vmul.f32 1.442695, %v3848_v12  ;;  %vm3945_vm12 = vcmp.gt.s32.totalorder %v3909_v60, 0  ;;  %7223 = vpow2.f32 %v3996_v2 }
 0x4e2   :  { %v3753_v53 = vpop.xlane.xlu1 %3752  ;;  %v4103_v54 = vrot.slane %v4102_v5, 4  ;;  %v9280_v41 = vmul.f32 %v7214_v33, %v9103_v13  ;;  %v4004_v48 = vmul.f32 1.442695, %v3851_v4  ;;  %v9302_v60 = vsel %vm3945_vm12, 1.0, %v10089_v0 }
 0x4e3   :  { %v3850_v47 = vadd.f32 %v9081_v63, %v3753_v53  ;;  %v3762_v6 = vpop.xlane.xlu0 %3761  ;;  %v9295_v53 = vsel %vm3943_vm11, 1.0, %v10089_v0  ;;  %7225 = vpow2.f32 %v3998_v58 }
 0x4e4   :  { %v3853_v12 = vadd.f32 %v9081_v63, %v3762_v6  ;;  %v4104_v38 = vadd.f32 %v4103_v54, %v4102_v5  ;;  %v4095_v13 = vsel %vm4094_vm10, %v9280_v41, 0.0  ;;  %7227 = vpow2.f32 %v4004_v48 }
 0x4e5   :  { %v7216_v23 = vpop.eup %7215  ;;  %v4002_v4 = vmul.f32 1.442695, %v3850_v47  ;;  %v4096_v33 = vrot.slane %v4095_v13, 4 }
 0x4e6   :  { %v4008_v25 = vmul.f32 1.442695, %v3853_v12  ;;  %v3765_v55 = vpop.xlane.xlu1 %3764  ;;  %v4105_v11 = vrot.slane %v4104_v38, 2  ;;  %v9298_v44 = vmul.f32 %v7216_v23, %v9109_v26 }
 0x4e7   :  { %v3854_v6 = vadd.f32 %v9081_v63, %v3765_v55  ;;  %v3759_v54 = vpop.xlane.xlu0 %3758  ;;  %v4097_v5 = vadd.f32 %v4096_v33, %v4095_v13  ;;  %7229 = vpow2.f32 %v4002_v4 }
 0x4e8   :  { %v7218_v47 = vpop.eup %7217  ;;  %v3852_v2 = vadd.f32 %v9081_v63, %v3759_v54  ;;  %v4106_v34 = vadd.f32 %v4105_v11, %v4104_v38  ;;  %v4116_v58 = vsel %vm4094_vm10, %v9298_v44, 0.0  ;;  %7231 = vpow2.f32 %v4008_v25 }
 0x4e9   :  { %v7220_v12 = vpop.eup %7219  ;;  %v4010_v36 = vmul.f32 1.442695, %v3854_v6  ;;  %v4098_v26 = vrot.slane %v4097_v5, 2  ;;  %v4117_v23 = vrot.slane %v4116_v58, 4  ;;  %v9308_v48 = vmul.f32 %v7218_v47, %v9112_v51 }
 0x4ea   :  { %v4006_v55 = vmul.f32 1.442695, %v3852_v2  ;;  %v3774_v13 = vpop.xlane.xlu1 %3773  ;;  %v4107_v33 = vrot.slane %v4106_v34, 1  ;;  %v9311_v37 = vmul.f32 %v7220_v12, %v9125_v28 }
 0x4eb   :  { %7233 = vpow2.f32 %v4010_v36  ;;  %v3857_v38 = vadd.f32 %v9081_v63, %v3774_v13  ;;  %v3768_v4 = vpop.xlane.xlu0 %3767  ;;  %v4099_v11 = vadd.f32 %v4098_v26, %v4097_v5  ;;  %v4118_v54 = vadd.f32 %v4117_v23, %v4116_v58 }
 0x4ec   :  { %v7222_v1 = vpop.eup %7221  ;;  %7235 = vpow2.f32 %v4006_v55  ;;  %v3855_v6 = vadd.f32 %v9081_v63, %v3768_v4  ;;  %v4108_v31 = vadd.f32 %v4107_v33, %v4106_v34  ;;  %v4123_v51 = vsel %vm4094_vm10, %v9308_v48, 0.0 }
 0x4ed   :  { %v4016_v25 = vmul.f32 1.442695, %v3857_v38  ;;  %v4100_v47 = vrot.slane %v4099_v11, 1  ;;  %v4119_v2 = vrot.slane %v4118_v54, 2  ;;  %v4124_v57 = vrot.slane %v4123_v51, 4 }
 0x4ee   :  { %v4012_v28 = vmul.f32 1.442695, %v3855_v6  ;;  %v3771_v12 = vpop.xlane.xlu1 %3770  ;;  %v4348_v36 = vadd.f32 1e-10, %v4108_v31  ;;  %v4109_v13 = vsel %vm4094_vm10, %v9311_v37, 0.0  ;;  %v9320_v5 = vmul.f32 %v7222_v1, %v9128_v62  ;;  %v7224_v15 = vpop.eup %7223 }
 0x4ef   :  { %7237 = vpow2.f32 %v4016_v25  ;;  %v3856_v58 = vadd.f32 %v9081_v63, %v3771_v12  ;;  %v3780_v34 = vpop.xlane.xlu0 %3779  ;;  %v4101_v26 = vadd.f32 %v4100_v47, %v4099_v11  ;;  %v4120_v23 = vadd.f32 %v4119_v2, %v4118_v54 }
 0x4f0   :  { %7239 = vpow2.f32 %v4012_v28  ;;  %v3859_v55 = vadd.f32 %v9081_v63, %v3780_v34  ;;  %v4125_v33 = vadd.f32 %v4124_v57, %v4123_v51  ;;  %v4110_v38 = vrot.slane %v4109_v13, 4  ;;  %v7226_v12 = vpop.eup %7225 }
 0x4f1   :  { %v4014_v4 = vmul.f32 1.442695, %v3856_v58  ;;  %7241 = vrcp.f32 %v4348_v36  ;;  %v4347_v31 = vadd.f32 1e-10, %v4101_v26  ;;  %v4121_v6 = vrot.slane %v4120_v23, 1  ;;  %v7228_v51 = vpop.eup %7227 }
 0x4f2   :  { %v4020_v21 = vmul.f32 1.442695, %v3859_v55  ;;  %v3777_v27 = vpop.xlane.xlu1 %3776  ;;  %v4126_v1 = vrot.slane %v4125_v33, 2  ;;  %v4111_v62 = vadd.f32 %v4110_v38, %v4109_v13  ;;  %v4144_v25 = vsel %vm4094_vm10, %v9320_v5, 0.0 }
 0x4f3   :  { %7243 = vpow2.f32 %v4014_v4  ;;  %v3858_v11 = vadd.f32 %v9081_v63, %v3777_v27  ;;  %v3786_v54 = vpop.xlane.xlu0 %3785  ;;  %v4122_v47 = vadd.f32 %v4121_v6, %v4120_v23  ;;  %v4145_v57 = vrot.slane %v4144_v25, 4 }
 0x4f4   :  { %7245 = vpow2.f32 %v4020_v21  ;;  %v3861_v2 = vadd.f32 %v9081_v63, %v3786_v54  ;;  %v4127_v28 = vadd.f32 %v4126_v1, %v4125_v33  ;;  %v4112_v36 = vrot.slane %v4111_v62, 2  ;;  %v9328_v58 = vpop.eup %7229 }
 0x4f5   :  { %v4018_v34 = vmul.f32 1.442695, %v3858_v11  ;;  %7247 = vrcp.f32 %v4347_v31  ;;  %v4350_v13 = vadd.f32 1e-10, %v4122_v47  ;;  %v4146_v26 = vadd.f32 %v4145_v57, %v4144_v25  ;;  %v9333_v23 = vpop.eup %7231 }
 0x4f6   :  { %v4024_v55 = vmul.f32 1.442695, %v3861_v2  ;;  %v3789_v38 = vpop.xlane.xlu1 %3788  ;;  %v4128_v4 = vrot.slane %v4127_v28, 1  ;;  %v4113_v30 = vadd.f32 %v4112_v36, %v4111_v62  ;;  %v9331_v27 = vmul.f32 %v7224_v15, %v9140_v32 }
 0x4f7   :  { %7249 = vpow2.f32 %v4018_v34  ;;  %v3862_v21 = vadd.f32 %v9081_v63, %v3789_v38  ;;  %v3783_v33 = vpop.xlane.xlu0 %3782  ;;  %v4147_v6 = vrot.slane %v4146_v26, 2  ;;  %v9337_v1 = vmul.f32 %v7226_v12, %v9143_v20 }
 0x4f8   :  { %v9339_v31 = vpop.eup %7233  ;;  %7251 = vpow2.f32 %v4024_v55  ;;  %v3860_v25 = vadd.f32 %v9081_v63, %v3783_v33  ;;  %v4129_v11 = vadd.f32 %v4128_v4, %v4127_v28  ;;  %v4114_v62 = vrot.slane %v4113_v30, 1 }
 0x4f9   :  { %v9342_v54 = vpop.eup %7235  ;;  %v4026_v15 = vmul.f32 1.442695, %v3862_v21  ;;  %7253 = vrcp.f32 %v4350_v13  ;;  %v4148_v32 = vadd.f32 %v4147_v6, %v4146_v26  ;;  %v4130_v47 = vsel %vm4094_vm10, %v9331_v27, 0.0 }
 0x4fa   :  { %v4022_v57 = vmul.f32 1.442695, %v3860_v25  ;;  %v3798_v2 = vpop.xlane.xlu1 %3797  ;;  %v4351_v36 = vadd.f32 1e-10, %v4129_v11  ;;  %v4115_v20 = vadd.f32 %v4114_v62, %v4113_v30  ;;  %v4131_v12 = vrot.slane %v4130_v47, 4 }
 0x4fb   :  { %7255 = vpow2.f32 %v4026_v15  ;;  %v3865_v34 = vadd.f32 %v9081_v63, %v3798_v2  ;;  %v3792_v55 = vpop.xlane.xlu0 %3791  ;;  %v4149_v38 = vrot.slane %v4148_v32, 1  ;;  %v4137_v28 = vsel %vm4094_vm10, %v9337_v1, 0.0 }
 0x4fc   :  { %v9349_v4 = vpop.eup %7237  ;;  %7257 = vpow2.f32 %v4022_v57  ;;  %v3863_v13 = vadd.f32 %v9081_v63, %v3792_v55  ;;  %v4349_v26 = vadd.f32 1e-10, %v4115_v20  ;;  %v4132_v21 = vadd.f32 %v4131_v12, %v4130_v47 }
 0x4fd   :  { %v9352_v33 = vpop.eup %7239  ;;  %v4032_v6 = vmul.f32 1.442695, %v3865_v34  ;;  %7259 = vrcp.f32 %v4351_v36  ;;  %v4150_v30 = vadd.f32 %v4149_v38, %v4148_v32  ;;  %v4138_v25 = vrot.slane %v4137_v28, 4 }
 0x4fe   :  { %v7242_v11 = vpop.eup %7241  ;;  %v4028_v62 = vmul.f32 1.442695, %v3863_v13  ;;  %v3795_v15 = vpop.xlane.xlu1 %3794  ;;  %7261 = vrcp.f32 %v4349_v26  ;;  %v4133_v2 = vrot.slane %v4132_v21, 2  ;;  %v9355_v56 = vmul.f32 %v7228_v51, %v9146_v35 }
 0x4ff   :  { %7263 = vpow2.f32 %v4032_v6  ;;  %v3864_v57 = vadd.f32 %v9081_v63, %v3795_v15  ;;  %v3804_v55 = vpop.xlane.xlu0 %3803  ;;  %v4386_v47 = vmul.f32 %v7242_v11, %v9254_v46  ;;  %v4354_v20 = vadd.f32 1e-10, %v4150_v30 }
 0x500   :  { %v9359_v12 = vpop.eup %7243  ;;  %7265 = vpow2.f32 %v4028_v62  ;;  %v3867_v32 = vadd.f32 %v9081_v63, %v3804_v55  ;;  %v4134_v36 = vadd.f32 %v4133_v2, %v4132_v21  ;;  %v4139_v34 = vadd.f32 %v4138_v25, %v4137_v28 }
 0x501   :  { %v9362_v38 = vpop.eup %7245  ;;  %v4030_v13 = vmul.f32 1.442695, %v3864_v57  ;;  %4462 = vperm.xlu0 %7209, %v4386_v47   ;;  %7267 = vrcp.f32 %v4354_v20  ;;  %v4158_v35 = vsel %vm4094_vm10, %v9355_v56, 0.0  ;;  %v9368_v51 = vmul.f32 %v9328_v58, %v9153_v10 }
 0x502   :  { %v7248_v46 = vpop.eup %7247  ;;  %v4036_v26 = vmul.f32 1.442695, %v3867_v32  ;;  %v3801_v6 = vpop.xlane.xlu1 %3800  ;;  %v4135_v30 = vrot.slane %v4134_v36, 1  ;;  %v4140_v11 = vrot.slane %v4139_v34, 2  ;;  %v4159_v62 = vrot.slane %v4158_v35, 4 }
 0x503   :  { %7269 = vpow2.f32 %v4030_v13  ;;  %v3866_v28 = vadd.f32 %v9081_v63, %v3801_v6  ;;  %v4384_v21 = vmul.f32 %v7248_v46, %v9280_v41  ;;  %v3810_v25 = vpop.xlane.xlu0 %3809  ;;  %v4151_v15 = vsel %vm4094_vm10, %v9368_v51, 0.0 }
 0x504   :  { %v9374_v2 = vpop.eup %7249  ;;  %7271 = vpow2.f32 %v4036_v26  ;;  %v3869_v10 = vadd.f32 %v9081_v63, %v3810_v25  ;;  %v4136_v58 = vadd.f32 %v4135_v30, %v4134_v36  ;;  %v4141_v57 = vadd.f32 %v4140_v11, %v4139_v34 }
 0x505   :  { %v9377_v55 = vpop.eup %7251  ;;  %v4034_v47 = vmul.f32 1.442695, %v3866_v28  ;;  %4457 = vperm.xlu1 %7210, %v4384_v21   ;;  %v4160_v20 = vadd.f32 %v4159_v62, %v4158_v35  ;;  %v4152_v32 = vrot.slane %v4151_v15, 4  ;;  %v9381_v41 = vmul.f32 %v9333_v23, %v9163_v45  ;;  %v4926_v45 = vld [vmem:[%s9970_s12 + $0x18] sm:$0xff] }
 0x506   :  { %v7254_v13 = vpop.eup %7253  ;;  %v4040_v46 = vmul.f32 1.442695, %v3869_v10  ;;  %v3813_v6 = vpop.xlane.xlu1 %3812  ;;  %v4352_v9 = vadd.f32 1e-10, %v4136_v58  ;;  %v4142_v22 = vrot.slane %v4141_v57, 1  ;;  %v9385_v26 = vmul.f32 %v9339_v31, %v9167_v24  ;;  %7100 = vmatpush3.msra.mxu1 %v4926_v45 }
 0x507   :  { %7273 = vpow2.f32 %v4034_v47  ;;  %v3870_v36 = vadd.f32 %v9081_v63, %v3813_v6  ;;  %v4390_v34 = vmul.f32 %v7254_v13, %v9298_v44  ;;  %v3807_v35 = vpop.xlane.xlu0 %3806  ;;  %v4161_v30 = vrot.slane %v4160_v20, 2  ;;  %7101 = vmatprep.subr.mxu1 %v10089_v0 }
 0x508   :  { %v9392_v23 = vpop.eup %7255  ;;  %7275 = vpow2.f32 %v4040_v46  ;;  %v3868_v11 = vadd.f32 %v9081_v63, %v3807_v35  ;;  %v4143_v62 = vadd.f32 %v4142_v22, %v4141_v57  ;;  %v4153_v28 = vadd.f32 %v4152_v32, %v4151_v15 }
 0x509   :  { %v9395_v24 = vpop.eup %7257  ;;  %v4042_v31 = vmul.f32 1.442695, %v3870_v36  ;;  %4472 = vperm.xlu1 %7210, %v4390_v34   ;;  %7277 = vrcp.f32 %v4352_v9  ;;  %v4162_v44 = vadd.f32 %v4161_v30, %v4160_v20  ;;  %v4172_v21 = vsel %vm4094_vm10, %v9381_v41, 0.0 }
 0x50a   :  { %v7260_v25 = vpop.eup %7259  ;;  %v4038_v10 = vmul.f32 1.442695, %v3868_v11  ;;  %v3819_v58 = vpop.xlane.xlu1 %3818  ;;  %v4353_v47 = vadd.f32 1e-10, %v4143_v62  ;;  %v4154_v13 = vrot.slane %v4153_v28, 2  ;;  %v4173_v46 = vrot.slane %v4172_v21, 4 }
 0x50b   :  { %v7262_v22 = vpop.eup %7261  ;;  %7279 = vpow2.f32 %v4042_v31  ;;  %v3872_v15 = vadd.f32 %v9081_v63, %v3819_v58  ;;  %v4392_v57 = vmul.f32 %v7260_v25, %v9308_v48  ;;  %v3816_v32 = vpop.xlane.xlu0 %3815  ;;  %v4163_v9 = vrot.slane %v4162_v44, 1 }
 0x50c   :  { %v9402_v20 = vpop.eup %7263  ;;  %7281 = vpow2.f32 %v4038_v10  ;;  %v4388_v6 = vmul.f32 %v7262_v22, %v9311_v37  ;;  %v3871_v36 = vadd.f32 %v9081_v63, %v3816_v32  ;;  %v4155_v34 = vadd.f32 %v4154_v13, %v4153_v28 }
 0x50d   :  { %v9406_v35 = vpop.eup %7265  ;;  %v4046_v30 = vmul.f32 1.442695, %v3872_v15  ;;  %4477 = vperm.xlu0 %7209, %v4392_v57   ;;  %7283 = vrcp.f32 %v4353_v47  ;;  %v4164_v45 = vadd.f32 %v4163_v9, %v4162_v44  ;;  %v4174_v11 = vadd.f32 %v4173_v46, %v4172_v21 }
 0x50e   :  { %v7268_v62 = vpop.eup %7267  ;;  %4467 = vperm.xlu1 %7210, %v4388_v6   ;;  %v4044_v48 = vmul.f32 1.442695, %v3871_v36  ;;  %v4156_v31 = vrot.slane %v4155_v34, 1  ;;  %v4179_v25 = vsel %vm4094_vm10, %v9385_v26, 0.0  ;;  %v9412_v37 = vmul.f32 %v9342_v54, %v9170_v17 }
 0x50f   :  { %7285 = vpow2.f32 %v4046_v30  ;;  %v4398_v28 = vmul.f32 %v7268_v62, %v9320_v5  ;;  %v3822_v10 = vpop.xlane.xlu0 %3821  ;;  %v4356_v58 = vadd.f32 1e-10, %v4164_v45  ;;  %v4175_v13 = vrot.slane %v4174_v11, 2 }
 0x510   :  { %v9415_v47 = vpop.eup %7269  ;;  %7287 = vpow2.f32 %v4044_v48  ;;  %v3873_v44 = vadd.f32 %v9081_v63, %v3822_v10  ;;  %v4157_v21 = vadd.f32 %v4156_v31, %v4155_v34  ;;  %v4180_v46 = vrot.slane %v4179_v25, 4 }
 0x511   :  { %v9418_v22 = vpop.eup %7271  ;;  %4492 = vperm.xlu0 %7209, %v4398_v28   ;;  %7289 = vrcp.f32 %v4356_v58  ;;  %v4176_v15 = vadd.f32 %v4175_v13, %v4174_v11  ;;  %v4165_v17 = vsel %vm4094_vm10, %v9412_v37, 0.0  ;;  %v9424_v5 = vmul.f32 %v9349_v4, %v9181_v52 }
 0x512   :  { %v4048_v54 = vmul.f32 1.442695, %v3873_v44  ;;  %v4355_v57 = vadd.f32 1e-10, %v4157_v21  ;;  %v4181_v32 = vadd.f32 %v4180_v46, %v4179_v25  ;;  %v4166_v9 = vrot.slane %v4165_v17, 4 }
 0x513   :  { %v4177_v6 = vrot.slane %v4176_v15, 1  ;;  %v4200_v63 = vsel %vm4094_vm10, %v9424_v5, 0.0  ;;  %v9430_v36 = vmul.f32 %v9352_v33, %v9189_v42  ;;  %v9434_v34 = vmul.f32 %v9359_v12, %v9193_v43 }
 0x514   :  { %v9436_v30 = vpop.eup %7273  ;;  %7291 = vpow2.f32 %v4048_v54  ;;  %v4182_v52 = vrot.slane %v4181_v32, 2  ;;  %v4167_v4 = vadd.f32 %v4166_v9, %v4165_v17  ;;  %v4201_v45 = vrot.slane %v4200_v63, 4 }
 0x515   :  { %v9438_v11 = vpop.eup %7275  ;;  %7293 = vrcp.f32 %v4355_v57  ;;  %v4178_v62 = vadd.f32 %v4177_v6, %v4176_v15  ;;  %v4186_v48 = vsel %vm4094_vm10, %v9430_v36, 0.0  ;;  %v4193_v42 = vsel %vm4094_vm10, %v9434_v34, 0.0 }
 0x516   :  { %v7278_v33 = vpop.eup %7277  ;;  %v4183_v31 = vadd.f32 %v4182_v52, %v4181_v32  ;;  %v4168_v43 = vrot.slane %v4167_v4, 2  ;;  %v4202_v12 = vadd.f32 %v4201_v45, %v4200_v63  ;;  %v4187_v25 = vrot.slane %v4186_v48, 4 }
 0x517   :  { %v4394_v28 = vmul.f32 %v7278_v33, %v9331_v27  ;;  %v4358_v10 = vadd.f32 1e-10, %v4178_v62  ;;  %v4194_v58 = vrot.slane %v4193_v42, 4  ;;  %v9447_v13 = vmul.f32 %v9362_v38, %v9203_v29 }
 0x518   :  { %v9449_v44 = vpop.eup %7279  ;;  %v4184_v21 = vrot.slane %v4183_v31, 1  ;;  %v4169_v46 = vadd.f32 %v4168_v43, %v4167_v4  ;;  %v4203_v15 = vrot.slane %v4202_v12, 2  ;;  %v4188_v17 = vadd.f32 %v4187_v25, %v4186_v48 }
 0x519   :  { %v9451_v54 = vpop.eup %7281  ;;  %4482 = vperm.xlu1 %7210, %v4394_v28   ;;  %7295 = vrcp.f32 %v4358_v10  ;;  %v4195_v57 = vadd.f32 %v4194_v58, %v4193_v42  ;;  %v4214_v27 = vsel %vm4094_vm10, %v9447_v13, 0.0  ;;  %v9457_v32 = vmul.f32 %v9374_v2, %v9210_v18 }
 0x51a   :  { %v7284_v29 = vpop.eup %7283  ;;  %v4185_v38 = vadd.f32 %v4184_v21, %v4183_v31  ;;  %v4170_v9 = vrot.slane %v4169_v46, 1  ;;  %v4204_v6 = vadd.f32 %v4203_v15, %v4202_v12  ;;  %v4189_v63 = vrot.slane %v4188_v17, 2 }
 0x51b   :  { %v4396_v52 = vmul.f32 %v7284_v29, %v9337_v1  ;;  %v4196_v4 = vrot.slane %v4195_v57, 2  ;;  %v4215_v45 = vrot.slane %v4214_v27, 4  ;;  %v4207_v62 = vsel %vm4094_vm10, %v9457_v32, 0.0 }
 0x51c   :  { %v9462_v48 = vpop.eup %7285  ;;  %v4359_v42 = vadd.f32 1e-10, %v4185_v38  ;;  %v4171_v33 = vadd.f32 %v4170_v9, %v4169_v46  ;;  %v4205_v43 = vrot.slane %v4204_v6, 1  ;;  %v4190_v25 = vadd.f32 %v4189_v63, %v4188_v17 }
 0x51d   :  { %v9464_v18 = vpop.eup %7287  ;;  %4487 = vperm.xlu0 %7209, %v4396_v52   ;;  %v4197_v2 = vadd.f32 %v4196_v4, %v4195_v57  ;;  %v4216_v31 = vadd.f32 %v4215_v45, %v4214_v27  ;;  %v4208_v12 = vrot.slane %v4207_v62, 4  ;;  %v9468_v1 = vmul.f32 %v9377_v55, %v9214_v8 }
 0x51e   :  { %v7290_v28 = vpop.eup %7289  ;;  %7297 = vrcp.f32 %v4359_v42  ;;  %v4357_v10 = vadd.f32 1e-10, %v4171_v33  ;;  %v4206_v58 = vadd.f32 %v4205_v43, %v4204_v6  ;;  %v4191_v21 = vrot.slane %v4190_v25, 1 }
 0x51f   :  { %v4402_v15 = vmul.f32 %v7290_v28, %v9355_v56  ;;  %v4198_v46 = vrot.slane %v4197_v2, 1  ;;  %v4217_v29 = vrot.slane %v4216_v31, 2  ;;  %v4209_v17 = vadd.f32 %v4208_v12, %v4207_v62 }
 0x520   :  { %7299 = vrcp.f32 %v4357_v10  ;;  %v4362_v38 = vadd.f32 1e-10, %v4206_v58  ;;  %v4192_v9 = vadd.f32 %v4191_v21, %v4190_v25  ;;  %v4228_v57 = vsel %vm4094_vm10, %v9468_v1, 0.0 }
 0x521   :  { %v9473_v27 = vpop.eup %7291  ;;  %4502 = vperm.xlu1 %7210, %v4402_v15   ;;  %v4199_v8 = vadd.f32 %v4198_v46, %v4197_v2  ;;  %v4218_v55 = vadd.f32 %v4217_v29, %v4216_v31  ;;  %v4210_v63 = vrot.slane %v4209_v17, 2  ;;  %v4229_v52 = vrot.slane %v4228_v57, 4 }
 0x522   :  { %v7294_v6 = vpop.eup %7293  ;;  %7301 = vrcp.f32 %v4362_v38  ;;  %v4360_v4 = vadd.f32 1e-10, %v4192_v9  ;;  %v9477_v56 = vmul.f32 %v9392_v23, %v9228_v49  ;;  %v9481_v45 = vmul.f32 %v9395_v24, %v9232_v40  ;;  %v4925_v49 = vld [vmem:[%s9970_s12 + $0x10] sm:$0xff] }
 0x523   :  { %v4400_v62 = vmul.f32 %v7294_v6, %v9368_v51  ;;  %v4361_v42 = vadd.f32 1e-10, %v4199_v8  ;;  %v4219_v33 = vrot.slane %v4218_v55, 1  ;;  %v4211_v43 = vadd.f32 %v4210_v63, %v4209_v17  ;;  %7102 = vmatpush3.msra.mxu1 %v4925_v49 }
 0x524   :  { %7303 = vrcp.f32 %v4360_v4  ;;  %v4230_v25 = vadd.f32 %v4229_v52, %v4228_v57  ;;  %v4235_v2 = vsel %vm4094_vm10, %v9477_v56, 0.0  ;;  %v4221_v31 = vsel %vm4094_vm10, %v9481_v45, 0.0  ;;  %7103 = vmatprep.subr.mxu1 %v10089_v0 }
 0x525   :  { %4497 = vperm.xlu0 %7209, %v4400_v62   ;;  %7305 = vrcp.f32 %v4361_v42  ;;  %v4220_v40 = vadd.f32 %v4219_v33, %v4218_v55  ;;  %v4212_v23 = vrot.slane %v4211_v43, 1  ;;  %v4236_v51 = vrot.slane %v4235_v2, 4 }
 0x526   :  { %v7296_v24 = vpop.eup %7295  ;;  %v4231_v12 = vrot.slane %v4230_v25, 2  ;;  %v4222_v28 = vrot.slane %v4221_v31, 4  ;;  %v9493_v10 = vmul.f32 %v9402_v20, %v9236_v16  ;;  %v9497_v58 = vmul.f32 %v9406_v35, %v9246_v7 }
 0x527   :  { %v4406_v21 = vmul.f32 %v7296_v24, %v9381_v41  ;;  %v4364_v15 = vadd.f32 1e-10, %v4220_v40  ;;  %v4213_v46 = vadd.f32 %v4212_v23, %v4211_v43  ;;  %v4237_v29 = vadd.f32 %v4236_v51, %v4235_v2 }
 0x528   :  { %v4232_v17 = vadd.f32 %v4231_v12, %v4230_v25  ;;  %v4223_v38 = vadd.f32 %v4222_v28, %v4221_v31  ;;  %v4256_v9 = vsel %vm4094_vm10, %v9493_v10, 0.0  ;;  %v4242_v16 = vsel %vm4094_vm10, %v9497_v58, 0.0 }
 0x529   :  { %4512 = vperm.xlu1 %7210, %v4406_v21   ;;  %7307 = vrcp.f32 %v4364_v15  ;;  %v4363_v20 = vadd.f32 1e-10, %v4213_v46  ;;  %v4238_v7 = vrot.slane %v4237_v29, 2  ;;  %v4257_v35 = vrot.slane %v4256_v9, 4 }
 0x52a   :  { %v4233_v57 = vrot.slane %v4232_v17, 1  ;;  %v4224_v8 = vrot.slane %v4223_v38, 2  ;;  %v4243_v55 = vrot.slane %v4242_v16, 4  ;;  %v9507_v41 = vmul.f32 %v9415_v47, %v9250_v3 }
 0x52b   :  { %v7298_v63 = vpop.eup %7297  ;;  %7309 = vrcp.f32 %v4363_v20  ;;  %v4239_v52 = vadd.f32 %v4238_v7, %v4237_v29  ;;  %v4258_v6 = vadd.f32 %v4257_v35, %v4256_v9  ;;  %v9511_v4 = vmul.f32 %v9418_v22, %v9258_v14 }
 0x52c   :  { %v4408_v62 = vmul.f32 %v7298_v63, %v9385_v26  ;;  %v4234_v42 = vadd.f32 %v4233_v57, %v4232_v17  ;;  %v4225_v33 = vadd.f32 %v4224_v8, %v4223_v38  ;;  %v4244_v43 = vadd.f32 %v4243_v55, %v4242_v16 }
 0x52d   :  { %v7300_v25 = vpop.eup %7299  ;;  %v4240_v2 = vrot.slane %v4239_v52, 1  ;;  %v4259_v31 = vrot.slane %v4258_v6, 2  ;;  %v4249_v3 = vsel %vm4094_vm10, %v9507_v41, 0.0  ;;  %v4270_v47 = vsel %vm4094_vm10, %v9511_v4, 0.0 }
 0x52e   :  { %4517 = vperm.xlu0 %7209, %v4408_v62   ;;  %v4404_v49 = vmul.f32 %v7300_v25, %v9412_v37  ;;  %v4366_v40 = vadd.f32 1e-10, %v4234_v42  ;;  %v4226_v14 = vrot.slane %v4225_v33, 1  ;;  %v4245_v22 = vrot.slane %v4244_v43, 2 }
 0x52f   :  { %v7302_v23 = vpop.eup %7301  ;;  %v4241_v26 = vadd.f32 %v4240_v2, %v4239_v52  ;;  %v4260_v51 = vadd.f32 %v4259_v31, %v4258_v6  ;;  %v4250_v24 = vrot.slane %v4249_v3, 4  ;;  %v4271_v12 = vrot.slane %v4270_v47, 4 }
 0x530   :  { %4507 = vperm.xlu1 %7210, %v4404_v49   ;;  %v4414_v28 = vmul.f32 %v7302_v23, %v9424_v5  ;;  %7311 = vrcp.f32 %v4366_v40  ;;  %v4227_v21 = vadd.f32 %v4226_v14, %v4225_v33  ;;  %v4246_v15 = vadd.f32 %v4245_v22, %v4244_v43 }
 0x531   :  { %v7304_v46 = vpop.eup %7303  ;;  %v4367_v29 = vadd.f32 1e-10, %v4241_v26  ;;  %v4261_v17 = vrot.slane %v4260_v51, 1  ;;  %v4251_v38 = vadd.f32 %v4250_v24, %v4249_v3  ;;  %v4272_v9 = vadd.f32 %v4271_v12, %v4270_v47 }
 0x532   :  { %v7306_v37 = vpop.eup %7305  ;;  %4532 = vperm.xlu0 %7209, %v4414_v28   ;;  %v4410_v16 = vmul.f32 %v7304_v46, %v9430_v36  ;;  %v4365_v20 = vadd.f32 1e-10, %v4227_v21  ;;  %v4247_v7 = vrot.slane %v4246_v15, 1  ;;  %v9523_v35 = vmul.f32 %v9436_v30, %v9266_v61  ;;  %v4924_v21 = vld [vmem:[%s9970_s12 + $0x8] sm:$0xff] }
 0x533   :  { %v4412_v5 = vmul.f32 %v7306_v37, %v9434_v34  ;;  %7313 = vrcp.f32 %v4367_v29  ;;  %v4262_v57 = vadd.f32 %v4261_v17, %v4260_v51  ;;  %v4252_v8 = vrot.slane %v4251_v38, 2  ;;  %7104 = vmatpush3.msra.mxu1 %v4924_v21 }
 0x534   :  { %4522 = vperm.xlu1 %7210, %v4410_v16   ;;  %7315 = vrcp.f32 %v4365_v20  ;;  %v4248_v55 = vadd.f32 %v4247_v7, %v4246_v15  ;;  %v4273_v63 = vrot.slane %v4272_v9, 2  ;;  %v4263_v52 = vsel %vm4094_vm10, %v9523_v35, 0.0  ;;  %7105 = vmatprep.subr.mxu1 %v10089_v0 }
 0x535   :  { %v4370_v6 = vadd.f32 1e-10, %v4262_v57  ;;  %v4253_v36 = vadd.f32 %v4252_v8, %v4251_v38  ;;  %v4264_v62 = vrot.slane %v4263_v52, 4  ;;  %v9530_v42 = vmul.f32 %v9438_v11, %v9271_v50 }
 0x536   :  { %v7308_v61 = vpop.eup %7307  ;;  %4527 = vperm.xlu0 %7209, %v4412_v5   ;;  %v4368_v34 = vadd.f32 1e-10, %v4248_v55  ;;  %v4274_v30 = vadd.f32 %v4273_v63, %v4272_v9  ;;  %v9534_v33 = vmul.f32 %v9449_v44, %v9274_v19  ;;  %v9538_v43 = vmul.f32 %v9451_v54, %v9285_v59 }
 0x537   :  { %v4418_v25 = vmul.f32 %v7308_v61, %v9447_v13  ;;  %7317 = vrcp.f32 %v4370_v6  ;;  %v4254_v2 = vrot.slane %v4253_v36, 1  ;;  %v4265_v31 = vadd.f32 %v4264_v62, %v4263_v52 }
 0x538   :  { %v7310_v3 = vpop.eup %7309  ;;  %7319 = vrcp.f32 %v4368_v34  ;;  %v4275_v50 = vrot.slane %v4274_v30, 1  ;;  %v4284_v11 = vsel %vm4094_vm10, %v9530_v42, 0.0  ;;  %v4291_v47 = vsel %vm4094_vm10, %v9534_v33, 0.0 }
 0x539   :  { %4542 = vperm.xlu1 %7210, %v4418_v25   ;;  %v4416_v19 = vmul.f32 %v7310_v3, %v9457_v32  ;;  %v4255_v44 = vadd.f32 %v4254_v2, %v4253_v36  ;;  %v4266_v59 = vrot.slane %v4265_v31, 2  ;;  %v4285_v54 = vrot.slane %v4284_v11, 4 }
 0x53a   :  { %v4276_v49 = vadd.f32 %v4275_v50, %v4274_v30  ;;  %v4292_v13 = vrot.slane %v4291_v47, 4  ;;  %v4277_v40 = vsel %vm4094_vm10, %v9538_v43, 0.0  ;;  %v9550_v14 = vmul.f32 %v9462_v48, %v9289_v39 }
 0x53b   :  { %4537 = vperm.xlu0 %7209, %v4416_v19   ;;  %v4369_v22 = vadd.f32 1e-10, %v4255_v44  ;;  %v4267_v23 = vadd.f32 %v4266_v59, %v4265_v31  ;;  %v4286_v26 = vadd.f32 %v4285_v54, %v4284_v11  ;;  %v4278_v51 = vrot.slane %v4277_v40, 4 }
 0x53c   :  { %v4372_v24 = vadd.f32 1e-10, %v4276_v49  ;;  %v4293_v12 = vadd.f32 %v4292_v13, %v4291_v47  ;;  %v4305_v32 = vsel %vm4094_vm10, %v9550_v14, 0.0  ;;  %v9556_v28 = vmul.f32 %v9464_v18, %v9295_v53  ;;  %v4923_v53 = vld [vmem:[%s9970_s12] sm:$0xff] }
 0x53d   :  { %v7312_v39 = vpop.eup %7311  ;;  %7321 = vrcp.f32 %v4369_v22  ;;  %v4268_v48 = vrot.slane %v4267_v23, 1  ;;  %v4287_v15 = vrot.slane %v4286_v26, 2  ;;  %v4279_v46 = vadd.f32 %v4278_v51, %v4277_v40  ;;  %7106 = vmatpush3.msra.mxu1 %v4923_v53 }
 0x53e   :  { %v4422_v29 = vmul.f32 %v7312_v39, %v9468_v1  ;;  %7323 = vrcp.f32 %v4372_v24  ;;  %v4294_v17 = vrot.slane %v4293_v12, 2  ;;  %v4306_v38 = vrot.slane %v4305_v32, 4  ;;  %7150 = vmatprep.subr.mxu1 %v10089_v0 }
 0x53f   :  { %v4269_v18 = vadd.f32 %v4268_v48, %v4267_v23  ;;  %v4288_v9 = vadd.f32 %v4287_v15, %v4286_v26  ;;  %v4280_v37 = vrot.slane %v4279_v46, 2  ;;  %v4298_v16 = vsel %vm4094_vm10, %v9556_v28, 0.0 }
 0x540   :  { %v7314_v20 = vpop.eup %7313  ;;  %4552 = vperm.xlu1 %7210, %v4422_v29   ;;  %v4295_v7 = vadd.f32 %v4294_v17, %v4293_v12  ;;  %v4307_v1 = vadd.f32 %v4306_v38, %v4305_v32  ;;  %v4299_v5 = vrot.slane %v4298_v16, 4  ;;  %v9570_v57 = vmul.f32 %v9473_v27, %v9302_v60 }
 0x541   :  { %v7316_v8 = vpop.eup %7315  ;;  %v4424_v55 = vmul.f32 %v7314_v20, %v9477_v56  ;;  %v4371_v63 = vadd.f32 1e-10, %v4269_v18  ;;  %v4289_v52 = vrot.slane %v4288_v9, 1  ;;  %v4281_v6 = vadd.f32 %v4280_v37, %v4279_v46  ;;  %v7095_v20 = vpop.f32.mrf.mxu0 }
 0x542   :  { %v4420_v36 = vmul.f32 %v7316_v8, %v9481_v45  ;;  %v4296_v62 = vrot.slane %v4295_v7, 1  ;;  %v4308_v61 = vrot.slane %v4307_v1, 2  ;;  %v4300_v34 = vadd.f32 %v4299_v5, %v4298_v16 }
 0x543   :  { %4557 = vperm.xlu0 %7209, %v4424_v55   ;;  %7325 = vrcp.f32 %v4371_v63  ;;  %v4290_v30 = vadd.f32 %v4289_v52, %v4288_v9  ;;  %v4282_v25 = vrot.slane %v4281_v6, 1  ;;  %v4312_v60 = vsel %vm4094_vm10, %v9570_v57, 0.0  ;;  %v3586_v5 = vpop.f32.mrf.mxu0 }
 0x544   :  { %v7318_v27 = vpop.eup %7317  ;;  %4547 = vperm.xlu1 %7210, %v4420_v36   ;;  %v4297_v2 = vadd.f32 %v4296_v62, %v4295_v7  ;;  %v4309_v31 = vadd.f32 %v4308_v61, %v4307_v1  ;;  %v4301_v56 = vrot.slane %v4300_v34, 2  ;;  %v4313_v3 = vrot.slane %v4312_v60, 4  ;;  %v7033_v1 = vpop.f32.mrf.mxu1 }
 0x545   :  { %v7320_v50 = vpop.eup %7319  ;;  %v4430_v11 = vmul.f32 %v7318_v27, %v9493_v10  ;;  %v4374_v45 = vadd.f32 1e-10, %v4290_v30  ;;  %v4283_v47 = vadd.f32 %v4282_v25, %v4281_v6  ;;  %v7098_v8 = vpop.f32.mrf.mxu0  ;;  %v7372_v25 = vld [vmem:[%s10087_s17] ss:$0 sm:$0xff] }
 0x546   :  { %v4426_v19 = vmul.f32 %v7320_v50, %v9497_v58  ;;  %v4375_v44 = vadd.f32 1e-10, %v4297_v2  ;;  %v4310_v59 = vrot.slane %v4309_v31, 1  ;;  %v4302_v54 = vadd.f32 %v4301_v56, %v4300_v34 }
 0x547   :  { %4572 = vperm.xlu0 %7209, %v4430_v11   ;;  %7327 = vrcp.f32 %v4374_v45  ;;  %v4373_v49 = vadd.f32 1e-10, %v4283_v47  ;;  %v4314_v13 = vadd.f32 %v4313_v3, %v4312_v60  ;;  %v3596_v63 = vpop.f32.mrf.mxu0  ;;  %v3592_v34 = vadd.f32 %v7095_v20, %v7033_v1  ;;  %v10090_v47 = vld [vmem:[#allocation8_spill] sm:$0xff] }
 0x548   :  { %4562 = vperm.xlu1 %7210, %v4426_v19   ;;  %7329 = vrcp.f32 %v4375_v44  ;;  %v4311_v40 = vadd.f32 %v4310_v59, %v4309_v31  ;;  %v4303_v22 = vrot.slane %v4302_v54, 1  ;;  %v10091_v59 = vld [vmem:[#allocation7_spill] sm:$0xff] }
 0x549   :  { %7331 = vrcp.f32 %v4373_v49  ;;  %v4315_v23 = vrot.slane %v4314_v13, 2 }
 0x54a   :  { %v7322_v26 = vpop.eup %7321  ;;  %v4377_v51 = vadd.f32 1e-10, %v4311_v40  ;;  %v4304_v10 = vadd.f32 %v4303_v22, %v4302_v54 }
 0x54b   :  { %v7324_v24 = vpop.eup %7323  ;;  %v4428_v12 = vmul.f32 %v7322_v26, %v9507_v41  ;;  %v4316_v58 = vadd.f32 %v4315_v23, %v4314_v13 }
 0x54c   :  { %v4434_v32 = vmul.f32 %v7324_v24, %v9511_v4  ;;  %7333 = vrcp.f32 %v4377_v51  ;;  %v4376_v21 = vadd.f32 1e-10, %v4304_v10  ;;  %v10092_v51 = vld [vmem:[#allocation10_spill] sm:$0xff] }
 0x54d   :  { %4567 = vperm.xlu0 %7209, %v4428_v12   ;;  %v4317_v39 = vrot.slane %v4316_v58, 1 }
 0x54e   :  { %4582 = vperm.xlu1 %7210, %v4434_v32   ;;  %7335 = vrcp.f32 %v4376_v21 }
 0x54f   :  { %v4318_v48 = vadd.f32 %v4317_v39, %v4316_v58 }
 0x550   :  { %v7326_v15 = vpop.eup %7325 }
 0x551   :  { %v4432_v46 = vmul.f32 %v7326_v15, %v9523_v35  ;;  %v4378_v29 = vadd.f32 1e-10, %v4318_v48  ;;  %v10093_v48 = vld [vmem:[#allocation11_spill] sm:$0xff] }
 0x553   :  { %4577 = vperm.xlu0 %7209, %v4432_v46   ;;  %7337 = vrcp.f32 %v4378_v29  ;;  %v10094_v46 = vld [vmem:[#allocation9_spill] sm:$0xff] }
 0x554   :  { %v7328_v41 = vpop.eup %7327 }
 0x555   :  { %v7330_v17 = vpop.eup %7329  ;;  %v4438_v38 = vmul.f32 %v7328_v41, %v9530_v42 }
 0x556   :  { %v7332_v53 = vpop.eup %7331  ;;  %v4440_v4 = vmul.f32 %v7330_v17, %v9534_v33  ;;  %v3233_v33 = vpop.f32.mrf.mxu1 }
 0x557   :  { %4592 = vperm.xlu1 %7210, %v4438_v38   ;;  %v4436_v18 = vmul.f32 %v7332_v53, %v9538_v43  ;;  %v3587_v55 = vadd.f32 %v3586_v5, %v3233_v33 }
 0x558   :  { %4597 = vperm.xlu0 %7209, %v4440_v4   ;;  %v7036_v43 = vpop.f32.mrf.mxu1 }
 0x559   :  { %v7334_v9 = vpop.eup %7333  ;;  %v3602_v62 = vadd.f32 %v7098_v8, %v7036_v43 }
 0x55a   :  { %v4444_v37 = vmul.f32 %v7334_v9, %v9550_v14  ;;  %v3243_v52 = vpop.f32.mrf.mxu1  ;;  %v7371_v14 = vld [vmem:[%s10086_s0] ss:$0 sm:$0xff] }
 0x55b   :  { %v7336_v16 = vpop.eup %7335  ;;  %4587 = vperm.xlu1 %7210, %v4436_v18   ;;  %v3644_v6 = vadd.f32 %v7371_v14, %v3587_v55  ;;  %v3647_v30 = vadd.f32 %v7371_v14, %v3602_v62  ;;  %v3645_v27 = vadd.f32 %v7371_v14, %v3592_v34 }
 0x55c   :  { %4607 = vperm.xlu0 %7209, %v4444_v37   ;;  %v4442_v35 = vmul.f32 %v7336_v16, %v9556_v28  ;;  %v3597_v28 = vadd.f32 %v3596_v63, %v3243_v52  ;;  %v10095_v37 = vld [vmem:[#allocation14_spill] sm:$0xff] }
 0x55d   :  { %v3680_v36 = vmax.f32 %v3644_v6, 0.0  ;;  %v3683_v2 = vmax.f32 %v3647_v30, 0.0  ;;  %v3681_v50 = vmax.f32 %v3645_v27, 0.0 }
 0x55e   :  { %v3646_v61 = vadd.f32 %v7371_v14, %v3597_v28  ;;  %v10096_v28 = vld [vmem:[#allocation12_spill] sm:$0xff] }
 0x55f   :  { %4602 = vperm.xlu1 %7210, %v4442_v35   ;;  %v3723_v60 = vmul.f32 %v7372_v25, %v3680_v36  ;;  %v3726_v45 = vmul.f32 %v7372_v25, %v3683_v2  ;;  %v3724_v13 = vmul.f32 %v7372_v25, %v3681_v50 }
 0x560   :  { %v7338_v7 = vpop.eup %7337 }
 0x561   :  { %v4446_v42 = vmul.f32 %v7338_v7, %v9570_v57  ;;  %v3682_v57 = vmax.f32 %v3646_v61, 0.0  ;;  %v3823_v31 = vsel %vm1741_vm1, %v3723_v60, 0.0  ;;  %v3832_v49 = vsel %vm1741_vm1, %v3726_v45, 0.0 }
 0x562   :  { %v3826_v24 = vsel %vm1741_vm1, %v3724_v13, 0.0 }
 0x563   :  { %4612 = vperm.xlu1 %7210, %v4446_v42   ;;  %v3725_v56 = vmul.f32 %v7372_v25, %v3682_v57 }
 0x565   :  { %v3829_v11 = vsel %vm1741_vm1, %v3725_v56, 0.0 }
 0x57b   :  { %3824 = vadd.xlane.f32.xlu0 %v3823_v31  ;;  %v10097_v31 = vld [vmem:[#allocation13_spill] sm:$0xff] }
 0x57c   :  { %v4463_v3 = vpop.permute.xlu0 %4462 }
 0x57d   :  { %v4636_v19 = vmul.f32 %v4463_v3, %v10090_v47 }
 0x57f   :  { %3830 = vadd.xlane.f32.xlu0 %v3829_v11  ;;  %v4678_v22 = vsel %vm1741_vm1, %v4636_v19, 0.0 }
 0x580   :  { %v4458_v44 = vpop.permute.xlu1 %4457  ;;  %v4679_v12 = vrot.slane %v4678_v22, 4 }
 0x581   :  { %v4635_v54 = vmul.f32 %v4458_v44, %v10091_v59 }
 0x582   :  { %v4680_v41 = vadd.f32 %v4679_v12, %v4678_v22 }
 0x583   :  { %3833 = vadd.xlane.f32.xlu0 %v3832_v49  ;;  %v4671_v40 = vsel %vm1741_vm1, %v4635_v54, 0.0 }
 0x584   :  { %v4473_v23 = vpop.permute.xlu1 %4472  ;;  %v4672_v26 = vrot.slane %v4671_v40, 4  ;;  %v4681_v20 = vrot.slane %v4680_v41, 2 }
 0x585   :  { %v4638_v10 = vmul.f32 %v4473_v23, %v10092_v51 }
 0x586   :  { %v4673_v21 = vadd.f32 %v4672_v26, %v4671_v40  ;;  %v4682_v43 = vadd.f32 %v4681_v20, %v4680_v41  ;;  %v10098_v40 = vld [vmem:[#allocation16_spill] sm:$0xff] }
 0x587   :  { %3827 = vadd.xlane.f32.xlu1 %v3826_v24  ;;  %v4692_v58 = vsel %vm1741_vm1, %v4638_v10, 0.0 }
 0x588   :  { %v4478_v32 = vpop.permute.xlu0 %4477  ;;  %v4693_v17 = vrot.slane %v4692_v58, 4  ;;  %v4674_v18 = vrot.slane %v4673_v21, 2  ;;  %v4683_v34 = vrot.slane %v4682_v43, 1 }
 0x589   :  { %v4468_v39 = vpop.permute.xlu1 %4467  ;;  %v4639_v15 = vmul.f32 %v4478_v32, %v10093_v48 }
 0x58a   :  { %v4637_v29 = vmul.f32 %v4468_v39, %v10094_v46  ;;  %v4694_v7 = vadd.f32 %v4693_v17, %v4692_v58  ;;  %v4675_v5 = vadd.f32 %v4674_v18, %v4673_v21  ;;  %v4684_v45 = vadd.f32 %v4683_v34, %v4682_v43  ;;  %v10102_v34 = vld [vmem:[#allocation17_spill] sm:$0xff] }
 0x58b   :  { %v4699_v38 = vsel %vm1741_vm1, %v4639_v15, 0.0  ;;  %v10099_v15 = vld [vmem:[#allocation15_spill] sm:$0xff] }
 0x58c   :  { %v4685_v53 = vsel %vm1741_vm1, %v4637_v29, 0.0  ;;  %v4493_v4 = vpop.permute.xlu0 %4492  ;;  %v4700_v35 = vrot.slane %v4699_v38, 4  ;;  %v4695_v55 = vrot.slane %v4694_v7, 2  ;;  %v4676_v6 = vrot.slane %v4675_v5, 1 }
 0x58d   :  { %v4686_v9 = vrot.slane %v4685_v53, 4  ;;  %v4642_v16 = vmul.f32 %v4493_v4, %v10095_v37 }
 0x58e   :  { %v4701_v8 = vadd.f32 %v4700_v35, %v4699_v38  ;;  %v4696_v30 = vadd.f32 %v4695_v55, %v4694_v7  ;;  %v4677_v2 = vadd.f32 %v4676_v6, %v4675_v5  ;;  %v10100_v35 = vld [vmem:[#allocation18_spill] sm:$0xff] }
 0x58f   :  { %v4687_v1 = vadd.f32 %v4686_v9, %v4685_v53  ;;  %v4720_v42 = vsel %vm1741_vm1, %v4642_v16, 0.0 }
 0x590   :  { %v4721_v52 = vrot.slane %v4720_v42, 4  ;;  %v4702_v61 = vrot.slane %v4701_v8, 2  ;;  %v4697_v47 = vrot.slane %v4696_v30, 1  ;;  %v4971_v13 = vsel %vm4970_vm14, %v4684_v45, %v4677_v2 }
 0x591   :  { %v4688_v33 = vrot.slane %v4687_v1, 2 }
 0x592   :  { %v4722_v25 = vadd.f32 %v4721_v52, %v4720_v42  ;;  %v4703_v50 = vadd.f32 %v4702_v61, %v4701_v8  ;;  %v4698_v24 = vadd.f32 %v4697_v47, %v4696_v30 }
 0x593   :  { %v4689_v63 = vadd.f32 %v4688_v33, %v4687_v1 }
 0x594   :  { %v4483_v14 = vpop.permute.xlu1 %4482  ;;  %v4723_v19 = vrot.slane %v4722_v25, 2  ;;  %v4704_v26 = vrot.slane %v4703_v50, 1 }
 0x595   :  { %v4640_v36 = vmul.f32 %v4483_v14, %v10096_v28  ;;  %v4690_v62 = vrot.slane %v4689_v63, 1  ;;  %v10101_v28 = vld [vmem:[#allocation19_spill] sm:$0xff] }
 0x596   :  { %v4724_v12 = vadd.f32 %v4723_v19, %v4722_v25  ;;  %v4705_v29 = vadd.f32 %v4704_v26, %v4703_v50  ;;  %v10104_v19 = vld [vmem:[#allocation20_spill] sm:$0xff] }
 0x597   :  { %v4706_v57 = vsel %vm1741_vm1, %v4640_v36, 0.0  ;;  %v4691_v3 = vadd.f32 %v4690_v62, %v4689_v63 }
 0x598   :  { %v4707_v60 = vrot.slane %v4706_v57, 4  ;;  %v4488_v27 = vpop.permute.xlu0 %4487  ;;  %v4725_v38 = vrot.slane %v4724_v12, 1 }
 0x599   :  { %v4641_v56 = vmul.f32 %v4488_v27, %v10097_v31  ;;  %v4973_v23 = vsel %vm4972_vm15, %v4691_v3, %v4971_v13 }
 0x59a   :  { %v4708_v11 = vadd.f32 %v4707_v60, %v4706_v57  ;;  %v4975_v39 = vsel %vm4974_vm0, %v4698_v24, %v4973_v23  ;;  %v4726_v5 = vadd.f32 %v4725_v38, %v4724_v12  ;;  %v10106_v38 = vld [vmem:[#allocation24_spill] sm:$0xff] }
 0x59b   :  { %v4713_v44 = vsel %vm1741_vm1, %v4641_v56, 0.0  ;;  %v4977_v4 = vsel %vm4976_vm2, %v4705_v29, %v4975_v39  ;;  %v10103_v56 = vld [vmem:[#allocation22_spill] sm:$0xff] }
 0x59c   :  { %v4709_v59 = vrot.slane %v4708_v11, 2  ;;  %v4503_v54 = vpop.permute.xlu1 %4502  ;;  %v4714_v49 = vrot.slane %v4713_v44, 4 }
 0x59d   :  { %v4644_v22 = vmul.f32 %v4503_v54, %v10098_v40 }
 0x59e   :  { %v4710_v51 = vadd.f32 %v4709_v59, %v4708_v11  ;;  %v4715_v10 = vadd.f32 %v4714_v49, %v4713_v44 }
 0x59f   :  { %v4734_v48 = vsel %vm1741_vm1, %v4644_v22, 0.0 }
 0x5a0   :  { %v4711_v58 = vrot.slane %v4710_v51, 1  ;;  %v4716_v32 = vrot.slane %v4715_v10, 2  ;;  %v4498_v21 = vpop.permute.xlu0 %4497  ;;  %v4735_v18 = vrot.slane %v4734_v48, 4 }
 0x5a1   :  { %v4643_v46 = vmul.f32 %v4498_v21, %v10099_v15 }
 0x5a2   :  { %v4717_v41 = vadd.f32 %v4716_v32, %v4715_v10  ;;  %v4712_v17 = vadd.f32 %v4711_v58, %v4710_v51  ;;  %v4736_v8 = vadd.f32 %v4735_v18, %v4734_v48  ;;  %v10105_v51 = vld [vmem:[#allocation21_spill] sm:$0xff] }
 0x5a3   :  { %v4727_v53 = vsel %vm1741_vm1, %v4643_v46, 0.0 }
 0x5a4   :  { %v4718_v9 = vrot.slane %v4717_v41, 1  ;;  %v4513_v37 = vpop.permute.xlu1 %4512  ;;  %v4728_v16 = vrot.slane %v4727_v53, 4  ;;  %v4979_v42 = vsel %vm4978_vm3, %v4712_v17, %v4977_v4  ;;  %v4737_v61 = vrot.slane %v4736_v8, 2 }
 0x5a5   :  { %v4646_v20 = vmul.f32 %v4513_v37, %v10100_v35 }
 0x5a6   :  { %v4719_v7 = vadd.f32 %v4718_v9, %v4717_v41  ;;  %v4729_v1 = vadd.f32 %v4728_v16, %v4727_v53  ;;  %v4738_v47 = vadd.f32 %v4737_v61, %v4736_v8 }
 0x5a7   :  { %v4748_v33 = vsel %vm1741_vm1, %v4646_v20, 0.0 }
 0x5a8   :  { %v4981_v43 = vsel %vm4980_vm4, %v4719_v7, %v4979_v42  ;;  %v4749_v55 = vrot.slane %v4748_v33, 4  ;;  %v4730_v6 = vrot.slane %v4729_v1, 2  ;;  %v4739_v21 = vrot.slane %v4738_v47, 1 }
 0x5a9   :  { %v4518_v63 = vpop.permute.xlu0 %4517  ;;  %v4983_v52 = vsel %vm4982_vm5, %v4726_v5, %v4981_v43 }
 0x5aa   :  { %v4750_v14 = vadd.f32 %v4749_v55, %v4748_v33  ;;  %v4647_v36 = vmul.f32 %v4518_v63, %v10101_v28  ;;  %7108 = vmatmul.mubr.msk.f32.vlgmr.msra.gmra.mxu1 %vm1741_vm1, %v4983_v52  ;;  %v4731_v2 = vadd.f32 %v4730_v6, %v4729_v1  ;;  %v4740_v35 = vadd.f32 %v4739_v21, %v4738_v47  ;;  %v10107_v1 = vld [vmem:[#allocation23_spill] sm:$0xff] }
 0x5ab   :  { %v4508_v62 = vpop.permute.xlu1 %4507  ;;  %7110 = vmatprep.mubr.msk.f32.mxu1 %vm7398_vm13, %v10089_v0 }
 0x5ac   :  { %v4645_v30 = vmul.f32 %v4508_v62, %v10102_v34  ;;  %v4755_v57 = vsel %vm1741_vm1, %v4647_v36, 0.0  ;;  %v4751_v27 = vrot.slane %v4750_v14, 2  ;;  %v4732_v23 = vrot.slane %v4731_v2, 1 }
 0x5ad   :  { %v4756_v25 = vrot.slane %v4755_v57, 4  ;;  %v4533_v60 = vpop.permute.xlu0 %4532 }
 0x5ae   :  { %v4741_v31 = vsel %vm1741_vm1, %v4645_v30, 0.0  ;;  %v4650_v3 = vmul.f32 %v4533_v60, %v10103_v56  ;;  %v4752_v22 = vadd.f32 %v4751_v27, %v4750_v14  ;;  %v4733_v17 = vadd.f32 %v4732_v23, %v4731_v2 }
 0x5af   :  { %v4742_v50 = vrot.slane %v4741_v31, 4  ;;  %v4757_v11 = vadd.f32 %v4756_v25, %v4755_v57  ;;  %v4523_v45 = vpop.permute.xlu1 %4522  ;;  %v10108_v57 = vld [vmem:[#allocation26_spill] sm:$0xff] }
 0x5b0   :  { %v4648_v44 = vmul.f32 %v4523_v45, %v10104_v19  ;;  %v4776_v59 = vsel %vm1741_vm1, %v4650_v3, 0.0  ;;  %v4753_v41 = vrot.slane %v4752_v22, 1  ;;  %v4984_v63 = vsel %vm4970_vm14, %v4740_v35, %v4733_v17  ;;  %v10109_v19 = vld [vmem:[#allocation27_spill] sm:$0xff]  ;;  %v10112_v17 = vld [vmem:[#allocation28_spill] sm:$0xff] }
 0x5b1   :  { %v4743_v54 = vadd.f32 %v4742_v50, %v4741_v31  ;;  %v4758_v49 = vrot.slane %v4757_v11, 2  ;;  %v4777_v13 = vrot.slane %v4776_v59, 4  ;;  %v4528_v40 = vpop.permute.xlu0 %4527 }
 0x5b2   :  { %v4762_v26 = vsel %vm1741_vm1, %v4648_v44, 0.0  ;;  %v4649_v10 = vmul.f32 %v4528_v40, %v10105_v51  ;;  %v4754_v55 = vadd.f32 %v4753_v41, %v4752_v22 }
 0x5b3   :  { %v4744_v24 = vrot.slane %v4743_v54, 2  ;;  %v4759_v12 = vadd.f32 %v4758_v49, %v4757_v11  ;;  %v4763_v58 = vrot.slane %v4762_v26, 4  ;;  %v4778_v32 = vadd.f32 %v4777_v13, %v4776_v59  ;;  %v10110_v13 = vld [vmem:[#allocation25_spill] sm:$0xff] }
 0x5b4   :  { %v4543_v39 = vpop.permute.xlu1 %4542  ;;  %v4769_v48 = vsel %vm1741_vm1, %v4649_v10, 0.0 }
 0x5b5   :  { %v4745_v15 = vadd.f32 %v4744_v24, %v4743_v54  ;;  %v4764_v46 = vadd.f32 %v4763_v58, %v4762_v26  ;;  %v4779_v29 = vrot.slane %v4778_v32, 2  ;;  %v4652_v53 = vmul.f32 %v4543_v39, %v10106_v38 }
 0x5b6   :  { %v4770_v4 = vrot.slane %v4769_v48, 4  ;;  %v4538_v18 = vpop.permute.xlu0 %4537  ;;  %v4760_v37 = vrot.slane %v4759_v12, 1 }
 0x5b7   :  { %v4746_v9 = vrot.slane %v4745_v15, 1  ;;  %v4765_v16 = vrot.slane %v4764_v46, 2  ;;  %v4790_v20 = vsel %vm1741_vm1, %v4652_v53, 0.0  ;;  %v4651_v42 = vmul.f32 %v4538_v18, %v10107_v1 }
 0x5b8   :  { %v4771_v7 = vadd.f32 %v4770_v4, %v4769_v48  ;;  %v4780_v8 = vadd.f32 %v4779_v29, %v4778_v32  ;;  %v4791_v43 = vrot.slane %v4790_v20, 4  ;;  %v4761_v28 = vadd.f32 %v4760_v37, %v4759_v12 }
 0x5b9   :  { %v4747_v5 = vadd.f32 %v4746_v9, %v4745_v15  ;;  %v4766_v33 = vadd.f32 %v4765_v16, %v4764_v46  ;;  %v4783_v14 = vsel %vm1741_vm1, %v4651_v42, 0.0  ;;  %v10111_v15 = vld [vmem:[#allocation30_spill] sm:$0xff] }
 0x5ba   :  { %v4772_v52 = vrot.slane %v4771_v7, 2  ;;  %v4792_v62 = vadd.f32 %v4791_v43, %v4790_v20  ;;  %v4784_v60 = vrot.slane %v4783_v14, 4  ;;  %v4781_v2 = vrot.slane %v4780_v8, 1 }
 0x5bb   :  { %v4985_v6 = vsel %vm4972_vm15, %v4747_v5, %v4984_v63  ;;  %v4767_v36 = vrot.slane %v4766_v33, 1  ;;  %v4553_v61 = vpop.permute.xlu1 %4552 }
 0x5bc   :  { %v4986_v34 = vsel %vm4974_vm0, %v4754_v55, %v4985_v6  ;;  %v4773_v30 = vadd.f32 %v4772_v52, %v4771_v7  ;;  %v4654_v25 = vmul.f32 %v4553_v61, %v10108_v57  ;;  %v4785_v50 = vadd.f32 %v4784_v60, %v4783_v14  ;;  %v10113_v52 = vld [vmem:[#allocation29_spill] sm:$0xff] }
 0x5bd   :  { %v4768_v27 = vadd.f32 %v4767_v36, %v4766_v33  ;;  %v4987_v31 = vsel %vm4976_vm2, %v4761_v28, %v4986_v34  ;;  %v4793_v59 = vrot.slane %v4792_v62, 2  ;;  %v4782_v22 = vadd.f32 %v4781_v2, %v4780_v8 }
 0x5be   :  { %v4774_v56 = vrot.slane %v4773_v30, 1  ;;  %v4804_v3 = vsel %vm1741_vm1, %v4654_v25, 0.0  ;;  %v4558_v11 = vpop.permute.xlu0 %4557  ;;  %v4786_v49 = vrot.slane %v4785_v50, 2 }
 0x5bf   :  { %v4805_v45 = vrot.slane %v4804_v3, 4  ;;  %v4548_v47 = vpop.permute.xlu1 %4547  ;;  %v4655_v44 = vmul.f32 %v4558_v11, %v10109_v19  ;;  %v4988_v51 = vsel %vm4978_vm3, %v4768_v27, %v4987_v31  ;;  %v4794_v29 = vadd.f32 %v4793_v59, %v4792_v62  ;;  %v10114_v62 = vld [vmem:[#allocation32_spill] sm:$0xff] }
 0x5c0   :  { %v4775_v54 = vadd.f32 %v4774_v56, %v4773_v30  ;;  %v4653_v40 = vmul.f32 %v4548_v47, %v10110_v13  ;;  %v4787_v10 = vadd.f32 %v4786_v49, %v4785_v50 }
 0x5c1   :  { %v4806_v23 = vadd.f32 %v4805_v45, %v4804_v3  ;;  %v4811_v26 = vsel %vm1741_vm1, %v4655_v44, 0.0  ;;  %v4795_v42 = vrot.slane %v4794_v29, 1 }
 0x5c2   :  { %v4797_v24 = vsel %vm1741_vm1, %v4653_v40, 0.0  ;;  %v4812_v12 = vrot.slane %v4811_v26, 4  ;;  %v4573_v58 = vpop.permute.xlu0 %4572  ;;  %v4989_v32 = vsel %vm4980_vm4, %v4775_v54, %v4988_v51  ;;  %v4788_v4 = vrot.slane %v4787_v10, 1  ;;  %v10115_v54 = vld [vmem:[#allocation31_spill] sm:$0xff] }
 0x5c3   :  { %v4807_v21 = vrot.slane %v4806_v23, 2  ;;  %v4798_v39 = vrot.slane %v4797_v24, 4  ;;  %v4563_v48 = vpop.permute.xlu1 %4562  ;;  %v4658_v46 = vmul.f32 %v4573_v58, %v10111_v15  ;;  %v4990_v53 = vsel %vm4982_vm5, %v4782_v22, %v4989_v32  ;;  %v10116_v32 = vld [vmem:[#allocation34_spill] sm:$0xff] }
 0x5c4   :  { %v4813_v41 = vadd.f32 %v4812_v12, %v4811_v26  ;;  %v4656_v38 = vmul.f32 %v4563_v48, %v10112_v17  ;;  %7111 = vmatmul.mubr.msk.f32.gmra.mxu1 %vm1741_vm1, %v4990_v53  ;;  %v4789_v8 = vadd.f32 %v4788_v4, %v4787_v10  ;;  %v4796_v25 = vadd.f32 %v4795_v42, %v4794_v29  ;;  %v10117_v29 = vld [vmem:[#allocation35_spill] sm:$0xff] }
 0x5c5   :  { %v4799_v18 = vadd.f32 %v4798_v39, %v4797_v24  ;;  %v4832_v9 = vsel %vm1741_vm1, %v4658_v46, 0.0  ;;  %v4808_v37 = vadd.f32 %v4807_v21, %v4806_v23  ;;  %7113 = vmatprep.mubr.msk.f32.mxu1 %vm7398_vm13, %v10089_v0 }
 0x5c6   :  { %v4814_v16 = vrot.slane %v4813_v41, 2  ;;  %v4818_v35 = vsel %vm1741_vm1, %v4656_v38, 0.0  ;;  %v4833_v20 = vrot.slane %v4832_v9, 4  ;;  %v4991_v50 = vsel %vm4970_vm14, %v4796_v25, %v4789_v8 }
 0x5c7   :  { %v4800_v7 = vrot.slane %v4799_v18, 2  ;;  %v4819_v1 = vrot.slane %v4818_v35, 4  ;;  %v4809_v6 = vrot.slane %v4808_v37, 1 }
 0x5c8   :  { %v4834_v5 = vadd.f32 %v4833_v20, %v4832_v9  ;;  %v4568_v33 = vpop.permute.xlu0 %4567  ;;  %v4815_v28 = vadd.f32 %v4814_v16, %v4813_v41 }
 0x5c9   :  { %v4801_v43 = vadd.f32 %v4800_v7, %v4799_v18  ;;  %v4820_v55 = vadd.f32 %v4819_v1, %v4818_v35  ;;  %v4583_v63 = vpop.permute.xlu1 %4582  ;;  %v4657_v14 = vmul.f32 %v4568_v33, %v10113_v52  ;;  %v4810_v3 = vadd.f32 %v4809_v6, %v4808_v37  ;;  %v10118_v35 = vld [vmem:[#allocation33_spill] sm:$0xff] }
 0x5ca   :  { %v4835_v36 = vrot.slane %v4834_v5, 2  ;;  %v4660_v61 = vmul.f32 %v4583_v63, %v10114_v62  ;;  %v4816_v11 = vrot.slane %v4815_v28, 1  ;;  %v10119_v33 = vld [vmem:[#allocation37_spill] sm:$0xff] }
 0x5cb   :  { %v4802_v34 = vrot.slane %v4801_v43, 1  ;;  %v4821_v30 = vrot.slane %v4820_v55, 2  ;;  %v4825_v57 = vsel %vm1741_vm1, %v4657_v14, 0.0 }
 0x5cc   :  { %v4846_v60 = vsel %vm1741_vm1, %v4660_v61, 0.0  ;;  %v4826_v27 = vrot.slane %v4825_v57, 4  ;;  %v4836_v56 = vadd.f32 %v4835_v36, %v4834_v5  ;;  %v4817_v26 = vadd.f32 %v4816_v11, %v4815_v28 }
 0x5cd   :  { %v4803_v2 = vadd.f32 %v4802_v34, %v4801_v43  ;;  %v4822_v31 = vadd.f32 %v4821_v30, %v4820_v55  ;;  %v4847_v59 = vrot.slane %v4846_v60, 4  ;;  %v10120_v30 = vld [vmem:[#allocation36_spill] sm:$0xff] }
 0x5ce   :  { %v4827_v45 = vadd.f32 %v4826_v27, %v4825_v57  ;;  %v4578_v47 = vpop.permute.xlu0 %4577  ;;  %v4837_v22 = vrot.slane %v4836_v56, 1 }
 0x5cf   :  { %v4992_v19 = vsel %vm4972_vm15, %v4803_v2, %v4991_v50  ;;  %v4823_v44 = vrot.slane %v4822_v31, 1  ;;  %v4659_v49 = vmul.f32 %v4578_v47, %v10115_v54  ;;  %v4848_v58 = vadd.f32 %v4847_v59, %v4846_v60 }
 0x5d0   :  { %v4828_v13 = vrot.slane %v4827_v45, 2  ;;  %v4993_v40 = vsel %vm4974_vm0, %v4810_v3, %v4992_v19  ;;  %v4838_v17 = vadd.f32 %v4837_v22, %v4836_v56 }
 0x5d1   :  { %v4839_v23 = vsel %vm1741_vm1, %v4659_v49, 0.0  ;;  %v4824_v12 = vadd.f32 %v4823_v44, %v4822_v31  ;;  %v4994_v48 = vsel %vm4976_vm2, %v4817_v26, %v4993_v40  ;;  %v4849_v16 = vrot.slane %v4848_v58, 2  ;;  %v10121_v44 = vld [vmem:[#allocation38_spill] sm:$0xff] }
 0x5d2   :  { %v4829_v51 = vadd.f32 %v4828_v13, %v4827_v45  ;;  %v4593_v10 = vpop.permute.xlu1 %4592  ;;  %v4840_v24 = vrot.slane %v4839_v23, 4 }
 0x5d3   :  { %v4662_v21 = vmul.f32 %v4593_v10, %v10116_v32  ;;  %v4598_v39 = vpop.permute.xlu0 %4597  ;;  %v4995_v42 = vsel %vm4978_vm3, %v4824_v12, %v4994_v48  ;;  %v4850_v61 = vadd.f32 %v4849_v16, %v4848_v58 }
 0x5d4   :  { %v4830_v15 = vrot.slane %v4829_v51, 1  ;;  %v4841_v46 = vadd.f32 %v4840_v24, %v4839_v23  ;;  %v4663_v41 = vmul.f32 %v4598_v39, %v10117_v29 }
 0x5d5   :  { %v4860_v38 = vsel %vm1741_vm1, %v4662_v21, 0.0  ;;  %v4851_v47 = vrot.slane %v4850_v61, 1 }
 0x5d6   :  { %v4831_v53 = vadd.f32 %v4830_v15, %v4829_v51  ;;  %v4861_v4 = vrot.slane %v4860_v38, 4  ;;  %v4842_v18 = vrot.slane %v4841_v46, 2  ;;  %v4588_v9 = vpop.permute.xlu1 %4587  ;;  %v4867_v37 = vsel %vm1741_vm1, %v4663_v41, 0.0 }
 0x5d7   :  { %v4661_v20 = vmul.f32 %v4588_v9, %v10118_v35  ;;  %v4868_v7 = vrot.slane %v4867_v37, 4  ;;  %v4608_v1 = vpop.permute.xlu0 %4607  ;;  %v4852_v12 = vadd.f32 %v4851_v47, %v4850_v61 }
 0x5d8   :  { %v4862_v5 = vadd.f32 %v4861_v4, %v4860_v38  ;;  %v4665_v8 = vmul.f32 %v4608_v1, %v10119_v33  ;;  %v4996_v43 = vsel %vm4980_vm4, %v4831_v53, %v4995_v42  ;;  %v4843_v55 = vadd.f32 %v4842_v18, %v4841_v46  ;;  %v5116_v1 = vld [vmem:[%s9972_s14 + $0x18] sm:$0xff]  ;;  %v5115_v42 = vld [vmem:[%s9972_s14 + $0x10] sm:$0xff]  ;;  %v5113_v33 = vld [vmem:[%s9972_s14] sm:$0xff] }
 0x5d9   :  { %v4853_v63 = vsel %vm1741_vm1, %v4661_v20, 0.0  ;;  %v4869_v52 = vadd.f32 %v4868_v7, %v4867_v37  ;;  %v4997_v14 = vsel %vm4982_vm5, %v4838_v17, %v4996_v43  ;;  %7136 = vmatprep.subr.mxu0 %v5116_v1 }
 0x5da   :  { %v4863_v6 = vrot.slane %v4862_v5, 2  ;;  %v4854_v28 = vrot.slane %v4853_v63, 4  ;;  %v4603_v36 = vpop.permute.xlu1 %4602  ;;  %v4881_v62 = vsel %vm1741_vm1, %v4665_v8, 0.0  ;;  %7114 = vmatmul.mubr.msk.f32.gmra.mxu1 %vm1741_vm1, %v4997_v14  ;;  %v4844_v2 = vrot.slane %v4843_v55, 1  ;;  %7137 = vmatpush3.msra.mxu0 %v5116_v1  ;;  %v9720_v8 = vld [vmem:[%s9971_s13] ss:$0 sm:$0xff] }
 0x5db   :  { %v4870_v34 = vrot.slane %v4869_v52, 2  ;;  %v4664_v57 = vmul.f32 %v4603_v36, %v10120_v30  ;;  %v4882_v25 = vrot.slane %v4881_v62, 4  ;;  %7116 = vmatprep.mubr.msk.f32.mxu1 %vm7398_vm13, %v10089_v0  ;;  %7138 = vmatprep.subr.mxu0 %v5115_v42 }
 0x5dc   :  { %v4855_v60 = vadd.f32 %v4854_v28, %v4853_v63  ;;  %v4864_v27 = vadd.f32 %v4863_v6, %v4862_v5  ;;  %v4845_v40 = vadd.f32 %v4844_v2, %v4843_v55  ;;  %7139 = vmatpush3.msra.mxu0 %v5115_v42  ;;  %v5114_v5 = vld [vmem:[%s9972_s14 + $0x8] sm:$0xff]  ;;  %v7132_v2 = vpop.f32.mrf.mxu0 }
 0x5dd   :  { %v4874_v31 = vsel %vm1741_vm1, %v4664_v57, 0.0  ;;  %v4883_v56 = vadd.f32 %v4882_v25, %v4881_v62  ;;  %v4871_v50 = vadd.f32 %v4870_v34, %v4869_v52  ;;  %7140 = vmatprep.subr.mxu0 %v5114_v5 }
 0x5de   :  { %v4856_v3 = vrot.slane %v4855_v60, 2  ;;  %v4875_v11 = vrot.slane %v4874_v31, 4  ;;  %v4613_v45 = vpop.permute.xlu1 %4612  ;;  %v4865_v13 = vrot.slane %v4864_v27, 1  ;;  %v4998_v48 = vsel %vm4970_vm14, %v4852_v12, %v4845_v40  ;;  %7141 = vmatpush3.msra.mxu0 %v5114_v5  ;;  %v9759_v40 = vld [vmem:[%s9973_s15] ss:$0 sm:$0xff] }
 0x5df   :  { %v4884_v19 = vrot.slane %v4883_v56, 2  ;;  %v4666_v59 = vmul.f32 %v4613_v45, %v10121_v44  ;;  %v4872_v51 = vrot.slane %v4871_v50, 1  ;;  %7142 = vmatprep.subr.mxu0 %v5113_v33 }
 0x5e0   :  { %v4857_v54 = vadd.f32 %v4856_v3, %v4855_v60  ;;  %v4876_v49 = vadd.f32 %v4875_v11, %v4874_v31  ;;  %v4866_v39 = vadd.f32 %v4865_v13, %v4864_v27  ;;  %7143 = vmatpush3.msra.mxu0 %v5113_v33  ;;  %v7373_v3 = vld [vmem:[#allocation2] ss:$0 sm:$0xff] }
 0x5e1   :  { %v4885_v22 = vadd.f32 %v4884_v19, %v4883_v56  ;;  %v4888_v23 = vsel %vm1741_vm1, %v4666_v59, 0.0  ;;  %v4873_v29 = vadd.f32 %v4872_v51, %v4871_v50  ;;  %7161 = vmatprep.subr.mxu0 %v10089_v0  ;;  %v5199_v56 = vpop.f32.mrf.mxu0 }
 0x5e2   :  { %v4858_v26 = vrot.slane %v4857_v54, 1  ;;  %v4877_v10 = vrot.slane %v4876_v49, 2  ;;  %v4889_v24 = vrot.slane %v4888_v23, 4 }
 0x5e3   :  { %v4886_v15 = vrot.slane %v4885_v22, 1  ;;  %v9752_v45 = vpop.f32.mrf.mxu0 }
 0x5e4   :  { %v4859_v58 = vadd.f32 %v4858_v26, %v4857_v54  ;;  %v4878_v32 = vadd.f32 %v4877_v10, %v4876_v49  ;;  %v4890_v21 = vadd.f32 %v4889_v24, %v4888_v23 }
 0x5e5   :  { %v4887_v9 = vadd.f32 %v4886_v15, %v4885_v22  ;;  %v9754_v59 = vpop.f32.mrf.mxu0 }
 0x5e6   :  { %v4999_v46 = vsel %vm4972_vm15, %v4859_v58, %v4998_v48  ;;  %v4879_v41 = vrot.slane %v4878_v32, 1  ;;  %v4891_v17 = vrot.slane %v4890_v21, 2  ;;  %v9765_v58 = vld [vmem:[%s9974_s16] ss:$0 sm:$0xff] }
 0x5e7   :  { %v5000_v38 = vsel %vm4974_vm0, %v4866_v39, %v4999_v46  ;;  %v3910_v46 = vld [vmem:[%s10088_s5 + $0x100] sm:$0xff] }
 0x5e8   :  { %v5001_v53 = vsel %vm4976_vm2, %v4873_v29, %v5000_v38  ;;  %v4880_v4 = vadd.f32 %v4879_v41, %v4878_v32  ;;  %v4892_v18 = vadd.f32 %v4891_v17, %v4890_v21  ;;  %vm3946_vm6 = vcmp.gt.s32.totalorder %v3910_v46, 0  ;;  %v3911_v38 = vld [vmem:[%s10088_s5 + $0x108] sm:$0xff] }
 0x5e9   :  { %vm3947_vm7 = vcmp.gt.s32.totalorder %v3911_v38, 0 }
 0x5ea   :  { %v4893_v37 = vrot.slane %v4892_v18, 1  ;;  %v5002_v16 = vsel %vm4978_vm3, %v4880_v4, %v5001_v53  ;;  %v3912_v53 = vld [vmem:[%s10088_s5 + $0x110] sm:$0xff] }
 0x5eb   :  { %v5003_v20 = vsel %vm4980_vm4, %v4887_v9, %v5002_v16  ;;  %vm3948_vm8 = vcmp.gt.s32.totalorder %v3912_v53, 0 }
 0x5ec   :  { %v4894_v35 = vadd.f32 %v4893_v37, %v4892_v18  ;;  %v3982_v18 = vsel %vm3946_vm6, 1.0, %v10089_v0  ;;  %v3913_v37 = vld [vmem:[%s10088_s5 + $0x118] sm:$0xff] }
 0x5ed   :  { %vm3949_vm9 = vcmp.gt.s32.totalorder %v3913_v37, 0 }
 0x5ee   :  { %v5004_v7 = vsel %vm4982_vm5, %v4894_v35, %v5003_v20  ;;  %v3983_v35 = vsel %vm3947_vm7, 1.0, %v10089_v0 }
 0x5ef   :  { %7117 = vmatmul.mubr.msk.f32.gmra.mxu1 %vm1741_vm1, %v5004_v7  ;;  %v3984_v7 = vsel %vm3948_vm8, 1.0, %v10089_v0 }
 0x5f0   :  { %7119 = vmatprep.mubr.msk.f32.mxu1 %vm7398_vm13, %v10089_v0 }
 0x604   :  { %v3825_v31 = vpop.xlane.xlu0 %3824 }
 0x605   :  { %v3874_v50 = vadd.f32 %v7373_v3, %v3825_v31 }
 0x607   :  { %v4050_v19 = vmul.f32 1.442695, %v3874_v50 }
 0x608   :  { %v3831_v11 = vpop.xlane.xlu0 %3830 }
 0x609   :  { %v3876_v54 = vadd.f32 %v7373_v3, %v3831_v11  ;;  %7339 = vpow2.f32 %v4050_v19 }
 0x60b   :  { %v4054_v26 = vmul.f32 1.442695, %v3876_v54 }
 0x60c   :  { %v3834_v49 = vpop.xlane.xlu0 %3833 }
 0x60d   :  { %v3877_v51 = vadd.f32 %v7373_v3, %v3834_v49 }
 0x60f   :  { %v4056_v39 = vmul.f32 1.442695, %v3877_v51 }
 0x610   :  { %v3828_v47 = vpop.xlane.xlu1 %3827 }
 0x611   :  { %v3875_v44 = vadd.f32 %v7373_v3, %v3828_v47 }
 0x613   :  { %v4052_v22 = vmul.f32 1.442695, %v3875_v44 }
 0x615   :  { %7341 = vpow2.f32 %v4052_v22 }
 0x616   :  { %7343 = vpow2.f32 %v4054_v26  ;;  %v7340_v4 = vpop.eup %7339 }
 0x617   :  { %7345 = vpow2.f32 %v4056_v39  ;;  %v9782_v9 = vmul.f32 %v7340_v4, %v3982_v18 }
 0x619   :  { %v4319_v1 = vsel %vm4094_vm10, %v9782_v9, 0.0 }
 0x622   :  { %v7342_v16 = vpop.eup %7341 }
 0x623   :  { %v7344_v20 = vpop.eup %7343  ;;  %v4091_v42 = vmul.f32 %v7342_v16, %v3983_v35 }
 0x624   :  { %v4092_v5 = vmul.f32 %v7344_v20, %v3984_v7  ;;  %v7346_v33 = vpop.eup %7345 }
 0x66a   :  { %v5084_v43 = vpop.f32.mrf.mxu1 }
 0x66b   :  { %v9723_v55 = vadd.f32 %v9720_v8, %v5084_v43  ;;  %v3985_v43 = vsel %vm3949_vm9, 1.0, %v10089_v0 }
 0x66c   :  { %v7109_v63 = vpop.f32.mrf.mxu1 }
 0x66d   :  { %v5108_v52 = vmax.f32 %v9723_v55, 0.0  ;;  %v4320_v63 = vrot.slane %v4319_v1, 4 }
 0x66f   :  { %7144 = vmatprep.mubr.msk.f32.mxu0 %vm1741_vm1, %v5108_v52 }
 0x684   :  { %v5089_v14 = vpop.f32.mrf.mxu1 }
 0x685   :  { %v9730_v6 = vadd.f32 %v9720_v8, %v5089_v14  ;;  %v4326_v14 = vsel %vm4094_vm10, %v4091_v42, 0.0 }
 0x686   :  { %v7112_v28 = vpop.f32.mrf.mxu1 }
 0x687   :  { %v5109_v36 = vmax.f32 %v9730_v6, 0.0  ;;  %v4333_v28 = vsel %vm4094_vm10, %v4092_v5, 0.0 }
 0x689   :  { %7145 = vmatmul.mubr.msk.f32.vlgmr.msra.gmra.mxu0 %vm1741_vm1, %v5109_v36 }
 0x69a   :  { %v5094_v62 = vpop.f32.mrf.mxu1 }
 0x69b   :  { %v9737_v61 = vadd.f32 %v9720_v8, %v5094_v62  ;;  %v4093_v62 = vmul.f32 %v7346_v33, %v3985_v43 }
 0x69c   :  { %v7115_v34 = vpop.f32.mrf.mxu1 }
 0x69d   :  { %v5110_v30 = vmax.f32 %v9737_v61, 0.0  ;;  %v4321_v34 = vadd.f32 %v4320_v63, %v4319_v1 }
 0x69f   :  { %7147 = vmatprep.mubr.msk.f32.mxu0 %vm1741_vm1, %v5110_v30  ;;  %v4322_v31 = vrot.slane %v4321_v34, 2 }
 0x6a1   :  { %v4323_v11 = vadd.f32 %v4322_v31, %v4321_v34 }
 0x6a3   :  { %v4324_v54 = vrot.slane %v4323_v11, 1 }
 0x6af   :  { %v5099_v57 = vpop.f32.mrf.mxu1 }
 0x6b0   :  { %v9744_v25 = vadd.f32 %v9720_v8, %v5099_v57  ;;  %v4327_v57 = vrot.slane %v4326_v14, 4 }
 0x6b1   :  { %v7118_v60 = vpop.f32.mrf.mxu1 }
 0x6b2   :  { %v5111_v27 = vmax.f32 %v9744_v25, 0.0  ;;  %v4334_v60 = vrot.slane %v4333_v28, 4 }
 0x6b4   :  { %7148 = vmatmul.mubr.msk.f32.gmra.mxu0 %vm1741_vm1, %v5111_v27  ;;  %v4335_v3 = vadd.f32 %v4334_v60, %v4333_v28 }
 0x6b5   :  { %7169 = vmatprep.mubr.msk.f32.mxu0 %vm7398_vm13, %v10089_v0 }
 0x6b6   :  { %v4336_v19 = vrot.slane %v4335_v3, 2 }
 0x749   :  { %v7146_v13 = vpop.f32.mrf.mxu0 }
 0x74a   :  { %v5302_v23 = vadd.f32 %v7146_v13, %v7132_v2  ;;  %v4340_v2 = vsel %vm4094_vm10, %v4093_v62, 0.0  ;;  %v4337_v13 = vadd.f32 %v4336_v19, %v4335_v3 }
 0x74b   :  { %v5296_v10 = vpop.f32.mrf.mxu0  ;;  %v4341_v50 = vrot.slane %v4340_v2, 4 }
 0x74c   :  { %v5323_v24 = vadd.f32 %v9759_v40, %v5302_v23  ;;  %v5297_v12 = vadd.f32 %v5296_v10, %v5199_v56  ;;  %v4328_v56 = vadd.f32 %v4327_v57, %v4326_v14  ;;  %v4325_v10 = vadd.f32 %v4324_v54, %v4323_v11  ;;  %v6234_v14 = vld [vmem:[#allocation3] ss:$0 sm:$0xff] }
 0x74d   :  { %v4342_v44 = vadd.f32 %v4341_v50, %v4340_v2 }
 0x74e   :  { %v5327_v32 = vmax.f32 %v5323_v24, 0.0  ;;  %v5322_v21 = vadd.f32 %v9759_v40, %v5297_v12  ;;  %v4329_v47 = vrot.slane %v4328_v56, 2  ;;  %v4379_v46 = vadd.f32 1e-10, %v4325_v10 }
 0x74f   :  { %v4343_v22 = vrot.slane %v4342_v44, 2 }
 0x750   :  { %v5326_v48 = vmax.f32 %v5322_v21, 0.0  ;;  %v5338_v15 = vmul.f32 %v9765_v58, %v5327_v32  ;;  %v4330_v49 = vadd.f32 %v4329_v47, %v4328_v56  ;;  %v4338_v21 = vrot.slane %v4337_v13, 1 }
 0x751   :  { %v4344_v39 = vadd.f32 %v4343_v22, %v4342_v44  ;;  %7347 = vrcp.f32 %v4379_v46 }
 0x752   :  { %v5344_v29 = vsel %vm1741_vm1, %v5338_v15, 0.0  ;;  %v5337_v41 = vmul.f32 %v9765_v58, %v5326_v48  ;;  %v4331_v24 = vrot.slane %v4330_v49, 1  ;;  %v4339_v38 = vadd.f32 %v4338_v21, %v4337_v13 }
 0x753   :  { %5345 = vadd.xlane.f32.xlu0 %v5344_v29  ;;  %v4345_v53 = vrot.slane %v4344_v39, 1 }
 0x754   :  { %v5341_v17 = vsel %vm1741_vm1, %v5337_v41, 0.0  ;;  %v4332_v29 = vadd.f32 %v4331_v24, %v4330_v49  ;;  %v4381_v37 = vadd.f32 1e-10, %v4339_v38 }
 0x755   :  { %5342 = vadd.xlane.f32.xlu1 %v5341_v17  ;;  %v4346_v16 = vadd.f32 %v4345_v53, %v4344_v39 }
 0x756   :  { %v4380_v18 = vadd.f32 1e-10, %v4332_v29 }
 0x758   :  { %7349 = vrcp.f32 %v4380_v18 }
 0x759   :  { %7351 = vrcp.f32 %v4381_v37 }
 0x75e   :  { %v7348_v35 = vpop.eup %7347 }
 0x75f   :  { %v4448_v7 = vmul.f32 %v7348_v35, %v9782_v9  ;;  %v5365_v9 = vld [vmem:[%s10122_s27 + $0x8] sm:$0xff] }
 0x760   :  { %vm5369_vm11 = vcmp.gt.s32.totalorder %v5365_v9, 0 }
 0x765   :  { %v7350_v20 = vpop.eup %7349 }
 0x766   :  { %v7352_v1 = vpop.eup %7351  ;;  %v4450_v33 = vmul.f32 %v7350_v20, %v4091_v42  ;;  %v5364_v42 = vld [vmem:[%s10122_s27] sm:$0xff] }
 0x767   :  { %vm5368_vm12 = vcmp.gt.s32.totalorder %v5364_v42, 0  ;;  %v10126_v42 = vld [vmem:[#allocation42_spill] sm:$0xff] }
 0x768   :  { %v5372_v56 = vsel %vm5368_vm12, 1.0, %v10089_v0 }
 0x774   :  { %v7149_v23 = vpop.f32.mrf.mxu0 }
 0x775   :  { %v5312_v26 = vadd.f32 %v7149_v23, %v9752_v45 }
 0x776   :  { %v5306_v51 = vpop.f32.mrf.mxu0 }
 0x777   :  { %v5325_v12 = vadd.f32 %v9759_v40, %v5312_v26  ;;  %v5307_v32 = vadd.f32 %v5306_v51, %v9754_v59 }
 0x779   :  { %v5329_v48 = vmax.f32 %v5325_v12, 0.0  ;;  %v5324_v15 = vadd.f32 %v9759_v40, %v5307_v32  ;;  %v4382_v40 = vadd.f32 1e-10, %v4346_v16 }
 0x77b   :  { %v5328_v41 = vmax.f32 %v5324_v15, 0.0  ;;  %v5340_v17 = vmul.f32 %v9765_v58, %v5329_v48  ;;  %7353 = vrcp.f32 %v4382_v40  ;;  %v10124_v40 = vld [vmem:[#allocation40_spill] sm:$0xff] }
 0x77d   :  { %v5350_v45 = vsel %vm1741_vm1, %v5340_v17, 0.0  ;;  %v5339_v4 = vmul.f32 %v9765_v58, %v5328_v41  ;;  %v4452_v58 = vmul.f32 %v7352_v1, %v4092_v5  ;;  %v5373_v5 = vsel %vm5369_vm11, 1.0, %v10089_v0 }
 0x77e   :  { %5351 = vadd.xlane.f32.xlu0 %v5350_v45  ;;  %v10123_v45 = vld [vmem:[#allocation39_spill] sm:$0xff] }
 0x77f   :  { %v5347_v59 = vsel %vm1741_vm1, %v5339_v4, 0.0 }
 0x780   :  { %5348 = vadd.xlane.f32.xlu1 %v5347_v59 }
 0x788   :  { %v7354_v43 = vpop.eup %7353 }
 0x789   :  { %v4454_v63 = vmul.f32 %v7354_v43, %v4093_v62  ;;  %v10125_v43 = vld [vmem:[#allocation41_spill] sm:$0xff] }
 0x791   :  { %4617 = vperm.xlu1 %7210, %v4448_v7  }
 0x794   :  { %4622 = vperm.xlu0 %7209, %v4450_v33   ;;  %v5367_v33 = vld [vmem:[%s10122_s27 + $0x18] sm:$0xff] }
 0x795   :  { %4627 = vperm.xlu1 %7210, %v4452_v58   ;;  %vm5371_vm2 = vcmp.gt.s32.totalorder %v5367_v33, 0 }
 0x799   :  { %4632 = vperm.xlu1 %7210, %v4454_v63  }
 0x7dc   :  { %v5346_v28 = vpop.xlane.xlu0 %5345 }
 0x7dd   :  { %v5361_v34 = vadd.f32 %v6234_v14, %v5346_v28 }
 0x7de   :  { %v5343_v57 = vpop.xlane.xlu1 %5342 }
 0x7df   :  { %v5378_v60 = vmul.f32 1.442695, %v5361_v34  ;;  %v5360_v2 = vadd.f32 %v6234_v14, %v5343_v57  ;;  %v5366_v34 = vld [vmem:[%s10122_s27 + $0x10] sm:$0xff] }
 0x7e0   :  { %vm5370_vm3 = vcmp.gt.s32.totalorder %v5366_v34, 0 }
 0x7e1   :  { %7355 = vpow2.f32 %v5378_v60  ;;  %v5376_v31 = vmul.f32 1.442695, %v5360_v2 }
 0x7e3   :  { %7357 = vpow2.f32 %v5376_v31 }
 0x7ee   :  { %v7356_v62 = vpop.eup %7355 }
 0x7ef   :  { %v5385_v3 = vmul.f32 %v7356_v62, %v5373_v5 }
 0x7f0   :  { %v7358_v50 = vpop.eup %7357 }
 0x7f1   :  { %v5395_v11 = vsel %vm4094_vm10, %v5385_v3, 0.0  ;;  %v5384_v47 = vmul.f32 %v7358_v50, %v5372_v56  ;;  %v5375_v50 = vsel %vm5371_vm2, 1.0, %v10089_v0 }
 0x7f2   :  { %v5396_v19 = vrot.slane %v5395_v11, 4 }
 0x7f3   :  { %v5388_v44 = vsel %vm4094_vm10, %v5384_v47, 0.0 }
 0x7f4   :  { %v5397_v54 = vadd.f32 %v5396_v19, %v5395_v11  ;;  %v5389_v49 = vrot.slane %v5388_v44, 4 }
 0x7f6   :  { %v5398_v13 = vrot.slane %v5397_v54, 2  ;;  %v5390_v22 = vadd.f32 %v5389_v49, %v5388_v44  ;;  %v5374_v49 = vsel %vm5370_vm3, 1.0, %v10089_v0 }
 0x7f8   :  { %v5399_v23 = vadd.f32 %v5398_v13, %v5397_v54  ;;  %v5391_v26 = vrot.slane %v5390_v22, 2 }
 0x7fa   :  { %v5400_v51 = vrot.slane %v5399_v23, 1  ;;  %v5392_v10 = vadd.f32 %v5391_v26, %v5390_v22 }
 0x7fc   :  { %v5401_v24 = vadd.f32 %v5400_v51, %v5399_v23  ;;  %v5393_v12 = vrot.slane %v5392_v10, 1 }
 0x7fe   :  { %v5417_v32 = vadd.f32 1e-10, %v5401_v24  ;;  %v5394_v21 = vadd.f32 %v5393_v12, %v5392_v10 }
 0x800   :  { %7359 = vrcp.f32 %v5417_v32  ;;  %v5416_v39 = vadd.f32 1e-10, %v5394_v21 }
 0x802   :  { %7361 = vrcp.f32 %v5416_v39 }
 0x807   :  { %v5352_v48 = vpop.xlane.xlu0 %5351 }
 0x808   :  { %v5363_v15 = vadd.f32 %v6234_v14, %v5352_v48 }
 0x809   :  { %v5349_v46 = vpop.xlane.xlu1 %5348 }
 0x80a   :  { %v5382_v29 = vmul.f32 1.442695, %v5363_v15  ;;  %v5362_v41 = vadd.f32 %v6234_v14, %v5349_v46  ;;  %v5483_v46 = vld [vmem:[%s9975_s18 + $0x18] sm:$0xff] }
 0x80b   :  { %7151 = vmatpush3.msra.mxu1 %v5483_v46 }
 0x80c   :  { %7363 = vpow2.f32 %v5382_v29  ;;  %v5380_v17 = vmul.f32 1.442695, %v5362_v41  ;;  %7152 = vmatprep.subr.mxu1 %v10089_v0 }
 0x80d   :  { %v4618_v38 = vpop.permute.xlu1 %4617  ;;  %v7360_v53 = vpop.eup %7359 }
 0x80e   :  { %7365 = vpow2.f32 %v5380_v17  ;;  %v4667_v4 = vmul.f32 %v4618_v38, %v10123_v45  ;;  %v5423_v59 = vmul.f32 %v7360_v53, %v5385_v3 }
 0x80f   :  { %v4623_v18 = vpop.permute.xlu0 %4622  ;;  %v7362_v37 = vpop.eup %7361 }
 0x810   :  { %v4895_v16 = vsel %vm1741_vm1, %v4667_v4, 0.0  ;;  %v4668_v35 = vmul.f32 %v4623_v18, %v10124_v40  ;;  %5435 = vperm.xlu1 %7210, %v5423_v59   ;;  %v5421_v1 = vmul.f32 %v7362_v37, %v5384_v47 }
 0x811   :  { %v4896_v20 = vrot.slane %v4895_v16, 4  ;;  %v4628_v7 = vpop.permute.xlu1 %4627 }
 0x812   :  { %v4902_v58 = vsel %vm1741_vm1, %v4668_v35, 0.0  ;;  %v4669_v63 = vmul.f32 %v4628_v7, %v10125_v43  ;;  %5430 = vperm.xlu0 %7209, %v5421_v1  }
 0x813   :  { %v4897_v14 = vadd.f32 %v4896_v20, %v4895_v16  ;;  %v4903_v28 = vrot.slane %v4902_v58, 4 }
 0x814   :  { %v4909_v57 = vsel %vm1741_vm1, %v4669_v63, 0.0 }
 0x815   :  { %v4898_v60 = vrot.slane %v4897_v14, 2  ;;  %v4904_v2 = vadd.f32 %v4903_v28, %v4902_v58  ;;  %v4910_v31 = vrot.slane %v4909_v57, 4  ;;  %v4633_v9 = vpop.permute.xlu1 %4632 }
 0x816   :  { %v4670_v5 = vmul.f32 %v4633_v9, %v10126_v42  ;;  %v5480_v9 = vld [vmem:[%s9975_s18] sm:$0xff]  ;;  %v5578_v42 = vld [vmem:[%s9977_s20 + $0x38] sm:$0xff] }
 0x817   :  { %v4899_v62 = vadd.f32 %v4898_v60, %v4897_v14  ;;  %v4905_v56 = vrot.slane %v4904_v2, 2  ;;  %v4911_v3 = vadd.f32 %v4910_v31, %v4909_v57  ;;  %v5481_v31 = vld [vmem:[%s9975_s18 + $0x8] sm:$0xff]  ;;  %7162 = vmatpush3.msra.mxu0 %v5578_v42 }
 0x818   :  { %v4916_v11 = vsel %vm1741_vm1, %v4670_v5, 0.0  ;;  %v5577_v5 = vld [vmem:[%s9977_s20 + $0x30] sm:$0xff]  ;;  %7163 = vmatprep.subr.mxu0 %v10089_v0 }
 0x819   :  { %v7364_v47 = vpop.eup %7363  ;;  %v4906_v19 = vadd.f32 %v4905_v56, %v4904_v2  ;;  %v4912_v44 = vrot.slane %v4911_v3, 2  ;;  %v4917_v54 = vrot.slane %v4916_v11, 4  ;;  %v4900_v23 = vrot.slane %v4899_v62, 1  ;;  %v5482_v2 = vld [vmem:[%s9975_s18 + $0x10] sm:$0xff]  ;;  %7164 = vmatpush3.msra.mxu0 %v5577_v5  ;;  %v6239_v5 = vld [vmem:[%s9978_s21] ss:$0 sm:$0xff] }
 0x81a   :  { %v5387_v13 = vmul.f32 %v7364_v47, %v5375_v50  ;;  %7153 = vmatpush3.msra.mxu1 %v5482_v2  ;;  %7165 = vmatprep.subr.mxu0 %v10089_v0  ;;  %v5735_v2 = vld [vmem:[%s9979_s22 + $0x8] sm:$0xff] }
 0x81b   :  { %v7366_v22 = vpop.eup %7365  ;;  %v4907_v26 = vrot.slane %v4906_v19, 1  ;;  %v4913_v51 = vadd.f32 %v4912_v44, %v4911_v3  ;;  %v4918_v10 = vadd.f32 %v4917_v54, %v4916_v11  ;;  %v4901_v29 = vadd.f32 %v4900_v23, %v4899_v62  ;;  %7154 = vmatprep.subr.mxu1 %v10089_v0 }
 0x81c   :  { %v5409_v24 = vsel %vm4094_vm10, %v5387_v13, 0.0  ;;  %v5386_v12 = vmul.f32 %v7366_v22, %v5374_v49  ;;  %7155 = vmatpush3.msra.mxu1 %v5481_v31  ;;  %v5734_v31 = vld [vmem:[%s9979_s22] sm:$0xff] }
 0x81d   :  { %v4908_v32 = vadd.f32 %v4907_v26, %v4906_v19  ;;  %v4914_v21 = vrot.slane %v4913_v51, 1  ;;  %v4919_v39 = vrot.slane %v4918_v10, 2  ;;  %v5410_v48 = vrot.slane %v5409_v24, 4  ;;  %7156 = vmatprep.subr.mxu1 %v10089_v0 }
 0x81e   :  { %v5402_v15 = vsel %vm4094_vm10, %v5386_v12, 0.0  ;;  %7157 = vmatpush3.msra.mxu1 %v5480_v9  ;;  %v5822_v9 = vld [vmem:[%s9981_s24 + $0x18] sm:$0xff]  ;;  %vm5904_vm10 = vcmask 257024  }
 0x81f   :  { %v4920_v41 = vadd.f32 %v4919_v39, %v4918_v10  ;;  %v5411_v17 = vadd.f32 %v5410_v48, %v5409_v24  ;;  %v4915_v38 = vadd.f32 %v4914_v21, %v4913_v51  ;;  %v5403_v53 = vrot.slane %v5402_v15, 4  ;;  %7172 = vmatprep.subr.mxu1 %v10089_v0 }
 0x820   :  { %v5005_v4 = vsel %vm4970_vm14, %v4908_v32, %v4901_v29 }
 0x821   :  { %v4921_v45 = vrot.slane %v4920_v41, 1  ;;  %v5412_v18 = vrot.slane %v5411_v17, 2  ;;  %v5404_v59 = vadd.f32 %v5403_v53, %v5402_v15  ;;  %v5006_v40 = vsel %vm4972_vm15, %v4915_v38, %v5005_v4  ;;  %v5574_v4 = vld [vmem:[%s9977_s20 + $0x18] sm:$0xff] }
 0x823   :  { %v4922_v37 = vadd.f32 %v4921_v45, %v4920_v41  ;;  %v5413_v16 = vadd.f32 %v5412_v18, %v5411_v17  ;;  %v5405_v35 = vrot.slane %v5404_v59, 2 }
 0x825   :  { %v5007_v20 = vsel %vm4974_vm0, %v4922_v37, %v5006_v40  ;;  %v5414_v7 = vrot.slane %v5413_v16, 1  ;;  %v5406_v1 = vadd.f32 %v5405_v35, %v5404_v59  ;;  %v5573_v59 = vld [vmem:[%s9977_s20 + $0x10] sm:$0xff]  ;;  %v5572_v37 = vld [vmem:[%s9977_s20 + $0x8] sm:$0xff] }
 0x826   :  { %7120 = vmatmul.mubr.msk.f32.gmra.mxu1 %vm1741_vm1, %v5007_v20 }
 0x827   :  { %v5415_v33 = vadd.f32 %v5414_v7, %v5413_v16  ;;  %7158 = vmatprep.mubr.msk.f32.mxu1 %vm7398_vm13, %v10089_v0  ;;  %v5407_v58 = vrot.slane %v5406_v1, 1  ;;  %v5571_v16 = vld [vmem:[%s9977_s20] sm:$0xff] }
 0x829   :  { %v5419_v43 = vadd.f32 1e-10, %v5415_v33  ;;  %v5408_v63 = vadd.f32 %v5407_v58, %v5406_v1  ;;  %v5576_v1 = vld [vmem:[%s9977_s20 + $0x28] sm:$0xff]  ;;  %v5575_v33 = vld [vmem:[%s9977_s20 + $0x20] sm:$0xff] }
 0x82a   :  { %7166 = vmatpush3.msra.mxu0 %v5576_v1 }
 0x82b   :  { %7367 = vrcp.f32 %v5419_v43  ;;  %v5418_v14 = vadd.f32 1e-10, %v5408_v63  ;;  %7167 = vmatprep.subr.mxu0 %v10089_v0 }
 0x82c   :  { %7168 = vmatpush3.msra.mxu0 %v5575_v33 }
 0x82d   :  { %7369 = vrcp.f32 %v5418_v14  ;;  %7183 = vmatprep.subr.mxu0 %v10089_v0 }
 0x838   :  { %v7368_v28 = vpop.eup %7367 }
 0x839   :  { %v5427_v34 = vmul.f32 %v7368_v28, %v5387_v13 }
 0x83a   :  { %v7370_v57 = vpop.eup %7369 }
 0x83b   :  { %5445 = vperm.xlu1 %7210, %v5427_v34   ;;  %v5425_v60 = vmul.f32 %v7370_v57, %v5386_v12  ;;  %v5737_v57 = vld [vmem:[%s9979_s22 + $0x18] sm:$0xff] }
 0x83d   :  { %5440 = vperm.xlu0 %7209, %v5425_v60   ;;  %v5736_v60 = vld [vmem:[%s9979_s22 + $0x10] sm:$0xff] }
 0x88b   :  { %v5436_v56 = vpop.permute.xlu1 %5435 }
 0x88c   :  { %v5449_v50 = vmul.f32 %v5436_v56, %v5109_v36 }
 0x88d   :  { %v5431_v62 = vpop.permute.xlu0 %5430 }
 0x88e   :  { %v5448_v3 = vmul.f32 %v5431_v62, %v5108_v52  ;;  %v5459_v47 = vsel %vm1741_vm1, %v5449_v50, 0.0 }
 0x88f   :  { %v5460_v44 = vrot.slane %v5459_v47, 4 }
 0x890   :  { %v5452_v11 = vsel %vm1741_vm1, %v5448_v3, 0.0 }
 0x891   :  { %v5453_v19 = vrot.slane %v5452_v11, 4  ;;  %v5461_v49 = vadd.f32 %v5460_v44, %v5459_v47  ;;  %v5820_v47 = vld [vmem:[%s9981_s24 + $0x8] sm:$0xff]  ;;  %v6240_v44 = vld [vmem:[%s9980_s23] ss:$0 sm:$0xff]  ;;  %s7374_s23 = scalar_lea.vmem %s5913_s6, 64 }
 0x892   :  { %p7375_p0 = scmp.ne.s32.totalorder %s5913_s6, %s7374_s23  ;;  %p7380_p2 = scmp.lt.s32.totalorder %s7374_s23, %s7374_s23 }
 0x893   :  { %v5454_v54 = vadd.f32 %v5453_v19, %v5452_v11  ;;  %v5462_v52 = vrot.slane %v5461_v49, 2  ;;  %v5821_v11 = vld [vmem:[%s9981_s24 + $0x10] sm:$0xff]  ;;  %v5819_v19 = vld [vmem:[%s9981_s24] sm:$0xff] }
 0x894   :  { %p7381_p3 = por %p7380_p2, %p7379_p1 }
 0x895   :  { %v5455_v23 = vrot.slane %v5454_v54, 2  ;;  %v5463_v32 = vadd.f32 %v5462_v52, %v5461_v49 }
 0x896   :  { %p7382_p4 = pnand %p7381_p3, %p7375_p0 }
 0x897   :  { %v5456_v36 = vadd.f32 %v5455_v23, %v5454_v54  ;;  %v5464_v15 = vrot.slane %v5463_v32, 1  ;;  %v6242_v23 = vld [vmem:[%s9982_s25] ss:$0 sm:$0xff] }
 0x899   :  { %v5457_v48 = vrot.slane %v5456_v36, 1  ;;  %v5465_v38 = vadd.f32 %v5464_v15, %v5463_v32 }
 0x89b   :  { %v5458_v29 = vadd.f32 %v5457_v48, %v5456_v36 }
 0x89d   :  { %v5495_v61 = vsel %vm4970_vm14, %v5465_v38, %v5458_v29 }
 0x8b6   :  { %v5446_v13 = vpop.permute.xlu1 %5445 }
 0x8b7   :  { %v5451_v22 = vmul.f32 %v5446_v13, %v5111_v27 }
 0x8b8   :  { %v5441_v55 = vpop.permute.xlu0 %5440 }
 0x8b9   :  { %v5473_v26 = vsel %vm1741_vm1, %v5451_v22, 0.0  ;;  %v5450_v6 = vmul.f32 %v5441_v55, %v5110_v30 }
 0x8ba   :  { %v5474_v51 = vrot.slane %v5473_v26, 4 }
 0x8bb   :  { %v5466_v24 = vsel %vm1741_vm1, %v5450_v6, 0.0 }
 0x8bc   :  { %v5475_v10 = vadd.f32 %v5474_v51, %v5473_v26  ;;  %v5467_v12 = vrot.slane %v5466_v24, 4 }
 0x8be   :  { %v5476_v21 = vrot.slane %v5475_v10, 2  ;;  %v5468_v39 = vadd.f32 %v5467_v12, %v5466_v24 }
 0x8c0   :  { %v5477_v25 = vadd.f32 %v5476_v21, %v5475_v10  ;;  %v5469_v27 = vrot.slane %v5468_v39, 2 }
 0x8c2   :  { %v5470_v46 = vadd.f32 %v5469_v27, %v5468_v39  ;;  %v5478_v41 = vrot.slane %v5477_v25, 1 }
 0x8c4   :  { %v5471_v17 = vrot.slane %v5470_v46, 1  ;;  %v5479_v30 = vadd.f32 %v5478_v41, %v5477_v25 }
 0x8c6   :  { %v5472_v53 = vadd.f32 %v5471_v17, %v5470_v46 }
 0x8c8   :  { %v5496_v45 = vsel %vm4972_vm15, %v5472_v53, %v5495_v61 }
 0x8c9   :  { %v5497_v18 = vsel %vm4974_vm0, %v5479_v30, %v5496_v45 }
 0x8ca   :  { %7159 = vmatmul.mubr.msk.f32.vlgmr.msra.gmra.mxu1 %vm1741_vm1, %v5497_v18 }
 0x8cb   :  { %7173 = vmatpush3.msra.mxu1 %v5574_v4  ;;  %7180 = vmatprep.mubr.msk.f32.mxu1 %vm7398_vm13, %v10089_v0 }
 0x8cc   :  { %7174 = vmatprep.subr.mxu1 %v10089_v0 }
 0x8cd   :  { %7175 = vmatpush3.msra.mxu1 %v5573_v59 }
 0x8ce   :  { %7176 = vmatprep.subr.mxu1 %v10089_v0 }
 0x8cf   :  { %7177 = vmatpush3.msra.mxu1 %v5572_v37 }
 0x8d0   :  { %7178 = vmatprep.subr.mxu1 %v10089_v0 }
 0x8d1   :  { %7179 = vmatpush3.msra.mxu1 %v5571_v16 }
 0x8d2   :  { %7194 = vmatprep.subr.mxu1 %v10089_v0 }
 0x8e6   :  { %v5104_v40 = vpop.f32.mrf.mxu1 }
 0x8e7   :  { %v5105_v35 = vadd.f32 %v9720_v8, %v5104_v40  ;;  %v6235_v8 = vld [vmem:[%s9976_s19] ss:$0 sm:$0xff] }
 0x8e8   :  { %v7121_v20 = vpop.f32.mrf.mxu1 }
 0x8e9   :  { %v5112_v7 = vmax.f32 %v5105_v35, 0.0 }
 0x8eb   :  { %7181 = vmatmul.mubr.msk.f32.vlgmr.msra.gmra.mxu1 %vm1741_vm1, %v5112_v7 }
 0x8ec   :  { %7202 = vmatprep.mubr.msk.f32.mxu1 %vm7398_vm13, %v10089_v0  ;;  %7195 = vmatpush3.msra.mxu1 %v5822_v9 }
 0x8ed   :  { %7196 = vmatprep.subr.mxu1 %v10089_v0 }
 0x8ee   :  { %7197 = vmatpush3.msra.mxu1 %v5821_v11 }
 0x8ef   :  { %7198 = vmatprep.subr.mxu1 %v10089_v0 }
 0x8f0   :  { %7199 = vmatpush3.msra.mxu1 %v5820_v47 }
 0x8f1   :  { %7200 = vmatprep.subr.mxu1 %v10089_v0 }
 0x8f2   :  { %7201 = vmatpush3.msra.mxu1 %v5819_v19 }
 0x98a   :  { %v5566_v58 = vpop.f32.mrf.mxu1 }
 0x98b   :  { %v5567_v43 = vadd.f32 %v6235_v8, %v5566_v58 }
 0x98c   :  { %v7160_v63 = vpop.f32.mrf.mxu1 }
 0x98d   :  { %v5570_v14 = vmax.f32 %v5567_v43, 0.0 }
 0x98f   :  { %7170 = vmatmul.mubr.msk.f32.vlgmr.msra.gmra.mxu0 %vm1741_vm1, %v5570_v14 }
 0x990   :  { %7191 = vmatprep.mubr.msk.f32.mxu0 %vm7398_vm13, %v10089_v0  ;;  %7184 = vmatpush3.msra.mxu0 %v5737_v57 }
 0x991   :  { %7185 = vmatprep.subr.mxu0 %v10089_v0 }
 0x992   :  { %7186 = vmatpush3.msra.mxu0 %v5736_v60 }
 0x993   :  { %7187 = vmatprep.subr.mxu0 %v10089_v0 }
 0x994   :  { %7188 = vmatpush3.msra.mxu0 %v5735_v2 }
 0x995   :  { %7189 = vmatprep.subr.mxu0 %v10089_v0 }
 0x996   :  { %7190 = vmatpush3.msra.mxu0 %v5734_v31 }
 0x9ab   :  { %v5721_v28 = vpop.f32.mrf.mxu1 }
 0x9ad   :  { %v7182_v34 = vpop.f32.mrf.mxu1 }
 0xa4f   :  { %v5648_v42 = vpop.f32.mrf.mxu0 }
 0xa50   :  { %v5722_v62 = vadd.f32 %v5721_v28, %v5648_v42 }
 0xa51   :  { %v7171_v56 = vpop.f32.mrf.mxu0 }
 0xa52   :  { %v5732_v3 = vadd.f32 %v6239_v5, %v5722_v62 }
 0xa54   :  { %v5733_v50 = vmax.f32 %v5732_v3, 0.0 }
 0xa56   :  { %7192 = vmatmul.mubr.msk.f32.vlgmr.msra.gmra.mxu0 %vm1741_vm1, %v5733_v50 }
 0xb16   :  { %v5814_v54 = vpop.f32.mrf.mxu0 }
 0xb17   :  { %v5815_v49 = vadd.f32 %v6240_v44, %v5814_v54 }
 0xb18   :  { %v7193_v13 = vpop.f32.mrf.mxu0 }
 0xb19   :  { %v5818_v22 = vmax.f32 %v5815_v49, 0.0 }
 0xb1b   :  { %7203 = vmatmul.mubr.msk.f32.vlgmr.msra.gmra.mxu1 %vm1741_vm1, %v5818_v22 }
 0xbdb   :  { %v5899_v0 = vpop.f32.mrf.mxu1 }
 0xbdc   :  { %v5900_v26 = vadd.f32 %v6242_v23, %v5899_v0 }
 0xbdd   :  { %v7204_v55 = vpop.f32.mrf.mxu1 }
 0xbde   :  { %v5903_v52 = vmax.f32 %v5900_v26, 0.0 }
 0xbe0   :  { %5905 = vst.msk [vmem:[#allocation4] sm:$0xf] %vm5904_vm10, %v5903_v52 }
 0xbe1   :  { %7385 = shalt.err (!%p7382_p4)
}
 0xbe2   :  { %5915 = dma.vmem_to_hbm [thread:$0]  %s5913_s6, 64, %s9983_s26, [#allocation5]  }
 0xbe3   :  { %7394 = dma.done.wait [#allocation5], 64  }
 0xbe4   :  { %7395 = vsyncadd [#allocation5], 4294967232 }
 0xbe5   :  { %5919 = vsyncpa [#allocation5], 1 }

</bundles_post_ra>
